<compile_context>
chip_gen: v7x
topology: tpu7x:2x2x1
jax: 0.10.0
libtpu: 0.0.40
codegen_flags: <defaults>
</compile_context>

<pallas_src>
import functools

import jax
import jax.numpy as jnp
from jax import lax
from jax.experimental import pallas as pl
from jax.experimental.pallas import tpu as pltpu

EPS_NORM = 1e-12     # F.normalize eps
EPS_LN = 1e-5        # nn.LayerNorm eps
NEG_INF = -1e30


# ---------------------------------------------------------------------------
# small helpers
# ---------------------------------------------------------------------------

def _round_up(x, m):
    return ((x + m - 1) // m) * m


def _row_tile(m):
    """Row tile for row-parallel kernels: multiple of 8, never a full-M VMEM cliff."""
    for t in (512, 256, 128, 64, 32, 16, 8):
        if m >= 2 * t:
            return t
    return 8


def _attn_tile(n):
    """Query/key tile for flash attention; full N when small, 256 otherwise."""
    return n if n <= 256 else 256


_VMEM_LIMIT = None


def _vmem_limit_bytes():
    global _VMEM_LIMIT
    if _VMEM_LIMIT is None:
        try:
            cap = int(pltpu.get_tpu_info().vmem_capacity_bytes)
            _VMEM_LIMIT = int(min((cap * 3) // 4, 96 * 1024 * 1024))
        except Exception:
            _VMEM_LIMIT = 64 * 1024 * 1024
    return _VMEM_LIMIT


def _cparams(dimension_semantics):
    return pltpu.CompilerParams(dimension_semantics=dimension_semantics,
                                vmem_limit_bytes=_vmem_limit_bytes())


_SINGLE_BUF_OK = None


def _single_buffer_supported():
    """Probe whether pipeline_mode=pl.Buffered(1) works on this runtime (saves the
    second VMEM buffer for grid-invariant weight blocks)."""
    global _SINGLE_BUF_OK
    if _SINGLE_BUF_OK is not None:
        return _SINGLE_BUF_OK
    try:
        def _probe(x_ref, w_ref, o_ref):
            o_ref[...] = x_ref[...] + w_ref[...]

        w_spec = pl.BlockSpec((8, 128), lambda i: (0, 0), pipeline_mode=pl.Buffered(1))
        out = pl.pallas_call(
            _probe,
            out_shape=jax.ShapeDtypeStruct((32, 128), jnp.float32),
            grid=(4,),
            in_specs=[pl.BlockSpec((8, 128), lambda i: (i, 0)), w_spec],
            out_specs=pl.BlockSpec((8, 128), lambda i: (i, 0)),
        )(jnp.ones((32, 128), jnp.float32), jnp.ones((8, 128), jnp.float32))
        out = jax.block_until_ready(out)
        _SINGLE_BUF_OK = bool(abs(float(out[0, 0]) - 2.0) < 1e-6
                              and abs(float(out[31, 127]) - 2.0) < 1e-6)
    except Exception:
        _SINGLE_BUF_OK = False
    return _SINGLE_BUF_OK


def _const_spec(block_shape):
    """BlockSpec for grid-invariant (weight/bias) blocks; single-buffered if supported."""
    index_map = lambda *args: (0,) * len(block_shape)
    if _single_buffer_supported():
        return pl.BlockSpec(block_shape, index_map, pipeline_mode=pl.Buffered(1))
    return pl.BlockSpec(block_shape, index_map)


# ---------------------------------------------------------------------------
# Kernel 1: fused triple projection  down(cat) -> ReLU -> 3x up (+ optional L2 norm)
# ---------------------------------------------------------------------------

def _triple_proj_kernel(x_ref, wd_ref, bd_ref, wu_ref, bu_ref,
                        o0_ref, o1_ref, o2_ref, *, dim_low, normalize):
    x = x_ref[...].astype(jnp.bfloat16)                                  # (TM, D)
    h = jnp.dot(x, wd_ref[...], preferred_element_type=jnp.float32) + bd_ref[...]
    h = jnp.maximum(h, 0.0).astype(jnp.bfloat16)                         # (TM, 3L)
    wu = wu_ref[...]                                                     # (3L, D) bf16
    bu = bu_ref[...]                                                     # (3, D)  f32
    outs = (o0_ref, o1_ref, o2_ref)
    for s in range(3):
        hs = h[:, s * dim_low:(s + 1) * dim_low]
        ws = wu[s * dim_low:(s + 1) * dim_low, :]
        y = jnp.dot(hs, ws, preferred_element_type=jnp.float32) + bu[s:s + 1, :]
        if normalize[s]:                                                 # fused F.normalize
            ss = jnp.sum(y * y, axis=-1, keepdims=True)
            y = y * lax.rsqrt(jnp.maximum(ss, EPS_NORM * EPS_NORM))
        outs[s][...] = y.astype(outs[s].dtype)


def pallas_triple_proj(x2, wd_list, bd_list, wu_list, bu_list, normalize):
    M, D = x2.shape
    L = wd_list[0].shape[1]
    wd = jnp.concatenate(wd_list, axis=1).astype(jnp.bfloat16)           # (D, 3L)
    bd = jnp.concatenate(bd_list, axis=0).reshape(1, 3 * L)              # (1, 3L)
    wu = jnp.concatenate(wu_list, axis=0).astype(jnp.bfloat16)           # (3L, D)
    bu = jnp.stack(bu_list, axis=0)                                      # (3, D)
    TM = _row_tile(M)
    return pl.pallas_call(
        functools.partial(_triple_proj_kernel, dim_low=L, normalize=normalize),
        out_shape=tuple(jax.ShapeDtypeStruct((M, D), jnp.bfloat16) for _ in range(3)),
        grid=(pl.cdiv(M, TM),),
        in_specs=[pl.BlockSpec((TM, D), lambda i: (i, 0)),
                  _const_spec((D, 3 * L)),
                  _const_spec((1, 3 * L)),
                  _const_spec((3 * L, D)),
                  _const_spec((3, D))],
        out_specs=tuple(pl.BlockSpec((TM, D), lambda i: (i, 0)) for _ in range(3)),
        compiler_params=_cparams(("parallel",)),
    )(x2, wd, bd, wu, bu)


# ---------------------------------------------------------------------------
# Kernel 2: flash cross-attention (online softmax over keys) with fused
#           residual + LayerNorm -> MLP(ReLU) -> residual epilogue.
#   Query branch:  Q=sup,  K=qry,  V=qry_v, residual=query_img   (== softmax(att,-2).T @ qry_v)
#   Support branch: Q=qry_s, K=sup_q, V=sup_v, residual=support_img
# ---------------------------------------------------------------------------

def _flash_attn_ln_mlp_kernel(q_ref, k_ref, v_ref, res_ref, g_ref, be_ref,
                              w1_ref, b1_ref, w2_ref, b2_ref,
                              o_ref, m_sc, l_sc, acc_sc,
                              *, scale, n_keys, block_k, need_mask):
    kv = pl.program_id(2)

    @pl.when(kv == 0)
    def _init():
        m_sc[...] = jnp.full_like(m_sc, -jnp.inf)
        l_sc[...] = jnp.zeros_like(l_sc)
        acc_sc[...] = jnp.zeros_like(acc_sc)

    q = q_ref[0]                                       # (TS, D) bf16
    k = k_ref[0]                                       # (TK, D) bf16
    v = v_ref[0]                                       # (TK, D) bf16
    s = lax.dot_general(q, k, (((1,), (1,)), ((), ())),
                        preferred_element_type=jnp.float32) * scale      # (TS, TK)
    if need_mask:                                      # partial last key tile
        kpos = kv * block_k + lax.broadcasted_iota(jnp.int32, s.shape, 1)
        s = jnp.where(kpos < n_keys, s, NEG_INF)
        vpos = kv * block_k + lax.broadcasted_iota(jnp.int32, (block_k, 1), 0)
        v = jnp.where(vpos < n_keys, v, jnp.zeros_like(v))

    m_prev = m_sc[...]
    m_new = jnp.maximum(m_prev, jnp.max(s, axis=-1, keepdims=True))
    alpha = jnp.exp(m_prev - m_new)
    p = jnp.exp(s - m_new)
    l_sc[...] = alpha * l_sc[...] + jnp.sum(p, axis=-1, keepdims=True)
    acc_sc[...] = alpha * acc_sc[...] + jnp.dot(p.astype(jnp.bfloat16), v,
                                                preferred_element_type=jnp.float32)
    m_sc[...] = m_new

    @pl.when(kv == pl.num_programs(2) - 1)
    def _finalize():
        # exact division (review flagged approx reciprocal in the softmax denom)
        y = acc_sc[...] / l_sc[...] + res_ref[0]                         # (TS, D) f32
        mu = jnp.mean(y, axis=-1, keepdims=True)
        var = jnp.mean((y - mu) ** 2, axis=-1, keepdims=True)
        yn = (y - mu) * lax.rsqrt(var + EPS_LN) * g_ref[...] + be_ref[...]
        h = jnp.maximum(
            jnp.dot(yn.astype(jnp.bfloat16), w1_ref[...],
                    preferred_element_type=jnp.float32) + b1_ref[...], 0.0)
        z = jnp.dot(h.astype(jnp.bfloat16), w2_ref[...],
                    preferred_element_type=jnp.float32) + b2_ref[...]
        o_ref[0] = (y + z).astype(o_ref.dtype)


def pallas_flash_attn_ln_mlp(q, k, v, residual, gamma, beta, w1, b1, w2, b2, scale):
    B, N, D = q.shape
    L = w1.shape[1]
    T = _attn_tile(N)
    n_tiles = pl.cdiv(N, T)
    need_mask = (N % T) != 0
    return pl.pallas_call(
        functools.partial(_flash_attn_ln_mlp_kernel, scale=scale,
                          n_keys=N, block_k=T, need_mask=need_mask),
        out_shape=jax.ShapeDtypeStruct((B, N, D), jnp.float32),
        grid=(B, n_tiles, n_tiles),
        in_specs=[pl.BlockSpec((1, T, D), lambda b, i, j: (b, i, 0)),
                  pl.BlockSpec((1, T, D), lambda b, i, j: (b, j, 0)),
                  pl.BlockSpec((1, T, D), lambda b, i, j: (b, j, 0)),
                  pl.BlockSpec((1, T, D), lambda b, i, j: (b, i, 0)),
                  _const_spec((1, D)), _const_spec((1, D)),
                  _const_spec((D, L)), _const_spec((1, L)),
                  _const_spec((L, D)), _const_spec((1, D))],
        out_specs=pl.BlockSpec((1, T, D), lambda b, i, j: (b, i, 0)),
        scratch_shapes=[pltpu.VMEM((T, 1), jnp.float32),
                        pltpu.VMEM((T, 1), jnp.float32),
                        pltpu.VMEM((T, D), jnp.float32)],
        compiler_params=_cparams(("parallel", "parallel", "arbitrary")),
    )(q, k, v, residual,
      gamma.reshape(1, D), beta.reshape(1, D),
      w1.astype(jnp.bfloat16), b1.reshape(1, L),
      w2.astype(jnp.bfloat16), b2.reshape(1, D))


# ---------------------------------------------------------------------------
# Kernel 3: aux distances, reassociated:  pre[b] = ((mask @ sup) @ qry^T) * scale
#           (exact reassociation of (qry @ sup^T / sqrt(D)) @ mask, O(N*D) work)
# ---------------------------------------------------------------------------

def _pre_kernel(mask_ref, sup_ref, qry_ref, o_ref, *, scale):
    m = mask_ref[0].astype(jnp.bfloat16)                                 # (2, N)
    s = sup_ref[0]                                                       # (N, D) bf16
    q = qry_ref[0]                                                       # (TQ, D) bf16
    ms = jnp.dot(m, s, preferred_element_type=jnp.float32).astype(jnp.bfloat16)  # (2, D)
    o_ref[0] = lax.dot_general(ms, q, (((1,), (1,)), ((), ())),
                               preferred_element_type=jnp.float32) * scale       # (2, TQ)


def pallas_pre(masks_t, sup, qry, scale):
    B, N, D = qry.shape
    TQ = _attn_tile(N)
    return pl.pallas_call(
        functools.partial(_pre_kernel, scale=scale),
        out_shape=jax.ShapeDtypeStruct((B, 2, N), jnp.float32),
        grid=(B, pl.cdiv(N, TQ)),
        in_specs=[pl.BlockSpec((1, 2, N), lambda b, t: (b, 0, 0)),
                  pl.BlockSpec((1, N, D), lambda b, t: (b, 0, 0)),
                  pl.BlockSpec((1, TQ, D), lambda b, t: (b, t, 0))],
        out_specs=pl.BlockSpec((1, 2, TQ), lambda b, t: (b, 0, t)),
        compiler_params=_cparams(("parallel", "parallel")),
    )(masks_t, sup, qry)


# ---------------------------------------------------------------------------
# Kernel 4: query projection head — reassociated one-hot channel gather.
#   wa = onehot_rf @ W_down, wb = onehot_qi @ W_down (built once per batch,
#   cached in VMEM scratch), then h = relu(rf@wa + qi@wb + b) -> up.
# ---------------------------------------------------------------------------

def _gather_proj_kernel(idx_ref, rf_ref, qi_ref, wd_ref, bd_ref, wu_ref, bu_ref,
                        o_ref, wa_sc, wb_sc, *, dim):
    t = pl.program_id(1)

    @pl.when(t == 0)
    def _build_gathered_weights():
        idx = idx_ref[0]                                                 # (1, D) int32
        cls = lax.broadcasted_iota(jnp.int32, (dim, dim), 0)
        oh_a = (cls == idx).astype(jnp.bfloat16)                         # picks rf channels
        oh_b = (cls == (idx - dim)).astype(jnp.bfloat16)                 # picks qi channels
        wa_sc[...] = jnp.dot(oh_a, wd_ref[...],
                             preferred_element_type=jnp.float32).astype(jnp.bfloat16)
        wb_sc[...] = jnp.dot(oh_b, wd_ref[...],
                             preferred_element_type=jnp.float32).astype(jnp.bfloat16)

    rf = rf_ref[0].astype(jnp.bfloat16)                                  # (TM, D)
    qi = qi_ref[0].astype(jnp.bfloat16)                                  # (TM, D)
    h = (jnp.dot(rf, wa_sc[...], preferred_element_type=jnp.float32)
         + jnp.dot(qi, wb_sc[...], preferred_element_type=jnp.float32)
         + bd_ref[...])
    h = jnp.maximum(h, 0.0).astype(jnp.bfloat16)
    o_ref[0] = (jnp.dot(h, wu_ref[...], preferred_element_type=jnp.float32)
                + bu_ref[...]).astype(o_ref.dtype)


def pallas_gather_proj(rf, qi, index_reg, wd, bd, wu, bu):
    B, N, D = rf.shape
    L = wd.shape[1]
    TM = _row_tile(N)
    idx3 = index_reg.astype(jnp.int32).reshape(B, 1, D)
    return pl.pallas_call(
        functools.partial(_gather_proj_kernel, dim=D),
        out_shape=jax.ShapeDtypeStruct((B, N, D), jnp.float32),
        grid=(B, pl.cdiv(N, TM)),
        in_specs=[pl.BlockSpec((1, 1, D), lambda b, t: (b, 0, 0)),
                  pl.BlockSpec((1, TM, D), lambda b, t: (b, t, 0)),
                  pl.BlockSpec((1, TM, D), lambda b, t: (b, t, 0)),
                  _const_spec((D, L)),
                  _const_spec((1, L)),
                  _const_spec((L, D)),
                  _const_spec((1, D))],
        out_specs=pl.BlockSpec((1, TM, D), lambda b, t: (b, t, 0)),
        scratch_shapes=[pltpu.VMEM((D, L), jnp.bfloat16),
                        pltpu.VMEM((D, L), jnp.bfloat16)],
        compiler_params=_cparams(("parallel", "arbitrary")),
    )(idx3, rf, qi, wd.astype(jnp.bfloat16), bd.reshape(1, L),
      wu.astype(jnp.bfloat16), bu.reshape(1, D))


# ---------------------------------------------------------------------------
# Kernel 5: support projection head — consumes the [rf_sup, support_img] concat
#           without materializing it: down -> ReLU -> up  (row-tiled)
# ---------------------------------------------------------------------------

def _concat_proj_kernel(a_ref, b_ref, wda_ref, wdb_ref, bd_ref, wu_ref, bu_ref, o_ref):
    a = a_ref[...].astype(jnp.bfloat16)
    b = b_ref[...].astype(jnp.bfloat16)
    h = (jnp.dot(a, wda_ref[...], preferred_element_type=jnp.float32)
         + jnp.dot(b, wdb_ref[...], preferred_element_type=jnp.float32)
         + bd_ref[...])
    h = jnp.maximum(h, 0.0).astype(jnp.bfloat16)
    o_ref[...] = (jnp.dot(h, wu_ref[...], preferred_element_type=jnp.float32)
                  + bu_ref[...]).astype(o_ref.dtype)


def pallas_concat_proj(a2, b2, wd, bd, wu, bu):
    M, D = a2.shape
    H2 = wd.shape[1]                 # 2 * dim_low
    DO = wu.shape[1]                 # dim
    TM = _row_tile(M)
    wda = wd[:D, :].astype(jnp.bfloat16)
    wdb = wd[D:, :].astype(jnp.bfloat16)
    return pl.pallas_call(
        _concat_proj_kernel,
        out_shape=jax.ShapeDtypeStruct((M, DO), jnp.float32),
        grid=(pl.cdiv(M, TM),),
        in_specs=[pl.BlockSpec((TM, D), lambda i: (i, 0)),
                  pl.BlockSpec((TM, D), lambda i: (i, 0)),
                  _const_spec((D, H2)),
                  _const_spec((D, H2)),
                  _const_spec((1, H2)),
                  _const_spec((H2, DO)),
                  _const_spec((1, DO))],
        out_specs=pl.BlockSpec((TM, DO), lambda i: (i, 0)),
        compiler_params=_cparams(("parallel",)),
    )(a2, b2, wda, wdb, bd.reshape(1, H2), wu.astype(jnp.bfloat16), bu.reshape(1, DO))


# ---------------------------------------------------------------------------
# Parameters (deterministic synthetic init; weights stored [in, out])
# ---------------------------------------------------------------------------

def init_params(key, dim, dim_low):
    keys = jax.random.split(key, 24)
    it = iter(keys)

    def w(shape):
        return jax.random.normal(next(it), shape, jnp.float32) * 0.02

    return {
        'dq_w': w((3, dim, dim_low)), 'dq_b': w((3, dim_low)),
        'uq_w': w((3, dim_low, dim)), 'uq_b': w((3, dim)),
        'ds_w': w((3, dim, dim_low)), 'ds_b': w((3, dim_low)),
        'us_w': w((3, dim_low, dim)), 'us_b': w((3, dim)),
        'mlp_q_w1': w((dim, dim_low)), 'mlp_q_b1': w((dim_low,)),
        'mlp_q_w2': w((dim_low, dim)), 'mlp_q_b2': w((dim,)),
        'mlp_s_w1': w((dim, dim_low)), 'mlp_s_b1': w((dim_low,)),
        'mlp_s_w2': w((dim_low, dim)), 'mlp_s_b2': w((dim,)),
        'norm1_g': jnp.ones((dim,), jnp.float32), 'norm1_b': jnp.zeros((dim,), jnp.float32),
        'norm2_g': jnp.ones((dim,), jnp.float32), 'norm2_b': jnp.zeros((dim,), jnp.float32),
        'proj_reg_down_w': w((dim, dim_low)), 'proj_reg_down_b': w((dim_low,)),
        'proj_reg_up_w': w((dim_low, dim)), 'proj_reg_up_b': w((dim,)),
        'proj_reg_down_sup_w': w((2 * dim, 2 * dim_low)), 'proj_reg_down_sup_b': w((2 * dim_low,)),
        'proj_reg_up_sup_w': w((2 * dim_low, dim)), 'proj_reg_up_sup_b': w((dim,)),
    }


# ---------------------------------------------------------------------------
# Forward pass
# ---------------------------------------------------------------------------

def adapter_block_v6_forward(params, query_img, support_img, support_mask, input_resolution):
    B, N, D = query_img.shape
    hh, ww = input_resolution
    scale = 1.0 / (D ** 0.5)

    q2 = query_img.reshape(B * N, D)
    s2 = support_img.reshape(B * N, D)

    # --- fused cloned projections (one kernel per shared input; bf16 outputs) ---
    # query_img -> qry (dq0/uq0, norm), qry_v (dq2/uq2, norm), qry_s (ds1/us1)
    qry, qry_v, qry_s = pallas_triple_proj(
        q2,
        [params['dq_w'][0], params['dq_w'][2], params['ds_w'][1]],
        [params['dq_b'][0], params['dq_b'][2], params['ds_b'][1]],
        [params['uq_w'][0], params['uq_w'][2], params['us_w'][1]],
        [params['uq_b'][0], params['uq_b'][2], params['us_b'][1]],
        normalize=(True, True, False))
    # support_img -> sup (dq1/uq1, norm), sup_v (ds2/us2, norm), sup_q (ds0/us0)
    sup, sup_v, sup_q = pallas_triple_proj(
        s2,
        [params['dq_w'][1], params['ds_w'][2], params['ds_w'][0]],
        [params['dq_b'][1], params['ds_b'][2], params['ds_b'][0]],
        [params['uq_w'][1], params['us_w'][2], params['us_w'][0]],
        [params['uq_b'][1], params['us_b'][2], params['us_b'][0]],
        normalize=(True, True, False))

    qry = qry.reshape(B, N, D)
    qry_v = qry_v.reshape(B, N, D)
    qry_s = qry_s.reshape(B, N, D)
    sup = sup.reshape(B, N, D)
    sup_v = sup_v.reshape(B, N, D)
    sup_q = sup_q.reshape(B, N, D)

    # --- F.interpolate(support_mask, (h, w), 'nearest') + binary fg/bg masks ---
    H_in, W_in = support_mask.shape[2], support_mask.shape[3]
    ri = (jnp.arange(hh) * H_in) // hh
    ci = (jnp.arange(ww) * W_in) // ww
    s_y = support_mask[:, :, ri, :][:, :, :, ci]                  # (B, 1, h, w)
    flat = s_y.reshape(B, N)
    mask_fg = (flat == 1).astype(jnp.float32)
    mask_bg = (flat == 0).astype(jnp.float32)
    masks_t = jnp.stack([mask_bg, mask_fg], axis=1)               # (B, 2, N) [bg, fg]

    # --- aux distances on pre-softmax scores (reassociated, O(N*D)) ---
    pre = pallas_pre(masks_t, sup, qry, scale).reshape(B, 2, hh, ww)

    # --- query-side flash attention + fused residual + norm1/MLP/residual ---
    registered_feas = pallas_flash_attn_ln_mlp(
        sup, qry, qry_v, query_img,
        params['norm1_g'], params['norm1_b'],
        params['mlp_q_w1'], params['mlp_q_b1'],
        params['mlp_q_w2'], params['mlp_q_b2'], scale)

    # --- channel re-indexing: token-normalize, pool, top-k (tiny XLA glue) ---
    # TODO(synk): torch.topk has no clean Pallas equivalent; lax.top_k runs in XLA,
    # as do the small pooling and final MSE reductions below.
    def _norm_tokens(x):                                           # F.normalize(x, dim=1)
        ss = jnp.sum(x * x, axis=1, keepdims=True)
        return x * lax.rsqrt(jnp.maximum(ss, EPS_NORM * EPS_NORM))

    reg_idx = jnp.mean(_norm_tokens(registered_feas), axis=1)      # (B, D)
    x_idx = jnp.mean(_norm_tokens(query_img), axis=1)              # (B, D)
    cat_idx = jnp.concatenate([reg_idx, x_idx], axis=-1)           # (B, 2D)
    _, index_reg = lax.top_k(cat_idx, D)                           # (B, D)

    # --- query head: reassociated in-kernel gather + down -> ReLU -> up ---
    registered_feas_out = pallas_gather_proj(
        registered_feas, query_img, index_reg,
        params['proj_reg_down_w'], params['proj_reg_down_b'],
        params['proj_reg_up_w'], params['proj_reg_up_b'])

    # --- support-side flash attention + fused residual + norm2/MLP/residual ---
    registered_feas_sup = pallas_flash_attn_ln_mlp(
        qry_s, sup_q, sup_v, support_img,
        params['norm2_g'], params['norm2_b'],
        params['mlp_s_w1'], params['mlp_s_b1'],
        params['mlp_s_w2'], params['mlp_s_b2'], scale)

    # --- support head: fused [rf_sup, support_img] concat + down -> ReLU -> up ---
    registered_feas_sup_out = pallas_concat_proj(
        registered_feas_sup.reshape(B * N, D), support_img.reshape(B * N, D),
        params['proj_reg_down_sup_w'], params['proj_reg_down_sup_b'],
        params['proj_reg_up_sup_w'], params['proj_reg_up_sup_b']).reshape(B, N, D)

    # nn.MSELoss (mean over all elements)
    loss_q = jnp.mean((registered_feas_out - query_img) ** 2)
    loss_s = jnp.mean((registered_feas_sup_out - support_img) ** 2)

    return registered_feas_out, registered_feas_sup_out, loss_q, loss_s, pre


# ---------------------------------------------------------------------------
# Demo
# ---------------------------------------------------------------------------

if __name__ == "__main__":
    # probe runtime features eagerly (outside any jit trace)
    _single_buffer_supported()
    _vmem_limit_bytes()

    B, dim = 2, 32
    h, w = 8, 8              # input_resolution
    N = h * w
    H, W = 16, 16            # raw support-mask resolution
    dim_low = dim // 4

    key = jax.random.PRNGKey(0)
    kp, kq, ks, km = jax.random.split(key, 4)
    params = init_params(kp, dim, dim_low)
    query_img = jax.random.normal(kq, (B, N, dim), jnp.float32)
    support_img = jax.random.normal(ks, (B, N, dim), jnp.float32)
    support_mask = jax.random.bernoulli(km, 0.4, (B, 1, H, W)).astype(jnp.float32)

    fwd = jax.jit(functools.partial(adapter_block_v6_forward, input_resolution=(h, w)))
    outs = fwd(params, query_img, support_img, support_mask)
    outs = jax.block_until_ready(outs)

    rf, rfs, lq, ls, pre = outs
    assert rf.shape == (B, N, dim)
    assert rfs.shape == (B, N, dim)
    assert pre.shape == (B, 2, h, w)
    assert lq.shape == () and ls.shape == ()
    assert bool(jnp.isfinite(lq)) and bool(jnp.isfinite(ls))
    assert bool(jnp.all(jnp.isfinite(rf))) and bool(jnp.all(jnp.isfinite(rfs)))
    print("KERNEL_OK")
</pallas_src>

<mosaic_0001>
module attributes {stable_mosaic.version = 11 : i64} {
  func.func @_probe(%arg0: i32, %arg1: memref<8x128xf32, #tpu.memory_space<vmem>>, %arg2: memref<8x128xf32, #tpu.memory_space<vmem>>, %arg3: memref<8x128xf32, #tpu.memory_space<vmem>>) attributes {dimension_semantics = [#tpu.dimension_semantics<arbitrary>], iteration_bounds = array<i64: 4>, scalar_prefetch = 0 : i64, scratch_operands = 0 : i64, tpu.core_type = #tpu.core_type<tc>, window_params = [{transform_indices = @transform_0, window_bounds = array<i64: 8, 128>}, {pipeline_mode = #tpu.pipeline_mode<synchronous>, transform_indices = @transform_1, window_bounds = array<i64: 8, 128>}, {transform_indices = @transform_2, window_bounds = array<i64: 8, 128>}]} {
    %c0 = arith.constant 0 : index
    %c0_0 = arith.constant 0 : index
    %0 = vector.load %arg1[%c0, %c0_0] : memref<8x128xf32, #tpu.memory_space<vmem>>, vector<8x128xf32>
    %c0_1 = arith.constant 0 : index
    %c0_2 = arith.constant 0 : index
    %1 = vector.load %arg2[%c0_1, %c0_2] : memref<8x128xf32, #tpu.memory_space<vmem>>, vector<8x128xf32>
    %2 = arith.addf %0, %1 : vector<8x128xf32>
    %c0_3 = arith.constant 0 : index
    %c0_4 = arith.constant 0 : index
    %3 = vector.load %arg3[%c0_3, %c0_4] : memref<8x128xf32, #tpu.memory_space<vmem>>, vector<8x128xf32>
    tpu.vector_store %arg3[%c0_3, %c0_4], %2 {strides = array<i32>} : memref<8x128xf32, #tpu.memory_space<vmem>>, vector<8x128xf32>,
    return
  }
  func.func @transform_0(%arg0: i32) -> (i32, i32) {
    %c0_i32 = arith.constant 0 : i32
    %c0_i32_0 = arith.constant 0 : i32
    return %arg0, %c0_i32 : i32, i32
  }
  func.func @transform_1(%arg0: i32) -> (i32, i32) {
    %c0_i32 = arith.constant 0 : i32
    %c0_i32_0 = arith.constant 0 : i32
    %c0_i32_1 = arith.constant 0 : i32
    return %c0_i32, %c0_i32_0 : i32, i32
  }
  func.func @transform_2(%arg0: i32) -> (i32, i32) {
    %c0_i32 = arith.constant 0 : i32
    %c0_i32_0 = arith.constant 0 : i32
    return %arg0, %c0_i32 : i32, i32
  }
}

module attributes {stable_mosaic.version = 11 : i64} {
  func.func @_flash_attn_ln_mlp_kernel(%arg0: i32, %arg1: i32, %arg2: i32, %arg3: memref<1x64x32xbf16, #tpu.memory_space<vmem>>, %arg4: memref<1x64x32xbf16, #tpu.memory_space<vmem>>, %arg5: memref<1x64x32xbf16, #tpu.memory_space<vmem>>, %arg6: memref<1x64x32xf32, #tpu.memory_space<vmem>>, %arg7: memref<1x32xf32, #tpu.memory_space<vmem>>, %arg8: memref<1x32xf32, #tpu.memory_space<vmem>>, %arg9: memref<32x8xbf16, #tpu.memory_space<vmem>>, %arg10: memref<1x8xf32, #tpu.memory_space<vmem>>, %arg11: memref<8x32xbf16, #tpu.memory_space<vmem>>, %arg12: memref<1x32xf32, #tpu.memory_space<vmem>>, %arg13: memref<1x64x32xf32, #tpu.memory_space<vmem>>, %arg14: memref<64x1xf32, #tpu.memory_space<vmem>>, %arg15: memref<64x1xf32, #tpu.memory_space<vmem>>, %arg16: memref<64x32xf32, #tpu.memory_space<vmem>>) attributes {dimension_semantics = [#tpu.dimension_semantics<parallel>, #tpu.dimension_semantics<parallel>, #tpu.dimension_semantics<arbitrary>], iteration_bounds = array<i64: 2, 1, 1>, scalar_prefetch = 0 : i64, scratch_operands = 3 : i64, tpu.core_type = #tpu.core_type<tc>, window_params = [{transform_indices = @transform_0, window_bounds = array<i64: 1, 64, 32>}, {transform_indices = @transform_1, window_bounds = array<i64: 1, 64, 32>}, {transform_indices = @transform_2, window_bounds = array<i64: 1, 64, 32>}, {transform_indices = @transform_3, window_bounds = array<i64: 1, 64, 32>}, {pipeline_mode = #tpu.pipeline_mode<synchronous>, transform_indices = @transform_4, window_bounds = array<i64: 1, 32>}, {pipeline_mode = #tpu.pipeline_mode<synchronous>, transform_indices = @transform_5, window_bounds = array<i64: 1, 32>}, {pipeline_mode = #tpu.pipeline_mode<synchronous>, transform_indices = @transform_6, window_bounds = array<i64: 32, 8>}, {pipeline_mode = #tpu.pipeline_mode<synchronous>, transform_indices = @transform_7, window_bounds = array<i64: 1, 8>}, {pipeline_mode = #tpu.pipeline_mode<synchronous>, transform_indices = @transform_8, window_bounds = array<i64: 8, 32>}, {pipeline_mode = #tpu.pipeline_mode<synchronous>, transform_indices = @transform_9, window_bounds = array<i64: 1, 32>}, {transform_indices = @transform_10, window_bounds = array<i64: 1, 64, 32>}]} {
    %c0_i32 = arith.constant 0 : i32
    %0 = arith.cmpi eq, %arg2, %c0_i32 : i32
    %1 = arith.extui %0 : i1 to i32
    %c0_i32_0 = arith.constant 0 : i32
    %2 = arith.cmpi ne, %1, %c0_i32_0 : i32
    scf.if %2 {
      %cst_27 = arith.constant 0xFF800000 : f32
      %38 = vector.broadcast %cst_27 : f32 to vector<64x1xf32>
      %c0_28 = arith.constant 0 : index
      %c0_29 = arith.constant 0 : index
      %39 = vector.load %arg14[%c0_28, %c0_29] : memref<64x1xf32, #tpu.memory_space<vmem>>, vector<64x1xf32>
      tpu.vector_store %arg14[%c0_28, %c0_29], %38 {strides = array<i32>} : memref<64x1xf32, #tpu.memory_space<vmem>>, vector<64x1xf32>,
      %cst_30 = arith.constant 0.000000e+00 : f32
      %40 = vector.broadcast %cst_30 : f32 to vector<64x1xf32>
      %c0_31 = arith.constant 0 : index
      %c0_32 = arith.constant 0 : index
      %41 = vector.load %arg15[%c0_31, %c0_32] : memref<64x1xf32, #tpu.memory_space<vmem>>, vector<64x1xf32>
      tpu.vector_store %arg15[%c0_31, %c0_32], %40 {strides = array<i32>} : memref<64x1xf32, #tpu.memory_space<vmem>>, vector<64x1xf32>,
      %cst_33 = arith.constant 0.000000e+00 : f32
      %42 = vector.broadcast %cst_33 : f32 to vector<64x32xf32>
      %c0_34 = arith.constant 0 : index
      %c0_35 = arith.constant 0 : index
      %43 = vector.load %arg16[%c0_34, %c0_35] : memref<64x32xf32, #tpu.memory_space<vmem>>, vector<64x32xf32>
      tpu.vector_store %arg16[%c0_34, %c0_35], %42 {strides = array<i32>} : memref<64x32xf32, #tpu.memory_space<vmem>>, vector<64x32xf32>,
    } else {
    }
    %c0 = arith.constant 0 : index
    %c0_1 = arith.constant 0 : index
    %c0_2 = arith.constant 0 : index
    %3 = vector.load %arg3[%c0, %c0_1, %c0_2] : memref<1x64x32xbf16, #tpu.memory_space<vmem>>, vector<1x64x32xbf16>
    %4 = vector.shape_cast %3 : vector<1x64x32xbf16> to vector<64x32xbf16>
    %c0_3 = arith.constant 0 : index
    %c0_4 = arith.constant 0 : index
    %c0_5 = arith.constant 0 : index
    %5 = vector.load %arg4[%c0_3, %c0_4, %c0_5] : memref<1x64x32xbf16, #tpu.memory_space<vmem>>, vector<1x64x32xbf16>
    %6 = vector.shape_cast %5 : vector<1x64x32xbf16> to vector<64x32xbf16>
    %c0_6 = arith.constant 0 : index
    %c0_7 = arith.constant 0 : index
    %c0_8 = arith.constant 0 : index
    %7 = vector.load %arg5[%c0_6, %c0_7, %c0_8] : memref<1x64x32xbf16, #tpu.memory_space<vmem>>, vector<1x64x32xbf16>
    %8 = vector.shape_cast %7 : vector<1x64x32xbf16> to vector<64x32xbf16>
    %cst = arith.constant dense<0.000000e+00> : vector<64x64xf32>
    %9 = tpu.matmul %4, %6, %cst {dimension_numbers = #tpu.dot_dimension_numbers<[1], [1], [0], [0], [0, 0, 1, 0], [], []>} : vector<64x32xbf16>, vector<64x32xbf16>, vector<64x64xf32> -> vector<64x64xf32>
    %cst_9 = arith.constant 0.176776692 : f32
    %10 = vector.broadcast %cst_9 : f32 to vector<64x64xf32>
    %11 = arith.mulf %9, %10 : vector<64x64xf32>
    %c0_10 = arith.constant 0 : index
    %c0_11 = arith.constant 0 : index
    %12 = vector.load %arg14[%c0_10, %c0_11] : memref<64x1xf32, #tpu.memory_space<vmem>>, vector<64x1xf32>
    %cst_12 = arith.constant dense<0xFF800000> : vector<64xf32>
    %13 = vector.multi_reduction <maximumf>, %11, %cst_12 [1] : vector<64x64xf32> to vector<64xf32>
    %14 = vector.shape_cast %13 : vector<64xf32> to vector<64x1xf32>
    %15 = arith.maximumf %12, %14 : vector<64x1xf32>
    %16 = arith.subf %12, %15 : vector<64x1xf32>
    %17 = math.exp %16 : vector<64x1xf32>
    %18 = vector.broadcast %15 : vector<64x1xf32> to vector<64x64xf32>
    %19 = arith.subf %11, %18 : vector<64x64xf32>
    %20 = math.exp %19 : vector<64x64xf32>
    %c0_13 = arith.constant 0 : index
    %c0_14 = arith.constant 0 : index
    %21 = vector.load %arg15[%c0_13, %c0_14] : memref<64x1xf32, #tpu.memory_space<vmem>>, vector<64x1xf32>
    %22 = arith.mulf %17, %21 : vector<64x1xf32>
    %cst_15 = arith.constant dense<0.000000e+00> : vector<64xf32>
    %23 = vector.multi_reduction <add>, %20, %cst_15 [1] : vector<64x64xf32> to vector<64xf32>
    %24 = vector.shape_cast %23 : vector<64xf32> to vector<64x1xf32>
    %25 = arith.addf %22, %24 : vector<64x1xf32>
    %c0_16 = arith.constant 0 : index
    %c0_17 = arith.constant 0 : index
    %26 = vector.load %arg15[%c0_16, %c0_17] : memref<64x1xf32, #tpu.memory_space<vmem>>, vector<64x1xf32>
    tpu.vector_store %arg15[%c0_16, %c0_17], %25 {strides = array<i32>} : memref<64x1xf32, #tpu.memory_space<vmem>>, vector<64x1xf32>,
    %c0_18 = arith.constant 0 : index
    %c0_19 = arith.constant 0 : index
    %27 = vector.load %arg16[%c0_18, %c0_19] : memref<64x32xf32, #tpu.memory_space<vmem>>, vector<64x32xf32>
    %28 = vector.broadcast %17 : vector<64x1xf32> to vector<64x32xf32>
    %29 = arith.mulf %28, %27 : vector<64x32xf32>
    %30 = arith.truncf %20 : vector<64x64xf32> to vector<64x64xbf16>
    %cst_20 = arith.constant dense<0.000000e+00> : vector<64x32xf32>
    %31 = tpu.matmul %30, %8, %cst_20 {dimension_numbers = #tpu.dot_dimension_numbers<[1], [0], [0], [1], [0, 0, 1, 1], [], []>} : vector<64x64xbf16>, vector<64x32xbf16>, vector<64x32xf32> -> vector<64x32xf32>
    %32 = arith.addf %29, %31 : vector<64x32xf32>
    %c0_21 = arith.constant 0 : index
    %c0_22 = arith.constant 0 : index
    %33 = vector.load %arg16[%c0_21, %c0_22] : memref<64x32xf32, #tpu.memory_space<vmem>>, vector<64x32xf32>
    tpu.vector_store %arg16[%c0_21, %c0_22], %32 {strides = array<i32>} : memref<64x32xf32, #tpu.memory_space<vmem>>, vector<64x32xf32>,
    %c0_23 = arith.constant 0 : index
    %c0_24 = arith.constant 0 : index
    %34 = vector.load %arg14[%c0_23, %c0_24] : memref<64x1xf32, #tpu.memory_space<vmem>>, vector<64x1xf32>
    tpu.vector_store %arg14[%c0_23, %c0_24], %15 {strides = array<i32>} : memref<64x1xf32, #tpu.memory_space<vmem>>, vector<64x1xf32>,
    %c0_i32_25 = arith.constant 0 : i32
    %35 = arith.cmpi eq, %arg2, %c0_i32_25 : i32
    %36 = arith.extui %35 : i1 to i32
    %c0_i32_26 = arith.constant 0 : i32
    %37 = arith.cmpi ne, %36, %c0_i32_26 : i32
    scf.if %37 {
      %c0_27 = arith.constant 0 : index
      %c0_28 = arith.constant 0 : index
      %38 = vector.load %arg16[%c0_27, %c0_28] : memref<64x32xf32, #tpu.memory_space<vmem>>, vector<64x32xf32>
      %c0_29 = arith.constant 0 : index
      %c0_30 = arith.constant 0 : index
      %39 = vector.load %arg15[%c0_29, %c0_30] : memref<64x1xf32, #tpu.memory_space<vmem>>, vector<64x1xf32>
      %40 = vector.broadcast %39 : vector<64x1xf32> to vector<64x32xf32>
      %41 = arith.divf %38, %40 : vector<64x32xf32>
      %c0_31 = arith.constant 0 : index
      %c0_32 = arith.constant 0 : index
      %c0_33 = arith.constant 0 : index
      %42 = vector.load %arg6[%c0_31, %c0_32, %c0_33] : memref<1x64x32xf32, #tpu.memory_space<vmem>>, vector<1x64x32xf32>
      %43 = vector.shape_cast %42 : vector<1x64x32xf32> to vector<64x32xf32>
      %44 = arith.addf %41, %43 : vector<64x32xf32>
      %cst_34 = arith.constant dense<0.000000e+00> : vector<64xf32>
      %45 = vector.multi_reduction <add>, %44, %cst_34 [1] : vector<64x32xf32> to vector<64xf32>
      %46 = vector.shape_cast %45 : vector<64xf32> to vector<64x1xf32>
      %cst_35 = arith.constant 3.200000e+01 : f32
      %47 = vector.broadcast %cst_35 : f32 to vector<64x1xf32>
      %48 = arith.divf %46, %47 : vector<64x1xf32>
      %49 = vector.broadcast %48 : vector<64x1xf32> to vector<64x32xf32>
      %50 = arith.subf %44, %49 : vector<64x32xf32>
      %51 = arith.mulf %50, %50 : vector<64x32xf32>
      %cst_36 = arith.constant dense<0.000000e+00> : vector<64xf32>
      %52 = vector.multi_reduction <add>, %51, %cst_36 [1] : vector<64x32xf32> to vector<64xf32>
      %53 = vector.shape_cast %52 : vector<64xf32> to vector<64x1xf32>
      %cst_37 = arith.constant 3.200000e+01 : f32
      %54 = vector.broadcast %cst_37 : f32 to vector<64x1xf32>
      %55 = arith.divf %53, %54 : vector<64x1xf32>
      %56 = vector.broadcast %48 : vector<64x1xf32> to vector<64x32xf32>
      %57 = arith.subf %44, %56 : vector<64x32xf32>
      %cst_38 = arith.constant 9.99999974E-6 : f32
      %58 = vector.broadcast %cst_38 : f32 to vector<64x1xf32>
      %59 = arith.addf %55, %58 : vector<64x1xf32>
      %60 = math.rsqrt %59 : vector<64x1xf32>
      %61 = vector.broadcast %60 : vector<64x1xf32> to vector<64x32xf32>
      %62 = arith.mulf %57, %61 : vector<64x32xf32>
      %c0_39 = arith.constant 0 : index
      %c0_40 = arith.constant 0 : index
      %63 = vector.load %arg7[%c0_39, %c0_40] : memref<1x32xf32, #tpu.memory_space<vmem>>, vector<1x32xf32>
      %64 = vector.broadcast %63 : vector<1x32xf32> to vector<64x32xf32>
      %65 = arith.mulf %62, %64 : vector<64x32xf32>
      %c0_41 = arith.constant 0 : index
      %c0_42 = arith.constant 0 : index
      %66 = vector.load %arg8[%c0_41, %c0_42] : memref<1x32xf32, #tpu.memory_space<vmem>>, vector<1x32xf32>
      %67 = vector.broadcast %66 : vector<1x32xf32> to vector<64x32xf32>
      %68 = arith.addf %65, %67 : vector<64x32xf32>
      %69 = arith.truncf %68 : vector<64x32xf32> to vector<64x32xbf16>
      %c0_43 = arith.constant 0 : index
      %c0_44 = arith.constant 0 : index
      %70 = vector.load %arg9[%c0_43, %c0_44] : memref<32x8xbf16, #tpu.memory_space<vmem>>, vector<32x8xbf16>
      %cst_45 = arith.constant dense<0.000000e+00> : vector<64x8xf32>
      %71 = tpu.matmul %69, %70, %cst_45 {dimension_numbers = #tpu.dot_dimension_numbers<[1], [0], [0], [1], [0, 0, 1, 1], [], []>} : vector<64x32xbf16>, vector<32x8xbf16>, vector<64x8xf32> -> vector<64x8xf32>
      %c0_46 = arith.constant 0 : index
      %c0_47 = arith.constant 0 : index
      %72 = vector.load %arg10[%c0_46, %c0_47] : memref<1x8xf32, #tpu.memory_space<vmem>>, vector<1x8xf32>
      %73 = vector.broadcast %72 : vector<1x8xf32> to vector<64x8xf32>
      %74 = arith.addf %71, %73 : vector<64x8xf32>
      %cst_48 = arith.constant 0.000000e+00 : f32
      %75 = vector.broadcast %cst_48 : f32 to vector<64x8xf32>
      %76 = arith.maximumf %74, %75 : vector<64x8xf32>
      %77 = arith.truncf %76 : vector<64x8xf32> to vector<64x8xbf16>
      %c0_49 = arith.constant 0 : index
      %c0_50 = arith.constant 0 : index
      %78 = vector.load %arg11[%c0_49, %c0_50] : memref<8x32xbf16, #tpu.memory_space<vmem>>, vector<8x32xbf16>
      %cst_51 = arith.constant dense<0.000000e+00> : vector<64x32xf32>
      %79 = tpu.matmul %77, %78, %cst_51 {dimension_numbers = #tpu.dot_dimension_numbers<[1], [0], [0], [1], [0, 0, 1, 1], [], []>} : vector<64x8xbf16>, vector<8x32xbf16>, vector<64x32xf32> -> vector<64x32xf32>
      %c0_52 = arith.constant 0 : index
      %c0_53 = arith.constant 0 : index
      %80 = vector.load %arg12[%c0_52, %c0_53] : memref<1x32xf32, #tpu.memory_space<vmem>>, vector<1x32xf32>
      %81 = vector.broadcast %80 : vector<1x32xf32> to vector<64x32xf32>
      %82 = arith.addf %79, %81 : vector<64x32xf32>
      %83 = arith.addf %44, %82 : vector<64x32xf32>
      %c0_54 = arith.constant 0 : index
      %c0_55 = arith.constant 0 : index
      %c0_56 = arith.constant 0 : index
      %84 = vector.load %arg13[%c0_54, %c0_55, %c0_56] : memref<1x64x32xf32, #tpu.memory_space<vmem>>, vector<1x64x32xf32>
      %85 = vector.shape_cast %84 : vector<1x64x32xf32> to vector<64x32xf32>
      %86 = vector.shape_cast %83 : vector<64x32xf32> to vector<1x64x32xf32>
      tpu.vector_store %arg13[%c0_54, %c0_55, %c0_56], %86 {strides = array<i32>} : memref<1x64x32xf32, #tpu.memory_space<vmem>>, vector<1x64x32xf32>,
    } else {
    }
    return
  }
  func.func @transform_0(%arg0: i32, %arg1: i32, %arg2: i32) -> (i32, i32, i32) {
    %c0_i32 = arith.constant 0 : i32
    %c0_i32_0 = arith.constant 0 : i32
    return %arg0, %arg1, %c0_i32 : i32, i32, i32
  }
  func.func @transform_1(%arg0: i32, %arg1: i32, %arg2: i32) -> (i32, i32, i32) {
    %c0_i32 = arith.constant 0 : i32
    %c0_i32_0 = arith.constant 0 : i32
    return %arg0, %arg2, %c0_i32 : i32, i32, i32
  }
  func.func @transform_2(%arg0: i32, %arg1: i32, %arg2: i32) -> (i32, i32, i32) {
    %c0_i32 = arith.constant 0 : i32
    %c0_i32_0 = arith.constant 0 : i32
    return %arg0, %arg2, %c0_i32 : i32, i32, i32
  }
  func.func @transform_3(%arg0: i32, %arg1: i32, %arg2: i32) -> (i32, i32, i32) {
    %c0_i32 = arith.constant 0 : i32
    %c0_i32_0 = arith.constant 0 : i32
    return %arg0, %arg1, %c0_i32 : i32, i32, i32
  }
  func.func @transform_4(%arg0: i32, %arg1: i32, %arg2: i32) -> (i32, i32) {
    %c0_i32 = arith.constant 0 : i32
    %c0_i32_0 = arith.constant 0 : i32
    %c0_i32_1 = arith.constant 0 : i32
    return %c0_i32, %c0_i32_0 : i32, i32
  }
  func.func @transform_5(%arg0: i32, %arg1: i32, %arg2: i32) -> (i32, i32) {
    %c0_i32 = arith.constant 0 : i32
    %c0_i32_0 = arith.constant 0 : i32
    %c0_i32_1 = arith.constant 0 : i32
    return %c0_i32, %c0_i32_0 : i32, i32
  }
  func.func @transform_6(%arg0: i32, %arg1: i32, %arg2: i32) -> (i32, i32) {
    %c0_i32 = arith.constant 0 : i32
    %c0_i32_0 = arith.constant 0 : i32
    %c0_i32_1 = arith.constant 0 : i32
    return %c0_i32, %c0_i32_0 : i32, i32
  }
  func.func @transform_7(%arg0: i32, %arg1: i32, %arg2: i32) -> (i32, i32) {
    %c0_i32 = arith.constant 0 : i32
    %c0_i32_0 = arith.constant 0 : i32
    %c0_i32_1 = arith.constant 0 : i32
    return %c0_i32, %c0_i32_0 : i32, i32
  }
  func.func @transform_8(%arg0: i32, %arg1: i32, %arg2: i32) -> (i32, i32) {
    %c0_i32 = arith.constant 0 : i32
    %c0_i32_0 = arith.constant 0 : i32
    %c0_i32_1 = arith.constant 0 : i32
    return %c0_i32, %c0_i32_0 : i32, i32
  }
  func.func @transform_9(%arg0: i32, %arg1: i32, %arg2: i32) -> (i32, i32) {
    %c0_i32 = arith.constant 0 : i32
    %c0_i32_0 = arith.constant 0 : i32
    %c0_i32_1 = arith.constant 0 : i32
    return %c0_i32, %c0_i32_0 : i32, i32
  }
  func.func @transform_10(%arg0: i32, %arg1: i32, %arg2: i32) -> (i32, i32, i32) {
    %c0_i32 = arith.constant 0 : i32
    %c0_i32_0 = arith.constant 0 : i32
    return %arg0, %arg1, %c0_i32 : i32, i32, i32
  }
}

module attributes {stable_mosaic.version = 11 : i64} {
  func.func @_triple_proj_kernel(%arg0: i32, %arg1: memref<64x32xf32, #tpu.memory_space<vmem>>, %arg2: memref<32x24xbf16, #tpu.memory_space<vmem>>, %arg3: memref<1x24xf32, #tpu.memory_space<vmem>>, %arg4: memref<24x32xbf16, #tpu.memory_space<vmem>>, %arg5: memref<3x32xf32, #tpu.memory_space<vmem>>, %arg6: memref<64x32xbf16, #tpu.memory_space<vmem>>, %arg7: memref<64x32xbf16, #tpu.memory_space<vmem>>, %arg8: memref<64x32xbf16, #tpu.memory_space<vmem>>) attributes {dimension_semantics = [#tpu.dimension_semantics<parallel>], iteration_bounds = array<i64: 2>, scalar_prefetch = 0 : i64, scratch_operands = 0 : i64, tpu.core_type = #tpu.core_type<tc>, window_params = [{transform_indices = @transform_0, window_bounds = array<i64: 64, 32>}, {pipeline_mode = #tpu.pipeline_mode<synchronous>, transform_indices = @transform_1, window_bounds = array<i64: 32, 24>}, {pipeline_mode = #tpu.pipeline_mode<synchronous>, transform_indices = @transform_2, window_bounds = array<i64: 1, 24>}, {pipeline_mode = #tpu.pipeline_mode<synchronous>, transform_indices = @transform_3, window_bounds = array<i64: 24, 32>}, {pipeline_mode = #tpu.pipeline_mode<synchronous>, transform_indices = @transform_4, window_bounds = array<i64: 3, 32>}, {transform_indices = @transform_5, window_bounds = array<i64: 64, 32>}, {transform_indices = @transform_6, window_bounds = array<i64: 64, 32>}, {transform_indices = @transform_7, window_bounds = array<i64: 64, 32>}]} {
    %c0 = arith.constant 0 : index
    %c0_0 = arith.constant 0 : index
    %0 = vector.load %arg1[%c0, %c0_0] : memref<64x32xf32, #tpu.memory_space<vmem>>, vector<64x32xf32>
    %1 = arith.truncf %0 : vector<64x32xf32> to vector<64x32xbf16>
    %c0_1 = arith.constant 0 : index
    %c0_2 = arith.constant 0 : index
    %2 = vector.load %arg2[%c0_1, %c0_2] : memref<32x24xbf16, #tpu.memory_space<vmem>>, vector<32x24xbf16>
    %cst = arith.constant dense<0.000000e+00> : vector<64x24xf32>
    %3 = tpu.matmul %1, %2, %cst {dimension_numbers = #tpu.dot_dimension_numbers<[1], [0], [0], [1], [0, 0, 1, 1], [], []>} : vector<64x32xbf16>, vector<32x24xbf16>, vector<64x24xf32> -> vector<64x24xf32>
    %c0_3 = arith.constant 0 : index
    %c0_4 = arith.constant 0 : index
    %4 = vector.load %arg3[%c0_3, %c0_4] : memref<1x24xf32, #tpu.memory_space<vmem>>, vector<1x24xf32>
    %5 = vector.broadcast %4 : vector<1x24xf32> to vector<64x24xf32>
    %6 = arith.addf %3, %5 : vector<64x24xf32>
    %cst_5 = arith.constant 0.000000e+00 : f32
    %7 = vector.broadcast %cst_5 : f32 to vector<64x24xf32>
    %8 = arith.maximumf %6, %7 : vector<64x24xf32>
    %9 = arith.truncf %8 : vector<64x24xf32> to vector<64x24xbf16>
    %c0_6 = arith.constant 0 : index
    %c0_7 = arith.constant 0 : index
    %10 = vector.load %arg4[%c0_6, %c0_7] : memref<24x32xbf16, #tpu.memory_space<vmem>>, vector<24x32xbf16>
    %c0_8 = arith.constant 0 : index
    %c0_9 = arith.constant 0 : index
    %11 = vector.load %arg5[%c0_8, %c0_9] : memref<3x32xf32, #tpu.memory_space<vmem>>, vector<3x32xf32>
    %12 = vector.extract_strided_slice %9 {offsets = [0, 0], sizes = [64, 8], strides = [1, 1]} : vector<64x24xbf16> to vector<64x8xbf16>
    %13 = vector.extract_strided_slice %10 {offsets = [0, 0], sizes = [8, 32], strides = [1, 1]} : vector<24x32xbf16> to vector<8x32xbf16>
    %cst_10 = arith.constant dense<0.000000e+00> : vector<64x32xf32>
    %14 = tpu.matmul %12, %13, %cst_10 {dimension_numbers = #tpu.dot_dimension_numbers<[1], [0], [0], [1], [0, 0, 1, 1], [], []>} : vector<64x8xbf16>, vector<8x32xbf16>, vector<64x32xf32> -> vector<64x32xf32>
    %15 = vector.extract_strided_slice %11 {offsets = [0, 0], sizes = [1, 32], strides = [1, 1]} : vector<3x32xf32> to vector<1x32xf32>
    %16 = vector.broadcast %15 : vector<1x32xf32> to vector<64x32xf32>
    %17 = arith.addf %14, %16 : vector<64x32xf32>
    %18 = arith.mulf %17, %17 : vector<64x32xf32>
    %cst_11 = arith.constant dense<0.000000e+00> : vector<64xf32>
    %19 = vector.multi_reduction <add>, %18, %cst_11 [1] : vector<64x32xf32> to vector<64xf32>
    %20 = vector.shape_cast %19 : vector<64xf32> to vector<64x1xf32>
    %cst_12 = arith.constant 1.000000e-24 : f32
    %21 = vector.broadcast %cst_12 : f32 to vector<64x1xf32>
    %22 = arith.maximumf %20, %21 : vector<64x1xf32>
    %23 = math.rsqrt %22 : vector<64x1xf32>
    %24 = vector.broadcast %23 : vector<64x1xf32> to vector<64x32xf32>
    %25 = arith.mulf %17, %24 : vector<64x32xf32>
    %26 = arith.truncf %25 : vector<64x32xf32> to vector<64x32xbf16>
    %c0_13 = arith.constant 0 : index
    %c0_14 = arith.constant 0 : index
    %27 = vector.load %arg6[%c0_13, %c0_14] : memref<64x32xbf16, #tpu.memory_space<vmem>>, vector<64x32xbf16>
    tpu.vector_store %arg6[%c0_13, %c0_14], %26 {strides = array<i32>} : memref<64x32xbf16, #tpu.memory_space<vmem>>, vector<64x32xbf16>,
    %28 = vector.extract_strided_slice %9 {offsets = [0, 8], sizes = [64, 8], strides = [1, 1]} : vector<64x24xbf16> to vector<64x8xbf16>
    %29 = vector.extract_strided_slice %10 {offsets = [8, 0], sizes = [8, 32], strides = [1, 1]} : vector<24x32xbf16> to vector<8x32xbf16>
    %cst_15 = arith.constant dense<0.000000e+00> : vector<64x32xf32>
    %30 = tpu.matmul %28, %29, %cst_15 {dimension_numbers = #tpu.dot_dimension_numbers<[1], [0], [0], [1], [0, 0, 1, 1], [], []>} : vector<64x8xbf16>, vector<8x32xbf16>, vector<64x32xf32> -> vector<64x32xf32>
    %31 = vector.extract_strided_slice %11 {offsets = [1, 0], sizes = [1, 32], strides = [1, 1]} : vector<3x32xf32> to vector<1x32xf32>
    %32 = vector.broadcast %31 : vector<1x32xf32> to vector<64x32xf32>
    %33 = arith.addf %30, %32 : vector<64x32xf32>
    %34 = arith.mulf %33, %33 : vector<64x32xf32>
    %cst_16 = arith.constant dense<0.000000e+00> : vector<64xf32>
    %35 = vector.multi_reduction <add>, %34, %cst_16 [1] : vector<64x32xf32> to vector<64xf32>
    %36 = vector.shape_cast %35 : vector<64xf32> to vector<64x1xf32>
    %cst_17 = arith.constant 1.000000e-24 : f32
    %37 = vector.broadcast %cst_17 : f32 to vector<64x1xf32>
    %38 = arith.maximumf %36, %37 : vector<64x1xf32>
    %39 = math.rsqrt %38 : vector<64x1xf32>
    %40 = vector.broadcast %39 : vector<64x1xf32> to vector<64x32xf32>
    %41 = arith.mulf %33, %40 : vector<64x32xf32>
    %42 = arith.truncf %41 : vector<64x32xf32> to vector<64x32xbf16>
    %c0_18 = arith.constant 0 : index
    %c0_19 = arith.constant 0 : index
    %43 = vector.load %arg7[%c0_18, %c0_19] : memref<64x32xbf16, #tpu.memory_space<vmem>>, vector<64x32xbf16>
    tpu.vector_store %arg7[%c0_18, %c0_19], %42 {strides = array<i32>} : memref<64x32xbf16, #tpu.memory_space<vmem>>, vector<64x32xbf16>,
    %44 = vector.extract_strided_slice %9 {offsets = [0, 16], sizes = [64, 8], strides = [1, 1]} : vector<64x24xbf16> to vector<64x8xbf16>
    %45 = vector.extract_strided_slice %10 {offsets = [16, 0], sizes = [8, 32], strides = [1, 1]} : vector<24x32xbf16> to vector<8x32xbf16>
    %cst_20 = arith.constant dense<0.000000e+00> : vector<64x32xf32>
    %46 = tpu.matmul %44, %45, %cst_20 {dimension_numbers = #tpu.dot_dimension_numbers<[1], [0], [0], [1], [0, 0, 1, 1], [], []>} : vector<64x8xbf16>, vector<8x32xbf16>, vector<64x32xf32> -> vector<64x32xf32>
    %47 = vector.extract_strided_slice %11 {offsets = [2, 0], sizes = [1, 32], strides = [1, 1]} : vector<3x32xf32> to vector<1x32xf32>
    %48 = vector.broadcast %47 : vector<1x32xf32> to vector<64x32xf32>
    %49 = arith.addf %46, %48 : vector<64x32xf32>
    %50 = arith.truncf %49 : vector<64x32xf32> to vector<64x32xbf16>
    %c0_21 = arith.constant 0 : index
    %c0_22 = arith.constant 0 : index
    %51 = vector.load %arg8[%c0_21, %c0_22] : memref<64x32xbf16, #tpu.memory_space<vmem>>, vector<64x32xbf16>
    tpu.vector_store %arg8[%c0_21, %c0_22], %50 {strides = array<i32>} : memref<64x32xbf16, #tpu.memory_space<vmem>>, vector<64x32xbf16>,
    return
  }
  func.func @transform_0(%arg0: i32) -> (i32, i32) {
    %c0_i32 = arith.constant 0 : i32
    %c0_i32_0 = arith.constant 0 : i32
    return %arg0, %c0_i32 : i32, i32
  }
  func.func @transform_1(%arg0: i32) -> (i32, i32) {
    %c0_i32 = arith.constant 0 : i32
    %c0_i32_0 = arith.constant 0 : i32
    %c0_i32_1 = arith.constant 0 : i32
    return %c0_i32, %c0_i32_0 : i32, i32
  }
  func.func @transform_2(%arg0: i32) -> (i32, i32) {
    %c0_i32 = arith.constant 0 : i32
    %c0_i32_0 = arith.constant 0 : i32
    %c0_i32_1 = arith.constant 0 : i32
    return %c0_i32, %c0_i32_0 : i32, i32
  }
  func.func @transform_3(%arg0: i32) -> (i32, i32) {
    %c0_i32 = arith.constant 0 : i32
    %c0_i32_0 = arith.constant 0 : i32
    %c0_i32_1 = arith.constant 0 : i32
    return %c0_i32, %c0_i32_0 : i32, i32
  }
  func.func @transform_4(%arg0: i32) -> (i32, i32) {
    %c0_i32 = arith.constant 0 : i32
    %c0_i32_0 = arith.constant 0 : i32
    %c0_i32_1 = arith.constant 0 : i32
    return %c0_i32, %c0_i32_0 : i32, i32
  }
  func.func @transform_5(%arg0: i32) -> (i32, i32) {
    %c0_i32 = arith.constant 0 : i32
    %c0_i32_0 = arith.constant 0 : i32
    return %arg0, %c0_i32 : i32, i32
  }
  func.func @transform_6(%arg0: i32) -> (i32, i32) {
    %c0_i32 = arith.constant 0 : i32
    %c0_i32_0 = arith.constant 0 : i32
    return %arg0, %c0_i32 : i32, i32
  }
  func.func @transform_7(%arg0: i32) -> (i32, i32) {
    %c0_i32 = arith.constant 0 : i32
    %c0_i32_0 = arith.constant 0 : i32
    return %arg0, %c0_i32 : i32, i32
  }
}

module attributes {stable_mosaic.version = 11 : i64} {
  func.func @_concat_proj_kernel(%arg0: i32, %arg1: memref<64x32xf32, #tpu.memory_space<vmem>>, %arg2: memref<64x32xf32, #tpu.memory_space<vmem>>, %arg3: memref<32x16xbf16, #tpu.memory_space<vmem>>, %arg4: memref<32x16xbf16, #tpu.memory_space<vmem>>, %arg5: memref<1x16xf32, #tpu.memory_space<vmem>>, %arg6: memref<16x32xbf16, #tpu.memory_space<vmem>>, %arg7: memref<1x32xf32, #tpu.memory_space<vmem>>, %arg8: memref<64x32xf32, #tpu.memory_space<vmem>>) attributes {dimension_semantics = [#tpu.dimension_semantics<parallel>], iteration_bounds = array<i64: 2>, scalar_prefetch = 0 : i64, scratch_operands = 0 : i64, tpu.core_type = #tpu.core_type<tc>, window_params = [{transform_indices = @transform_0, window_bounds = array<i64: 64, 32>}, {transform_indices = @transform_1, window_bounds = array<i64: 64, 32>}, {pipeline_mode = #tpu.pipeline_mode<synchronous>, transform_indices = @transform_2, window_bounds = array<i64: 32, 16>}, {pipeline_mode = #tpu.pipeline_mode<synchronous>, transform_indices = @transform_3, window_bounds = array<i64: 32, 16>}, {pipeline_mode = #tpu.pipeline_mode<synchronous>, transform_indices = @transform_4, window_bounds = array<i64: 1, 16>}, {pipeline_mode = #tpu.pipeline_mode<synchronous>, transform_indices = @transform_5, window_bounds = array<i64: 16, 32>}, {pipeline_mode = #tpu.pipeline_mode<synchronous>, transform_indices = @transform_6, window_bounds = array<i64: 1, 32>}, {transform_indices = @transform_7, window_bounds = array<i64: 64, 32>}]} {
    %c0 = arith.constant 0 : index
    %c0_0 = arith.constant 0 : index
    %0 = vector.load %arg1[%c0, %c0_0] : memref<64x32xf32, #tpu.memory_space<vmem>>, vector<64x32xf32>
    %1 = arith.truncf %0 : vector<64x32xf32> to vector<64x32xbf16>
    %c0_1 = arith.constant 0 : index
    %c0_2 = arith.constant 0 : index
    %2 = vector.load %arg2[%c0_1, %c0_2] : memref<64x32xf32, #tpu.memory_space<vmem>>, vector<64x32xf32>
    %3 = arith.truncf %2 : vector<64x32xf32> to vector<64x32xbf16>
    %c0_3 = arith.constant 0 : index
    %c0_4 = arith.constant 0 : index
    %4 = vector.load %arg3[%c0_3, %c0_4] : memref<32x16xbf16, #tpu.memory_space<vmem>>, vector<32x16xbf16>
    %cst = arith.constant dense<0.000000e+00> : vector<64x16xf32>
    %5 = tpu.matmul %1, %4, %cst {dimension_numbers = #tpu.dot_dimension_numbers<[1], [0], [0], [1], [0, 0, 1, 1], [], []>} : vector<64x32xbf16>, vector<32x16xbf16>, vector<64x16xf32> -> vector<64x16xf32>
    %c0_5 = arith.constant 0 : index
    %c0_6 = arith.constant 0 : index
    %6 = vector.load %arg4[%c0_5, %c0_6] : memref<32x16xbf16, #tpu.memory_space<vmem>>, vector<32x16xbf16>
    %cst_7 = arith.constant dense<0.000000e+00> : vector<64x16xf32>
    %7 = tpu.matmul %3, %6, %cst_7 {dimension_numbers = #tpu.dot_dimension_numbers<[1], [0], [0], [1], [0, 0, 1, 1], [], []>} : vector<64x32xbf16>, vector<32x16xbf16>, vector<64x16xf32> -> vector<64x16xf32>
    %8 = arith.addf %5, %7 : vector<64x16xf32>
    %c0_8 = arith.constant 0 : index
    %c0_9 = arith.constant 0 : index
    %9 = vector.load %arg5[%c0_8, %c0_9] : memref<1x16xf32, #tpu.memory_space<vmem>>, vector<1x16xf32>
    %10 = vector.broadcast %9 : vector<1x16xf32> to vector<64x16xf32>
    %11 = arith.addf %8, %10 : vector<64x16xf32>
    %cst_10 = arith.constant 0.000000e+00 : f32
    %12 = vector.broadcast %cst_10 : f32 to vector<64x16xf32>
    %13 = arith.maximumf %11, %12 : vector<64x16xf32>
    %14 = arith.truncf %13 : vector<64x16xf32> to vector<64x16xbf16>
    %c0_11 = arith.constant 0 : index
    %c0_12 = arith.constant 0 : index
    %15 = vector.load %arg6[%c0_11, %c0_12] : memref<16x32xbf16, #tpu.memory_space<vmem>>, vector<16x32xbf16>
    %cst_13 = arith.constant dense<0.000000e+00> : vector<64x32xf32>
    %16 = tpu.matmul %14, %15, %cst_13 {dimension_numbers = #tpu.dot_dimension_numbers<[1], [0], [0], [1], [0, 0, 1, 1], [], []>} : vector<64x16xbf16>, vector<16x32xbf16>, vector<64x32xf32> -> vector<64x32xf32>
    %c0_14 = arith.constant 0 : index
    %c0_15 = arith.constant 0 : index
    %17 = vector.load %arg7[%c0_14, %c0_15] : memref<1x32xf32, #tpu.memory_space<vmem>>, vector<1x32xf32>
    %18 = vector.broadcast %17 : vector<1x32xf32> to vector<64x32xf32>
    %19 = arith.addf %16, %18 : vector<64x32xf32>
    %c0_16 = arith.constant 0 : index
    %c0_17 = arith.constant 0 : index
    %20 = vector.load %arg8[%c0_16, %c0_17] : memref<64x32xf32, #tpu.memory_space<vmem>>, vector<64x32xf32>
    tpu.vector_store %arg8[%c0_16, %c0_17], %19 {strides = array<i32>} : memref<64x32xf32, #tpu.memory_space<vmem>>, vector<64x32xf32>,
    return
  }
  func.func @transform_0(%arg0: i32) -> (i32, i32) {
    %c0_i32 = arith.constant 0 : i32
    %c0_i32_0 = arith.constant 0 : i32
    return %arg0, %c0_i32 : i32, i32
  }
  func.func @transform_1(%arg0: i32) -> (i32, i32) {
    %c0_i32 = arith.constant 0 : i32
    %c0_i32_0 = arith.constant 0 : i32
    return %arg0, %c0_i32 : i32, i32
  }
  func.func @transform_2(%arg0: i32) -> (i32, i32) {
    %c0_i32 = arith.constant 0 : i32
    %c0_i32_0 = arith.constant 0 : i32
    %c0_i32_1 = arith.constant 0 : i32
    return %c0_i32, %c0_i32_0 : i32, i32
  }
  func.func @transform_3(%arg0: i32) -> (i32, i32) {
    %c0_i32 = arith.constant 0 : i32
    %c0_i32_0 = arith.constant 0 : i32
    %c0_i32_1 = arith.constant 0 : i32
    return %c0_i32, %c0_i32_0 : i32, i32
  }
  func.func @transform_4(%arg0: i32) -> (i32, i32) {
    %c0_i32 = arith.constant 0 : i32
    %c0_i32_0 = arith.constant 0 : i32
    %c0_i32_1 = arith.constant 0 : i32
    return %c0_i32, %c0_i32_0 : i32, i32
  }
  func.func @transform_5(%arg0: i32) -> (i32, i32) {
    %c0_i32 = arith.constant 0 : i32
    %c0_i32_0 = arith.constant 0 : i32
    %c0_i32_1 = arith.constant 0 : i32
    return %c0_i32, %c0_i32_0 : i32, i32
  }
  func.func @transform_6(%arg0: i32) -> (i32, i32) {
    %c0_i32 = arith.constant 0 : i32
    %c0_i32_0 = arith.constant 0 : i32
    %c0_i32_1 = arith.constant 0 : i32
    return %c0_i32, %c0_i32_0 : i32, i32
  }
  func.func @transform_7(%arg0: i32) -> (i32, i32) {
    %c0_i32 = arith.constant 0 : i32
    %c0_i32_0 = arith.constant 0 : i32
    return %arg0, %c0_i32 : i32, i32
  }
}

module attributes {stable_mosaic.version = 11 : i64} {
  func.func @_gather_proj_kernel(%arg0: i32, %arg1: i32, %arg2: memref<1x1x32xi32, #tpu.memory_space<vmem>>, %arg3: memref<1x32x32xf32, #tpu.memory_space<vmem>>, %arg4: memref<1x32x32xf32, #tpu.memory_space<vmem>>, %arg5: memref<32x8xbf16, #tpu.memory_space<vmem>>, %arg6: memref<1x8xf32, #tpu.memory_space<vmem>>, %arg7: memref<8x32xbf16, #tpu.memory_space<vmem>>, %arg8: memref<1x32xf32, #tpu.memory_space<vmem>>, %arg9: memref<1x32x32xf32, #tpu.memory_space<vmem>>, %arg10: memref<32x8xbf16, #tpu.memory_space<vmem>>, %arg11: memref<32x8xbf16, #tpu.memory_space<vmem>>) attributes {dimension_semantics = [#tpu.dimension_semantics<parallel>, #tpu.dimension_semantics<arbitrary>], iteration_bounds = array<i64: 2, 2>, scalar_prefetch = 0 : i64, scratch_operands = 2 : i64, tpu.core_type = #tpu.core_type<tc>, window_params = [{transform_indices = @transform_0, window_bounds = array<i64: 1, 1, 32>}, {transform_indices = @transform_1, window_bounds = array<i64: 1, 32, 32>}, {transform_indices = @transform_2, window_bounds = array<i64: 1, 32, 32>}, {pipeline_mode = #tpu.pipeline_mode<synchronous>, transform_indices = @transform_3, window_bounds = array<i64: 32, 8>}, {pipeline_mode = #tpu.pipeline_mode<synchronous>, transform_indices = @transform_4, window_bounds = array<i64: 1, 8>}, {pipeline_mode = #tpu.pipeline_mode<synchronous>, transform_indices = @transform_5, window_bounds = array<i64: 8, 32>}, {pipeline_mode = #tpu.pipeline_mode<synchronous>, transform_indices = @transform_6, window_bounds = array<i64: 1, 32>}, {transform_indices = @transform_7, window_bounds = array<i64: 1, 32, 32>}]} {
    %c0_i32 = arith.constant 0 : i32
    %0 = arith.cmpi eq, %arg1, %c0_i32 : i32
    %1 = arith.extui %0 : i1 to i32
    %c0_i32_0 = arith.constant 0 : i32
    %2 = arith.cmpi ne, %1, %c0_i32_0 : i32
    scf.if %2 {
      %c0_22 = arith.constant 0 : index
      %c0_23 = arith.constant 0 : index
      %c0_24 = arith.constant 0 : index
      %28 = vector.load %arg2[%c0_22, %c0_23, %c0_24] : memref<1x1x32xi32, #tpu.memory_space<vmem>>, vector<1x1x32xi32>
      %29 = vector.shape_cast %28 : vector<1x1x32xi32> to vector<1x32xi32>
      %30 = tpu.iota {dimensions = array<i32: 0>} : vector<32x32xi32>
      %31 = vector.broadcast %29 : vector<1x32xi32> to vector<32x32xi32>
      %32 = arith.cmpi eq, %30, %31 : vector<32x32xi32>
      %33 = arith.extui %32 : vector<32x32xi1> to vector<32x32xi32>
      %34 = arith.sitofp %33 : vector<32x32xi32> to vector<32x32xf32>
      %35 = arith.truncf %34 : vector<32x32xf32> to vector<32x32xbf16>
      %c32_i32 = arith.constant 32 : i32
      %36 = vector.broadcast %c32_i32 : i32 to vector<1x32xi32>
      %37 = arith.subi %29, %36 : vector<1x32xi32>
      %38 = vector.broadcast %37 : vector<1x32xi32> to vector<32x32xi32>
      %39 = arith.cmpi eq, %30, %38 : vector<32x32xi32>
      %40 = arith.extui %39 : vector<32x32xi1> to vector<32x32xi32>
      %41 = arith.sitofp %40 : vector<32x32xi32> to vector<32x32xf32>
      %42 = arith.truncf %41 : vector<32x32xf32> to vector<32x32xbf16>
      %c0_25 = arith.constant 0 : index
      %c0_26 = arith.constant 0 : index
      %43 = vector.load %arg5[%c0_25, %c0_26] : memref<32x8xbf16, #tpu.memory_space<vmem>>, vector<32x8xbf16>
      %cst_27 = arith.constant dense<0.000000e+00> : vector<32x8xf32>
      %44 = tpu.matmul %35, %43, %cst_27 {dimension_numbers = #tpu.dot_dimension_numbers<[1], [0], [0], [1], [0, 0, 1, 1], [], []>} : vector<32x32xbf16>, vector<32x8xbf16>, vector<32x8xf32> -> vector<32x8xf32>
      %45 = arith.truncf %44 : vector<32x8xf32> to vector<32x8xbf16>
      %c0_28 = arith.constant 0 : index
      %c0_29 = arith.constant 0 : index
      %46 = vector.load %arg10[%c0_28, %c0_29] : memref<32x8xbf16, #tpu.memory_space<vmem>>, vector<32x8xbf16>
      tpu.vector_store %arg10[%c0_28, %c0_29], %45 {strides = array<i32>} : memref<32x8xbf16, #tpu.memory_space<vmem>>, vector<32x8xbf16>,
      %c0_30 = arith.constant 0 : index
      %c0_31 = arith.constant 0 : index
      %47 = vector.load %arg5[%c0_30, %c0_31] : memref<32x8xbf16, #tpu.memory_space<vmem>>, vector<32x8xbf16>
      %cst_32 = arith.constant dense<0.000000e+00> : vector<32x8xf32>
      %48 = tpu.matmul %42, %47, %cst_32 {dimension_numbers = #tpu.dot_dimension_numbers<[1], [0], [0], [1], [0, 0, 1, 1], [], []>} : vector<32x32xbf16>, vector<32x8xbf16>, vector<32x8xf32> -> vector<32x8xf32>
      %49 = arith.truncf %48 : vector<32x8xf32> to vector<32x8xbf16>
      %c0_33 = arith.constant 0 : index
      %c0_34 = arith.constant 0 : index
      %50 = vector.load %arg11[%c0_33, %c0_34] : memref<32x8xbf16, #tpu.memory_space<vmem>>, vector<32x8xbf16>
      tpu.vector_store %arg11[%c0_33, %c0_34], %49 {strides = array<i32>} : memref<32x8xbf16, #tpu.memory_space<vmem>>, vector<32x8xbf16>,
    } else {
    }
    %c0 = arith.constant 0 : index
    %c0_1 = arith.constant 0 : index
    %c0_2 = arith.constant 0 : index
    %3 = vector.load %arg3[%c0, %c0_1, %c0_2] : memref<1x32x32xf32, #tpu.memory_space<vmem>>, vector<1x32x32xf32>
    %4 = vector.shape_cast %3 : vector<1x32x32xf32> to vector<32x32xf32>
    %5 = arith.truncf %4 : vector<32x32xf32> to vector<32x32xbf16>
    %c0_3 = arith.constant 0 : index
    %c0_4 = arith.constant 0 : index
    %c0_5 = arith.constant 0 : index
    %6 = vector.load %arg4[%c0_3, %c0_4, %c0_5] : memref<1x32x32xf32, #tpu.memory_space<vmem>>, vector<1x32x32xf32>
    %7 = vector.shape_cast %6 : vector<1x32x32xf32> to vector<32x32xf32>
    %8 = arith.truncf %7 : vector<32x32xf32> to vector<32x32xbf16>
    %c0_6 = arith.constant 0 : index
    %c0_7 = arith.constant 0 : index
    %9 = vector.load %arg10[%c0_6, %c0_7] : memref<32x8xbf16, #tpu.memory_space<vmem>>, vector<32x8xbf16>
    %cst = arith.constant dense<0.000000e+00> : vector<32x8xf32>
    %10 = tpu.matmul %5, %9, %cst {dimension_numbers = #tpu.dot_dimension_numbers<[1], [0], [0], [1], [0, 0, 1, 1], [], []>} : vector<32x32xbf16>, vector<32x8xbf16>, vector<32x8xf32> -> vector<32x8xf32>
    %c0_8 = arith.constant 0 : index
    %c0_9 = arith.constant 0 : index
    %11 = vector.load %arg11[%c0_8, %c0_9] : memref<32x8xbf16, #tpu.memory_space<vmem>>, vector<32x8xbf16>
    %cst_10 = arith.constant dense<0.000000e+00> : vector<32x8xf32>
    %12 = tpu.matmul %8, %11, %cst_10 {dimension_numbers = #tpu.dot_dimension_numbers<[1], [0], [0], [1], [0, 0, 1, 1], [], []>} : vector<32x32xbf16>, vector<32x8xbf16>, vector<32x8xf32> -> vector<32x8xf32>
    %13 = arith.addf %10, %12 : vector<32x8xf32>
    %c0_11 = arith.constant 0 : index
    %c0_12 = arith.constant 0 : index
    %14 = vector.load %arg6[%c0_11, %c0_12] : memref<1x8xf32, #tpu.memory_space<vmem>>, vector<1x8xf32>
    %15 = vector.broadcast %14 : vector<1x8xf32> to vector<32x8xf32>
    %16 = arith.addf %13, %15 : vector<32x8xf32>
    %cst_13 = arith.constant 0.000000e+00 : f32
    %17 = vector.broadcast %cst_13 : f32 to vector<32x8xf32>
    %18 = arith.maximumf %16, %17 : vector<32x8xf32>
    %19 = arith.truncf %18 : vector<32x8xf32> to vector<32x8xbf16>
    %c0_14 = arith.constant 0 : index
    %c0_15 = arith.constant 0 : index
    %20 = vector.load %arg7[%c0_14, %c0_15] : memref<8x32xbf16, #tpu.memory_space<vmem>>, vector<8x32xbf16>
    %cst_16 = arith.constant dense<0.000000e+00> : vector<32x32xf32>
    %21 = tpu.matmul %19, %20, %cst_16 {dimension_numbers = #tpu.dot_dimension_numbers<[1], [0], [0], [1], [0, 0, 1, 1], [], []>} : vector<32x8xbf16>, vector<8x32xbf16>, vector<32x32xf32> -> vector<32x32xf32>
    %c0_17 = arith.constant 0 : index
    %c0_18 = arith.constant 0 : index
    %22 = vector.load %arg8[%c0_17, %c0_18] : memref<1x32xf32, #tpu.memory_space<vmem>>, vector<1x32xf32>
    %23 = vector.broadcast %22 : vector<1x32xf32> to vector<32x32xf32>
    %24 = arith.addf %21, %23 : vector<32x32xf32>
    %c0_19 = arith.constant 0 : index
    %c0_20 = arith.constant 0 : index
    %c0_21 = arith.constant 0 : index
    %25 = vector.load %arg9[%c0_19, %c0_20, %c0_21] : memref<1x32x32xf32, #tpu.memory_space<vmem>>, vector<1x32x32xf32>
    %26 = vector.shape_cast %25 : vector<1x32x32xf32> to vector<32x32xf32>
    %27 = vector.shape_cast %24 : vector<32x32xf32> to vector<1x32x32xf32>
    tpu.vector_store %arg9[%c0_19, %c0_20, %c0_21], %27 {strides = array<i32>} : memref<1x32x32xf32, #tpu.memory_space<vmem>>, vector<1x32x32xf32>,
    return
  }
  func.func @transform_0(%arg0: i32, %arg1: i32) -> (i32, i32, i32) {
    %c0_i32 = arith.constant 0 : i32
    %c0_i32_0 = arith.constant 0 : i32
    %c0_i32_1 = arith.constant 0 : i32
    return %arg0, %c0_i32, %c0_i32_0 : i32, i32, i32
  }
  func.func @transform_1(%arg0: i32, %arg1: i32) -> (i32, i32, i32) {
    %c0_i32 = arith.constant 0 : i32
    %c0_i32_0 = arith.constant 0 : i32
    return %arg0, %arg1, %c0_i32 : i32, i32, i32
  }
  func.func @transform_2(%arg0: i32, %arg1: i32) -> (i32, i32, i32) {
    %c0_i32 = arith.constant 0 : i32
    %c0_i32_0 = arith.constant 0 : i32
    return %arg0, %arg1, %c0_i32 : i32, i32, i32
  }
  func.func @transform_3(%arg0: i32, %arg1: i32) -> (i32, i32) {
    %c0_i32 = arith.constant 0 : i32
    %c0_i32_0 = arith.constant 0 : i32
    %c0_i32_1 = arith.constant 0 : i32
    return %c0_i32, %c0_i32_0 : i32, i32
  }
  func.func @transform_4(%arg0: i32, %arg1: i32) -> (i32, i32) {
    %c0_i32 = arith.constant 0 : i32
    %c0_i32_0 = arith.constant 0 : i32
    %c0_i32_1 = arith.constant 0 : i32
    return %c0_i32, %c0_i32_0 : i32, i32
  }
  func.func @transform_5(%arg0: i32, %arg1: i32) -> (i32, i32) {
    %c0_i32 = arith.constant 0 : i32
    %c0_i32_0 = arith.constant 0 : i32
    %c0_i32_1 = arith.constant 0 : i32
    return %c0_i32, %c0_i32_0 : i32, i32
  }
  func.func @transform_6(%arg0: i32, %arg1: i32) -> (i32, i32) {
    %c0_i32 = arith.constant 0 : i32
    %c0_i32_0 = arith.constant 0 : i32
    %c0_i32_1 = arith.constant 0 : i32
    return %c0_i32, %c0_i32_0 : i32, i32
  }
  func.func @transform_7(%arg0: i32, %arg1: i32) -> (i32, i32, i32) {
    %c0_i32 = arith.constant 0 : i32
    %c0_i32_0 = arith.constant 0 : i32
    return %arg0, %arg1, %c0_i32 : i32, i32, i32
  }
}

module attributes {stable_mosaic.version = 11 : i64} {
  func.func @_pre_kernel(%arg0: i32, %arg1: i32, %arg2: memref<1x2x64xf32, #tpu.memory_space<vmem>>, %arg3: memref<1x64x32xbf16, #tpu.memory_space<vmem>>, %arg4: memref<1x64x32xbf16, #tpu.memory_space<vmem>>, %arg5: memref<1x2x64xf32, #tpu.memory_space<vmem>>) attributes {dimension_semantics = [#tpu.dimension_semantics<parallel>, #tpu.dimension_semantics<parallel>], iteration_bounds = array<i64: 2, 1>, scalar_prefetch = 0 : i64, scratch_operands = 0 : i64, tpu.core_type = #tpu.core_type<tc>, window_params = [{transform_indices = @transform_0, window_bounds = array<i64: 1, 2, 64>}, {transform_indices = @transform_1, window_bounds = array<i64: 1, 64, 32>}, {transform_indices = @transform_2, window_bounds = array<i64: 1, 64, 32>}, {transform_indices = @transform_3, window_bounds = array<i64: 1, 2, 64>}]} {
    %c0 = arith.constant 0 : index
    %c0_0 = arith.constant 0 : index
    %c0_1 = arith.constant 0 : index
    %0 = vector.load %arg2[%c0, %c0_0, %c0_1] : memref<1x2x64xf32, #tpu.memory_space<vmem>>, vector<1x2x64xf32>
    %1 = vector.shape_cast %0 : vector<1x2x64xf32> to vector<2x64xf32>
    %2 = arith.truncf %1 : vector<2x64xf32> to vector<2x64xbf16>
    %c0_2 = arith.constant 0 : index
    %c0_3 = arith.constant 0 : index
    %c0_4 = arith.constant 0 : index
    %3 = vector.load %arg3[%c0_2, %c0_3, %c0_4] : memref<1x64x32xbf16, #tpu.memory_space<vmem>>, vector<1x64x32xbf16>
    %4 = vector.shape_cast %3 : vector<1x64x32xbf16> to vector<64x32xbf16>
    %c0_5 = arith.constant 0 : index
    %c0_6 = arith.constant 0 : index
    %c0_7 = arith.constant 0 : index
    %5 = vector.load %arg4[%c0_5, %c0_6, %c0_7] : memref<1x64x32xbf16, #tpu.memory_space<vmem>>, vector<1x64x32xbf16>
    %6 = vector.shape_cast %5 : vector<1x64x32xbf16> to vector<64x32xbf16>
    %cst = arith.constant dense<0.000000e+00> : vector<2x32xf32>
    %7 = tpu.matmul %2, %4, %cst {dimension_numbers = #tpu.dot_dimension_numbers<[1], [0], [0], [1], [0, 0, 1, 1], [], []>} : vector<2x64xbf16>, vector<64x32xbf16>, vector<2x32xf32> -> vector<2x32xf32>
    %8 = arith.truncf %7 : vector<2x32xf32> to vector<2x32xbf16>
    %cst_8 = arith.constant dense<0.000000e+00> : vector<2x64xf32>
    %9 = tpu.matmul %8, %6, %cst_8 {dimension_numbers = #tpu.dot_dimension_numbers<[1], [1], [0], [0], [0, 0, 1, 0], [], []>} : vector<2x32xbf16>, vector<64x32xbf16>, vector<2x64xf32> -> vector<2x64xf32>
    %cst_9 = arith.constant 0.176776692 : f32
    %10 = vector.broadcast %cst_9 : f32 to vector<2x64xf32>
    %11 = arith.mulf %9, %10 : vector<2x64xf32>
    %c0_10 = arith.constant 0 : index
    %c0_11 = arith.constant 0 : index
    %c0_12 = arith.constant 0 : index
    %12 = vector.load %arg5[%c0_10, %c0_11, %c0_12] : memref<1x2x64xf32, #tpu.memory_space<vmem>>, vector<1x2x64xf32>
    %13 = vector.shape_cast %12 : vector<1x2x64xf32> to vector<2x64xf32>
    %14 = vector.shape_cast %11 : vector<2x64xf32> to vector<1x2x64xf32>
    tpu.vector_store %arg5[%c0_10, %c0_11, %c0_12], %14 {strides = array<i32>} : memref<1x2x64xf32, #tpu.memory_space<vmem>>, vector<1x2x64xf32>,
    return
  }
  func.func @transform_0(%arg0: i32, %arg1: i32) -> (i32, i32, i32) {
    %c0_i32 = arith.constant 0 : i32
    %c0_i32_0 = arith.constant 0 : i32
    %c0_i32_1 = arith.constant 0 : i32
    return %arg0, %c0_i32, %c0_i32_0 : i32, i32, i32
  }
  func.func @transform_1(%arg0: i32, %arg1: i32) -> (i32, i32, i32) {
    %c0_i32 = arith.constant 0 : i32
    %c0_i32_0 = arith.constant 0 : i32
    %c0_i32_1 = arith.constant 0 : i32
    return %arg0, %c0_i32, %c0_i32_0 : i32, i32, i32
  }
  func.func @transform_2(%arg0: i32, %arg1: i32) -> (i32, i32, i32) {
    %c0_i32 = arith.constant 0 : i32
    %c0_i32_0 = arith.constant 0 : i32
    return %arg0, %arg1, %c0_i32 : i32, i32, i32
  }
  func.func @transform_3(%arg0: i32, %arg1: i32) -> (i32, i32, i32) {
    %c0_i32 = arith.constant 0 : i32
    %c0_i32_0 = arith.constant 0 : i32
    return %arg0, %c0_i32, %arg1 : i32, i32, i32
  }
}

</mosaic_0001>

<bundles_post_ra>
// kernel: tpu_custom_call.1
= control target key start
LH: loop header
LB: loop body
LE: loop exit
PB: predicated region body
PF: predicated region fallthrough
CT: control target
= control target key end

     0   :  { %7 = vsyncpa [#allocation3], 0  ;;  %s688_s0 = inlined_call_operand.hbm [shape: f32[32,128], index: 0, kind: input, shape index: {}]   ;;  %s689_s1 = inlined_call_operand.hbm [shape: f32[8,128], index: 1, kind: input, shape index: {}]   ;;  %s690_s2 = inlined_call_operand.hbm [shape: f32[32,128], index: 2, kind: output, shape index: {}]  }
   0x1   :  { %9 = vsyncpa [#allocation3 + $0x1], 0 }
   0x2   :  { %10 = vsyncpa [#allocation6], 0 }
   0x3   :  { %11 = vsyncpa [#allocation4], 0 }
   0x4   :  { %13 = vsyncpa [#allocation4 + $0x1], 0  ;;  %s489_s9 = smov 0   ;;  %s491_s10 = smov 0  }
   0x5   :  { %s493_s11 = smov 0   ;;  %s495_s12 = smov 0  }
   0x6 LB: > { %s510_s13 = sadd.s32 4294967295, %s469_s12   ;;  %s270_s14 = sadd.s32 4294967294, %s469_s12   ;;  %s469_s12 = sphi %s495_s12, %s713_s12   ;;  %s465_s11 = sphi %s493_s11, %s712_s11   ;;  %s461_s10 = sphi %s491_s10, %s711_s10   ;;  %s457_s9 = sphi %s489_s9, %s710_s9  }
   0x7   : > { %p39_p0 = scmp.ne.s32.totalorder %s461_s10, %s457_s9  ;;  %p691_p1 = scmp.eq.s32.totalorder %s510_s13, 0 }
   0x8   : > { %p90_p3 = scmp.eq.s32.totalorder %s270_s14, 3  ;;  %p271_p5 = scmp.ge.s32.totalorder %s469_s12, 1 }
   0x9   : > { %p519_p4 = por %p691_p1, %p39_p0  ;;  %p97_p7 = scmp.lt.s32.totalorder %s469_s12, 5 }
   0xa   : > { %p524_p6 = por %p90_p3, %p39_p0  ;;  %s471_s18 = smov [#allocation5]  }
   0xb   : > { %s694_s15 = scalar_select %p519_p4, 1, 0 }
   0xc   : > { %s695_s16 = scalar_select %p524_p6, 1, 0 }
   0xd   : > { %p529_p8 = pnand %p271_p5, %p97_p7  ;;  %s110_s19 = sshll.u32 %s471_s18, 4  ;;  %s111_s19 = int_to_ptr.vmem [resolvable:$true] %s110_s19 }
   0xe   : > { %s536_s20 = sadd.s32 1, %s469_s12   ;;  %s26_s24 = sadd.s32 1, %s465_s11 }
   0xf   : > { %s696_s17 = scalar_select %p529_p8, 1, 0 }
  0x10   : > { %p292_p9 = pneg %p529_p8  ;;  %s23_s22 = ssub.s32 %s469_s12, %s536_s20 }
  0x11   : > { %p546_p11 = scmp.eq.s32.totalorder %s23_s22, 0  ;;  %s341_s27 = scalar_lea.hbm %s689_s1, 128 }
  0x12   : > { %p540_p10 = pnand %p292_p9, %p691_p1  ;;  %p342_p13 = scmp.ne.s32.totalorder %s689_s1, %s341_s27 }
  0x13   : > { %s698_s23 = scalar_select %p546_p11, 1, 0 }
  0x14   : > { %p343_p0 = pneg %p540_p10  ;;  %p348_p7 = scmp.lt.u32.totalorder %s341_s27, %s689_s1 }
  0x16   : > { %p344_p3 = pnand %p343_p0, %p342_p13 }
  0x18   : > { %p345_p5 = pneg %p344_p3 }
  0x1a   : > { %p350_p9 = pnand %p348_p7, %p345_p5 }
  0x1c   : > { %353 = shalt.err (!%p350_p9)
}
  0x1d   : > { %s354_s4 = scalar_lea.vmem %s111_s19, 128  ;;  %p362_p6 = scmp.lt.s32.totalorder %s111_s19, %s111_s19 }
  0x1e   : > { %p355_p1 = scmp.ne.s32.totalorder %s111_s19, %s354_s4  ;;  %p363_p4 = scmp.lt.s32.totalorder %s354_s4, %s354_s4 }
  0x20   : > { %p357_p2 = pnand %p355_p1, %p343_p0  ;;  %p364_p8 = por %p363_p4, %p362_p6 }
  0x22   : > { %p358_p12 = pneg %p357_p2 }
  0x24   : > { %p365_p11 = pnand %p364_p8, %p358_p12 }
  0x26   : > { %368 = shalt.err (!%p365_p11)
}
  0x27   : > { %295 = dma.hbm_to_vmem [thread:$0]  (!%p540_p10), %s689_s1, 128, %s111_s19, [#allocation6]  }
  0x28   : > { %p699_p1 = scmp.ne.s32.totalorder %s698_s23, 0  ;;  %p34_p2 = scmp.eq.s32.totalorder %s469_s12, 0 }
  0x29   : > { %p700_p4 = scmp.ne.s32.totalorder %s465_s11, %s461_s10  ;;  %p701_p6 = scmp.eq.s32.totalorder %s510_s13, 3 }
  0x2a   : > { %s572_s7 = scalar_select %p699_p1, %s465_s11, %s26_s24  }
  0x2b   : > { %p580_p8 = por %p701_p6, %p700_p4  ;;  %p305_p11 = scmp.lt.s32.totalorder %s469_s12, 4 }
  0x2c   : > { %s121_s14 = sand.u32 1, %s465_s11   ;;  %p703_p12 = pmov %p700_p4 }
  0x2d   : > { %s274_s18 = sshll.u32 %s121_s14, 3  ;;  %s275_s21 = sshll.u32 %s469_s12, 7 }
  0x2e   : > { %p35_p13 = por %p34_p2, %p703_p12  ;;  %s593_s19 = scalar_lea.hbm %s688_s0, %s275_s21 }
  0x2f   : > { %s125_s23 = scalar_lea.vmem [#allocation2], %s274_s18  ;;  %s122_s27 = scalar_lea.sflag [#allocation3], %s121_s14 }
  0x30   : > { %s132_s24 = sshll.u32 %s125_s23, 4  ;;  %p595_p10 = pnand %p305_p11, %p35_p13  ;;  %s599_s24 = int_to_ptr.vmem [resolvable:$true] %s132_s24 }
  0x31   : > { %s369_s28 = scalar_lea.hbm %s593_s19, 128  ;;  %s374_s3 = scalar_lea.hbm %s688_s0, 512 }
  0x32   : > { %p370_p0 = scmp.ne.s32.totalorder %s593_s19, %s369_s28  ;;  %p371_p3 = pneg %p595_p10 }
  0x33   : > { %p375_p9 = scmp.lt.u32.totalorder %s593_s19, %s688_s0  ;;  %p376_p1 = scmp.lt.u32.totalorder %s374_s3, %s369_s28 }
  0x34   : > { %p372_p5 = pnand %p371_p3, %p370_p0  ;;  %p378_p4 = scmp.lt.u32.totalorder %s369_s28, %s593_s19 }
  0x35   : > { %p377_p2 = por %p376_p1, %p375_p9 }
  0x36   : > { %p373_p7 = pneg %p372_p5 }
  0x37   : > { %p379_p6 = por %p378_p4, %p377_p2 }
  0x39   : > { %p380_p11 = pnand %p379_p6, %p373_p7 }
  0x3b   : > { %383 = shalt.err (!%p380_p11)
}
  0x3c   : > { %s384_s6 = scalar_lea.vmem %s599_s24, 128  ;;  %s472_s14 = smov [#allocation2]  }
  0x3d   : > { %p385_p12 = scmp.ne.s32.totalorder %s599_s24, %s384_s6  ;;  %s389_s18 = sshll.u32 %s472_s14, 4  ;;  %s390_s18 = int_to_ptr.vmem [resolvable:$false] %s389_s18 }
  0x3e   : > { %s391_s21 = scalar_lea.vmem %s390_s18, 256  ;;  %p392_p5 = scmp.lt.s32.totalorder %s599_s24, %s390_s18 }
  0x3f   : > { %p387_p13 = pnand %p385_p12, %p371_p3  ;;  %p393_p9 = scmp.lt.s32.totalorder %s391_s21, %s384_s6 }
  0x41   : > { %p388_p0 = pneg %p387_p13  ;;  %p394_p1 = por %p393_p9, %p392_p5 }
  0x43   : > { %p395_p2 = pnand %p394_p1, %p388_p0 }
  0x45   : > { %398 = shalt.err (!%p395_p2)
}
  0x46   : > { %299 = dma.hbm_to_vmem [thread:$0]  (!%p595_p10), %s593_s19, 128, %s599_s24, %s122_s27  }
  0x47   : > { %p705_p7 = scmp.ne.s32.totalorder %s696_s17, 0 }
  0x48   : > { %s629_s22 = sand.u32 (!%p705_p7), 1, %s461_s10   ;;  %p706_p3 = scmp.ne.s32.totalorder (!%p705_p7), %s694_s15, 0 }
  0x49   : > { %141 = sbr.rel (%p705_p7) target bundleno = 109 (0x6d), region = 28  ;;  %s277_s25 = sshll.u32 (!%p705_p7), %s629_s22, 3 }
  0x4a   : > { %s144_s23 = scalar_lea.sflag (!%p705_p7), [#allocation3], %s629_s22  ;;  %s147_s28 = scalar_lea.vmem (!%p705_p7), [#allocation2], %s277_s25 }
  0x50   : > { %444 = dma.done.wait (%p706_p3), %s144_s23, 128  }
  0x51   : > { %446 = vsyncadd (%p706_p3), %s144_s23, 4294967168  ;;  %p707_p4 = scmp.eq.s32.totalorder %s510_s13, 0 }
  0x53   : > { %448 = dma.done.wait (%p707_p4), [#allocation6], 128   ;;  %p708_p10 = pmov %p707_p4 }
  0x54   : > { %s171_s17 = scalar_lea.vmem [#allocation7], %s277_s25  ;;  %s281_s24 = sshll.u32 %s510_s13, 7  ;;  %v172_v0 = vld [vmem:[%s147_s28] sm:$0xff]  ;;  %v173_v1 = vld [vmem:[#allocation5] sm:$0xff] }
  0x55   : > { %450 = vsyncadd (%p708_p10), [#allocation6], 4294967168  ;;  %s190_s19 = sshll.u32 %s171_s17, 4  ;;  %v174_v2 = vadd.f32 %v173_v1, %v172_v0  ;;  %s647_s27 = scalar_lea.hbm %s690_s2, %s281_s24  ;;  %s642_s19 = int_to_ptr.vmem [resolvable:$true] %s190_s19 }
  0x56   : > { %s177_s29 = scalar_lea.sflag [#allocation4], %s629_s22  ;;  %s399_s30 = scalar_lea.vmem %s642_s19, 128 }
  0x57   : > { %175 = vst [vmem:[%s171_s17] sm:$0xff] %v174_v2  ;;  %p400_p6 = scmp.ne.s32.totalorder %s642_s19, %s399_s30  ;;  %s473_s13 = smov [#allocation7]  }
  0x58   : > { %s403_s3 = sshll.u32 %s473_s13, 4  ;;  %s404_s3 = int_to_ptr.vmem [resolvable:$false] %s403_s3 }
  0x59   : > { %p401_p11 = pnand %p400_p6, %p580_p8  ;;  %s405_s4 = scalar_lea.vmem %s404_s3, 256 }
  0x5a   : > { %p406_p13 = scmp.lt.s32.totalorder %s642_s19, %s404_s3  ;;  %p407_p0 = scmp.lt.s32.totalorder %s405_s4, %s399_s30 }
  0x5b   : > { %p402_p12 = pneg %p401_p11 }
  0x5c   : > { %p408_p5 = por %p407_p0, %p406_p13 }
  0x5e   : > { %p409_p9 = pnand %p408_p5, %p402_p12 }
  0x60   : > { %412 = shalt.err (!%p409_p9)
}
  0x61   : > { %s413_s5 = scalar_lea.hbm %s647_s27, 128  ;;  %s417_s18 = scalar_lea.hbm %s690_s2, 512 }
  0x62   : > { %p414_p1 = scmp.ne.s32.totalorder %s647_s27, %s413_s5  ;;  %p418_p3 = scmp.lt.u32.totalorder %s647_s27, %s690_s2 }
  0x63   : > { %p419_p4 = scmp.lt.u32.totalorder %s417_s18, %s413_s5  ;;  %p421_p6 = scmp.lt.u32.totalorder %s413_s5, %s647_s27 }
  0x64   : > { %p415_p2 = pnand %p414_p1, %p580_p8 }
  0x65   : > { %p420_p10 = por %p419_p4, %p418_p3 }
  0x66   : > { %p416_p7 = pneg %p415_p2 }
  0x67   : > { %p422_p11 = por %p421_p6, %p420_p10 }
  0x69   : > { %p423_p12 = pnand %p422_p11, %p416_p7 }
  0x6b   : > { %426 = shalt.err (!%p423_p12)
}
  0x6c   : > { %290 = dma.vmem_to_hbm [thread:$0]  (%p580_p8), %s642_s19, 128, %s647_s27, %s177_s29  }
  0x6d PF: > { %p307_p13 = scmp.ge.s32.totalorder %s469_s12, 2  ;;  %s202_s25 = sand.u32 1, %s457_s9  }
  0x6e   : > { %p709_p0 = scmp.ne.s32.totalorder %s695_s16, 0  ;;  %s203_s23 = scalar_lea.sflag [#allocation4], %s202_s25 }
  0x70   : > { %p301_p5 = pnand %p307_p13, %p709_p0 }
  0x72   : > { %452 = dma.done.wait (!%p301_p5), %s203_s23, 128  }
  0x73   : > { %454 = vsyncadd (!%p301_p5), %s203_s23, 4294967168  ;;  %p16_p9 = scmp.ge.s32.totalorder %s536_s20, 6   ;;  %s710_s9 = smov %s461_s10 }
  0x74   : > { %s711_s10 = smov %s465_s11  ;;  %s712_s11 = smov %s572_s7 }
  0x75   : > { %s713_s12 = smov %s536_s20  ;;  %18 = sbr.rel (!%p16_p9) target bundleno = 6 (0x6), region = 77 }
  0x7c   :  { %208 = vsyncpa [#allocation3], 1 }
  0x7d   :  { %210 = vsyncpa [#allocation3 + $0x1], 1 }
  0x7e   :  { %211 = vsyncpa [#allocation6], 1 }
  0x7f   :  { %212 = vsyncpa [#allocation4], 1 }
  0x80   :  { %214 = vsyncpa [#allocation4 + $0x1], 1 }

// kernel: adapter_block_v6_forward.13
= control target key start
LH: loop header
LB: loop body
LE: loop exit
PB: predicated region body
PF: predicated region fallthrough
CT: control target
= control target key end

     0   :  { %s1877_s0 = inlined_call_operand.hbm [shape: f32[128,32], index: 0, kind: input, shape index: {}]   ;;  %s1878_s1 = inlined_call_operand.hbm [shape: f32[128,32], index: 1, kind: input, shape index: {}]   ;;  %s1879_s2 = inlined_call_operand.hbm [shape: bf16[32,16], index: 2, kind: input, shape index: {}]   ;;  %s1880_s3 = inlined_call_operand.hbm [shape: bf16[32,16], index: 3, kind: input, shape index: {}]   ;;  %s1881_s4 = inlined_call_operand.hbm [shape: f32[1,16], index: 4, kind: input, shape index: {}]   ;;  %s1882_s5 = inlined_call_operand.hbm [shape: bf16[16,32], index: 5, kind: input, shape index: {}]   ;;  %s1883_s6 = inlined_call_operand.hbm [shape: f32[1,32], index: 6, kind: input, shape index: {}]   ;;  %s1884_s7 = inlined_call_operand.hbm [shape: f32[128,32], index: 7, kind: output, shape index: {}]  }
   0x1   :  { %1889 = sst [smem:[#allocation21_spill]] %s1877_s0 }
   0x2   :  { %1890 = sst [smem:[#allocation22_spill]] %s1879_s2 }
   0x3   :  { %1891 = sst [smem:[#allocation23_spill]] %s1880_s3 }
   0x4   :  { %1892 = sst [smem:[#allocation24_spill]] %s1881_s4 }
   0x5   :  { %12 = vsyncpa [#allocation3], 0 }
   0x6   :  { %14 = vsyncpa [#allocation3 + $0x1], 0 }
   0x7   :  { %15 = vsyncpa [#allocation6], 0 }
   0x8   :  { %17 = vsyncpa [#allocation6 + $0x1], 0 }
   0x9   :  { %18 = vsyncpa [#allocation9], 0 }
   0xa   :  { %19 = vsyncpa [#allocation12], 0 }
   0xb   :  { %20 = vsyncpa [#allocation4], 0 }
   0xc   :  { %22 = vsyncpa [#allocation4 + $0x1], 0  ;;  %s1469_s24 = smov 0   ;;  %s1471_s25 = smov 0  }
   0xd   :  { %s1473_s26 = smov 0   ;;  %s1475_s27 = smov 0  }
   0xe LB: > { %s1415_s28 = smov [#allocation7]   ;;  %s1490_s30 = sadd.s32 4294967295, %s1413_s27   ;;  %s1413_s27 = sphi %s1475_s27, %s1919_s27   ;;  %s1409_s26 = sphi %s1473_s26, %s1918_s26   ;;  %s1405_s25 = sphi %s1471_s25, %s1917_s25   ;;  %s1401_s24 = sphi %s1469_s24, %s1916_s24  }
   0xf   : > { %s228_s29 = sshll.u32 %s1415_s28, 4  ;;  %p906_p0 = scmp.ge.s32.totalorder %s1413_s27, 1  ;;  %s1495_s29 = int_to_ptr.vmem [resolvable:$true] %s228_s29 }
  0x10   : > { %p1885_p1 = scmp.eq.s32.totalorder %s1490_s30, 0  ;;  %p216_p2 = scmp.lt.s32.totalorder %s1413_s27, 3 }
  0x11   : > { %s1416_s9 = smov [#allocation8]   ;;  %s1417_s12 = smov [#allocation11]  }
  0x12   : > { %p1497_p3 = pnand %p906_p0, %p216_p2  ;;  %s241_s10 = sshll.u32 %s1416_s9, 4  ;;  %s1510_s10 = int_to_ptr.vmem [resolvable:$true] %s241_s10 }
  0x13   : > { %s265_s13 = sshll.u32 %s1417_s12, 4  ;;  %s1895_s2 = sld [smem:[#allocation22_spill]]  ;;  %s1512_s13 = int_to_ptr.vmem [resolvable:$true] %s265_s13 }
  0x14   : > { %s1893_s8 = scalar_select %p1497_p3, 1, 0 }
  0x15   : > { %p1044_p5 = pneg %p1497_p3 }
  0x17   : > { %p1506_p6 = pnand %p1044_p5, %p1885_p1 }
  0x19   : > { %s1131_s16 = scalar_lea.hbm %s1895_s2, 256  ;;  %p1522_p8 = pneg %p1506_p6 }
  0x1a   : > { %p1132_p7 = scmp.ne.s32.totalorder %s1895_s2, %s1131_s16  ;;  %p1138_p11 = scmp.lt.u32.totalorder %s1131_s16, %s1895_s2 }
  0x1c   : > { %p1134_p9 = pnand %p1522_p8, %p1132_p7 }
  0x1e   : > { %p1135_p10 = pneg %p1134_p9 }
  0x20   : > { %p1140_p12 = pnand %p1138_p11, %p1135_p10 }
  0x22   : > { %1143 = shalt.err (!%p1140_p12)
}
  0x23   : > { %s1144_s22 = scalar_lea.vmem %s1495_s29, 256  ;;  %p1152_p5 = scmp.lt.s32.totalorder %s1495_s29, %s1495_s29 }
  0x24   : > { %p1145_p13 = scmp.ne.s32.totalorder %s1495_s29, %s1144_s22  ;;  %p1153_p4 = scmp.lt.s32.totalorder %s1144_s22, %s1144_s22 }
  0x26   : > { %p1147_p0 = pnand %p1145_p13, %p1522_p8  ;;  %p1154_p7 = por %p1153_p4, %p1152_p5 }
  0x28   : > { %p1148_p2 = pneg %p1147_p0 }
  0x2a   : > { %p1155_p9 = pnand %p1154_p7, %p1148_p2 }
  0x2c   : > { %1158 = shalt.err (!%p1155_p9)
}
  0x2d   : > { %s1418_s23 = smov 64   ;;  %s1419_s28 = smov 4  }
  0x2e   : > { %1047 = dma.hbm_to_vmem [thread:$0]  (!%p1506_p6), %s1895_s2, 256, %s1495_s29, [#allocation6], %s1418_s23, %s1418_s23, %s1419_s28  }
  0x2f   : > { %s1897_s3 = sld [smem:[#allocation23_spill]] }
  0x35   : > { %s1159_s16 = scalar_lea.hbm %s1897_s3, 256 }
  0x36   : > { %p1160_p4 = scmp.ne.s32.totalorder %s1897_s3, %s1159_s16  ;;  %p1166_p12 = scmp.lt.u32.totalorder %s1159_s16, %s1897_s3 }
  0x38   : > { %p1162_p10 = pnand %p1160_p4, %p1522_p8 }
  0x3a   : > { %p1163_p11 = pneg %p1162_p10 }
  0x3c   : > { %p1168_p13 = pnand %p1166_p12, %p1163_p11 }
  0x3e   : > { %1171 = shalt.err (!%p1168_p13)
}
  0x3f   : > { %s1172_s29 = scalar_lea.vmem %s1510_s10, 256  ;;  %p1180_p7 = scmp.lt.s32.totalorder %s1510_s10, %s1510_s10 }
  0x40   : > { %p1173_p0 = scmp.ne.s32.totalorder %s1510_s10, %s1172_s29  ;;  %p1181_p9 = scmp.lt.s32.totalorder %s1172_s29, %s1172_s29 }
  0x42   : > { %p1175_p2 = pnand %p1173_p0, %p1522_p8  ;;  %p1182_p4 = por %p1181_p9, %p1180_p7 }
  0x44   : > { %p1176_p5 = pneg %p1175_p2 }
  0x46   : > { %p1183_p10 = pnand %p1182_p4, %p1176_p5 }
  0x48   : > { %1186 = shalt.err (!%p1183_p10)
}
  0x49   : > { %1050 = dma.hbm_to_vmem [thread:$0]  (!%p1506_p6), %s1897_s3, 256, %s1510_s10, [#allocation9], %s1418_s23, %s1418_s23, %s1419_s28  }
  0x4a   : > { %s1187_s15 = scalar_lea.hbm %s1882_s5, 128 }
  0x4b   : > { %p1188_p11 = scmp.ne.s32.totalorder %s1882_s5, %s1187_s15  ;;  %p1194_p0 = scmp.lt.u32.totalorder %s1187_s15, %s1882_s5 }
  0x4d   : > { %p1190_p12 = pnand %p1188_p11, %p1522_p8 }
  0x4f   : > { %p1191_p13 = pneg %p1190_p12 }
  0x51   : > { %p1196_p2 = pnand %p1194_p0, %p1191_p13 }
  0x53   : > { %1199 = shalt.err (!%p1196_p2)
}
  0x54   : > { %s1200_s10 = scalar_lea.vmem %s1512_s13, 128  ;;  %p1208_p4 = scmp.lt.s32.totalorder %s1512_s13, %s1512_s13 }
  0x55   : > { %p1201_p5 = scmp.ne.s32.totalorder %s1512_s13, %s1200_s10  ;;  %p1209_p10 = scmp.lt.s32.totalorder %s1200_s10, %s1200_s10 }
  0x57   : > { %p1203_p7 = pnand %p1201_p5, %p1522_p8  ;;  %p1210_p11 = por %p1209_p10, %p1208_p4 }
  0x59   : > { %p1204_p9 = pneg %p1203_p7 }
  0x5b   : > { %p1211_p12 = pnand %p1210_p11, %p1204_p9 }
  0x5d   : > { %1214 = shalt.err (!%p1211_p12)
}
  0x5e   : > { %1056 = dma.hbm_to_vmem [thread:$0]  (!%p1506_p6), %s1882_s5, 128, %s1512_s13, [#allocation12], %s1418_s23, %s1418_s23, %s1419_s28  }
  0x5f   : > { %s1420_s22 = smov [#allocation10]   ;;  %s1421_s12 = smov [#allocation13]  }
  0x60   : > { %s255_s9 = sshll.u32 %s1420_s22, 4  ;;  %s279_s14 = sshll.u32 %s1421_s12, 4  ;;  %s256_s9 = int_to_ptr.vmem [resolvable:$true] %s255_s9  ;;  %s280_s14 = int_to_ptr.vmem [resolvable:$true] %s279_s14 }
  0x61   : > { %s1898_s4 = sld [smem:[#allocation24_spill]] }
  0x67   : > { %s1215_s17 = scalar_lea.hbm %s1898_s4, 16 }
  0x68   : > { %p1216_p13 = scmp.ne.s32.totalorder %s1898_s4, %s1215_s17  ;;  %p1222_p5 = scmp.lt.u32.totalorder %s1215_s17, %s1898_s4 }
  0x6a   : > { %p1218_p0 = pnand %p1216_p13, %p1522_p8 }
  0x6c   : > { %p1219_p2 = pneg %p1218_p0 }
  0x6e   : > { %p1224_p7 = pnand %p1222_p5, %p1219_p2 }
  0x70   : > { %1227 = shalt.err (!%p1224_p7)
}
  0x71   : > { %s1228_s13 = scalar_lea.vmem %s256_s9, 16  ;;  %s1235_s23 = scalar_lea.vmem %s256_s9, 32 }
  0x72   : > { %p1229_p9 = scmp.ne.s32.totalorder %s256_s9, %s1228_s13  ;;  %p1236_p11 = scmp.lt.s32.totalorder %s256_s9, %s256_s9 }
  0x73   : > { %p1237_p12 = scmp.lt.s32.totalorder %s1235_s23, %s1228_s13 }
  0x74   : > { %p1231_p4 = pnand %p1229_p9, %p1522_p8 }
  0x75   : > { %p1238_p1 = por %p1237_p12, %p1236_p11 }
  0x76   : > { %p1232_p10 = pneg %p1231_p4 }
  0x78   : > { %p1239_p3 = pnand %p1238_p1, %p1232_p10 }
  0x7a   : > { %1242 = shalt.err (!%p1239_p3)
}
  0x7b   : > { %1053 = dma.hbm_to_vmem [thread:$0]  (!%p1506_p6), %s1898_s4, 16, %s256_s9, [#allocation9]  }
  0x7c   : > { %s1243_s15 = scalar_lea.hbm %s1883_s6, 16 }
  0x7d   : > { %p1244_p13 = scmp.ne.s32.totalorder %s1883_s6, %s1243_s15  ;;  %p1250_p3 = scmp.lt.u32.totalorder %s1243_s15, %s1883_s6 }
  0x7f   : > { %p1246_p0 = pnand %p1244_p13, %p1522_p8 }
  0x81   : > { %p1247_p1 = pneg %p1246_p0 }
  0x83   : > { %p1252_p2 = pnand %p1250_p3, %p1247_p1 }
  0x85   : > { %1255 = shalt.err (!%p1252_p2)
}
  0x86   : > { %s1256_s10 = scalar_lea.vmem %s280_s14, 16  ;;  %s1263_s9 = scalar_lea.vmem %s280_s14, 32 }
  0x87   : > { %p1257_p5 = scmp.ne.s32.totalorder %s280_s14, %s1256_s10  ;;  %p1264_p4 = scmp.lt.s32.totalorder %s280_s14, %s280_s14 }
  0x88   : > { %p1265_p10 = scmp.lt.s32.totalorder %s1263_s9, %s1256_s10 }
  0x89   : > { %p1259_p7 = pnand %p1257_p5, %p1522_p8 }
  0x8a   : > { %p1266_p11 = por %p1265_p10, %p1264_p4 }
  0x8b   : > { %p1260_p9 = pneg %p1259_p7 }
  0x8d   : > { %p1267_p12 = pnand %p1266_p11, %p1260_p9 }
  0x8f   : > { %1270 = shalt.err (!%p1267_p12)
}
  0x90   : > { %1059 = dma.hbm_to_vmem [thread:$0]  (!%p1506_p6), %s1883_s6, 16, %s280_s14, [#allocation12]  }
  0x91   : > { %s905_s19 = sadd.s32 4294967294, %s1413_s27   ;;  %s1636_s11 = sadd.s32 1, %s1413_s27  }
  0x92   : > { %s35_s23 = sadd.s32 1, %s1409_s26  ;;  %s32_s28 = ssub.s32 %s1413_s27, %s1636_s11 }
  0x93   : > { %p42_p8 = scmp.ne.s32.totalorder %s1409_s26, %s1405_s25  ;;  %p33_p13 = scmp.eq.s32.totalorder %s32_s28, 0 }
  0x94   : > { %p43_p0 = scmp.eq.s32.totalorder %s1413_s27, 0  ;;  %p48_p1 = scmp.ne.s32.totalorder %s1405_s25, %s1401_s24 }
  0x95   : > { %p203_p3 = scmp.eq.s32.totalorder %s1490_s30, 1  ;;  %p1899_p5 = scmp.eq.s32.totalorder %s1490_s30, 0 }
  0x96   : > { %s1648_s29 = scalar_select %p33_p13, %s1409_s26, %s35_s23  }
  0x97   : > { %p44_p2 = por %p43_p0, %p42_p8  ;;  %p1652_p7 = por %p1899_p5, %p48_p1 }
  0x98   : > { %p1656_p6 = por %p203_p3, %p42_p8  ;;  %p209_p9 = scmp.eq.s32.totalorder %s905_s19, 1 }
  0x99   : > { %p1076_p4 = scmp.lt.s32.totalorder %s1413_s27, 2  ;;  %s290_s12 = sand.u32 1, %s1409_s26  }
  0x9a   : > { %s1901_s22 = scalar_select %p1656_p6, 1, 0 }
  0x9b   : > { %p1662_p10 = por %p209_p9, %p48_p1  ;;  %s1666_s16 = sshll.u32 %s290_s12, 6 }
  0x9c   : > { %s1887_s17 = sshll.u32 %s1413_s27, 10  ;;  %s1903_s0 = sld [smem:[#allocation21_spill]] }
  0x9d   : > { %s1902_s15 = scalar_select %p1662_p10, 1, 0 }
  0x9e   : > { %s294_s9 = scalar_lea.vmem [#allocation2], %s1666_s16  ;;  %p1677_p11 = pnand %p1076_p4, %p44_p2 }
  0x9f   : > { %s301_s21 = sshll.u32 %s294_s9, 4  ;;  %s1683_s19 = scalar_lea.sflag [#allocation3], %s290_s12  ;;  %s1681_s21 = int_to_ptr.vmem [resolvable:$true] %s301_s21 }
  0xa0   : > { %p1273_p8 = pneg %p1677_p11 }
  0xa2   : > { %s1674_s10 = scalar_lea.hbm %s1903_s0, %s1887_s17  ;;  %s1276_s20 = scalar_lea.hbm %s1903_s0, 2048 }
  0xa3   : > { %s1271_s23 = scalar_lea.hbm %s1674_s10, 1024  ;;  %p1277_p1 = scmp.lt.u32.totalorder %s1674_s10, %s1903_s0 }
  0xa4   : > { %p1272_p12 = scmp.ne.s32.totalorder %s1674_s10, %s1271_s23  ;;  %p1278_p3 = scmp.lt.u32.totalorder %s1276_s20, %s1271_s23 }
  0xa5   : > { %p1280_p5 = scmp.lt.u32.totalorder %s1271_s23, %s1674_s10 }
  0xa6   : > { %p1274_p13 = pnand %p1273_p8, %p1272_p12  ;;  %p1279_p2 = por %p1278_p3, %p1277_p1 }
  0xa8   : > { %p1275_p0 = pneg %p1274_p13  ;;  %p1281_p9 = por %p1280_p5, %p1279_p2 }
  0xaa   : > { %p1282_p4 = pnand %p1281_p9, %p1275_p0 }
  0xac   : > { %1285 = shalt.err (!%p1282_p4)
}
  0xad   : > { %s1286_s12 = scalar_lea.vmem %s1681_s21, 1024  ;;  %s1422_s28 = smov [#allocation2]  }
  0xae   : > { %p1287_p12 = scmp.ne.s32.totalorder %s1681_s21, %s1286_s12  ;;  %s1291_s18 = sshll.u32 %s1422_s28, 4  ;;  %s1292_s18 = int_to_ptr.vmem [resolvable:$false] %s1291_s18 }
  0xaf   : > { %s1293_s17 = scalar_lea.vmem %s1292_s18, 2048  ;;  %p1294_p6 = scmp.lt.s32.totalorder %s1681_s21, %s1292_s18 }
  0xb0   : > { %p1289_p13 = pnand %p1287_p12, %p1273_p8  ;;  %p1295_p1 = scmp.lt.s32.totalorder %s1293_s17, %s1286_s12 }
  0xb2   : > { %p1290_p10 = pneg %p1289_p13  ;;  %p1296_p3 = por %p1295_p1, %p1294_p6 }
  0xb4   : > { %p1297_p2 = pnand %p1296_p3, %p1290_p10 }
  0xb6   : > { %1300 = shalt.err (!%p1297_p2)
}
  0xb7   : > { %s1423_s23 = smov 128   ;;  %s1424_s20 = smov 8  }
  0xb8   : > { %1063 = dma.hbm_to_vmem [thread:$0]  (!%p1677_p11), %s1674_s10, 1024, %s1681_s21, %s1683_s19, %s1423_s23, %s1423_s23, %s1424_s20  }
  0xb9   : > { %s1905_s9 = sshll.u32 %s1413_s27, 10  ;;  %s315_s17 = scalar_lea.vmem [#allocation5], %s1666_s16 }
  0xba   : > { %s1719_s18 = scalar_lea.hbm %s1878_s1, %s1905_s9  ;;  %s322_s0 = sshll.u32 %s315_s17, 4  ;;  %s1723_s0 = int_to_ptr.vmem [resolvable:$true] %s322_s0 }
  0xbb   : > { %s311_s2 = sand.u32 1, %s1413_s27   ;;  %s1301_s4 = scalar_lea.hbm %s1719_s18, 1024 }
  0xbc   : > { %s1725_s3 = scalar_lea.sflag [#allocation6], %s311_s2  ;;  %p1302_p6 = scmp.ne.s32.totalorder %s1719_s18, %s1301_s4 }
  0xbd   : > { %s1306_s19 = scalar_lea.hbm %s1878_s1, 2048  ;;  %p1307_p5 = scmp.lt.u32.totalorder %s1719_s18, %s1878_s1 }
  0xbe   : > { %p1304_p10 = pnand %p1302_p6, %p1273_p8  ;;  %p1308_p9 = scmp.lt.u32.totalorder %s1306_s19, %s1301_s4 }
  0xbf   : > { %p1310_p12 = scmp.lt.u32.totalorder %s1301_s4, %s1719_s18 }
  0xc0   : > { %p1305_p0 = pneg %p1304_p10  ;;  %p1309_p4 = por %p1308_p9, %p1307_p5 }
  0xc2   : > { %p1311_p13 = por %p1310_p12, %p1309_p4 }
  0xc4   : > { %p1312_p1 = pnand %p1311_p13, %p1305_p0 }
  0xc6   : > { %1315 = shalt.err (!%p1312_p1)
}
  0xc7   : > { %s1316_s2 = scalar_lea.vmem %s1723_s0, 1024  ;;  %s1425_s16 = smov [#allocation5]  }
  0xc8   : > { %p1317_p3 = scmp.ne.s32.totalorder %s1723_s0, %s1316_s2  ;;  %s1321_s28 = sshll.u32 %s1425_s16, 4  ;;  %s1322_s28 = int_to_ptr.vmem [resolvable:$false] %s1321_s28 }
  0xc9   : > { %s1323_s17 = scalar_lea.vmem %s1322_s28, 2048  ;;  %p1324_p10 = scmp.lt.s32.totalorder %s1723_s0, %s1322_s28 }
  0xca   : > { %p1319_p2 = pnand %p1317_p3, %p1273_p8  ;;  %p1325_p5 = scmp.lt.s32.totalorder %s1323_s17, %s1316_s2 }
  0xcc   : > { %p1320_p6 = pneg %p1319_p2  ;;  %p1326_p9 = por %p1325_p5, %p1324_p10 }
  0xce   : > { %p1327_p4 = pnand %p1326_p9, %p1320_p6 }
  0xd0   : > { %1330 = shalt.err (!%p1327_p4)
}
  0xd1   : > { %1066 = dma.hbm_to_vmem [thread:$0]  (!%p1677_p11), %s1719_s18, 1024, %s1723_s0, %s1725_s3, %s1423_s23, %s1423_s23, %s1424_s20  }
  0xd2   : > { %p1906_p8 = scmp.ne.s32.totalorder %s1893_s8, 0 }
  0xd3   : > { %s1757_s4 = sand.u32 (!%p1906_p8), 1, %s1405_s25  }
  0xd4   : > { %334 = sbr.rel (%p1906_p8) target bundleno = 718 (0x2ce), region = 48  ;;  %s1760_s10 = sshll.u32 (!%p1906_p8), %s1757_s4, 6 }
  0xd5   : > { %s337_s13 = scalar_lea.sflag (!%p1906_p8), [#allocation3], %s1757_s4  ;;  %s1764_s21 = scalar_lea.vmem (!%p1906_p8), [#allocation2], %s1760_s10 }
  0xdb   : > { %1376 = dma.done.wait (%p1652_p7), %s337_s13, 1024  }
  0xdc   : > { %1378 = vsyncadd (%p1652_p7), %s337_s13, 4294966272  ;;  %s345_s0 = sand.u32 1, %s1490_s30   ;;  %s1772_s8 = scalar_lea.vmem [#allocation5], %s1760_s10 }
  0xdd   : > { %s346_s3 = scalar_lea.sflag [#allocation6], %s345_s0 }
  0xde   : > { %1380 = dma.done.wait (%p1652_p7), %s346_s3, 1024  }
  0xdf   : > { %1382 = vsyncadd (%p1652_p7), %s346_s3, 4294966272  ;;  %p1907_p11 = scmp.eq.s32.totalorder %s1490_s30, 0 }
  0xe1   : > { %1384 = dma.done.wait (%p1907_p11), [#allocation6], 256   ;;  %p1908_p0 = pmov %p1907_p11 }
  0xe3   : > { %1386 = vsyncadd (%p1908_p0), [#allocation6], 4294967040  ;;  %p1909_p12 = pmov %p1908_p0 }
  0xe4   : > { %p1910_p13 = pmov %p1908_p0 }
  0xe5   : > { %1388 = dma.done.wait (%p1909_p12), [#allocation9], 272  }
  0xe6   : > { %1390 = vsyncadd (%p1910_p13), [#allocation9], 4294967024  ;;  %p1911_p1 = pmov %p1908_p0 }
  0xe7   : > { %p1912_p3 = pmov %p1908_p0 }
  0xe8   : > { %1392 = dma.done.wait (%p1911_p1), [#allocation12], 144  }
  0xe9   : > { %1394 = vsyncadd (%p1912_p3), [#allocation12], 4294967152  ;;  %v1126_v0 = vld [vmem:[#allocation8] sm:$0xff]   ;;  %v1127_v1 = vld [vmem:[#allocation8 + $0x8] sm:$0xff]   ;;  %vm453_vm0 = vcmask 261120   ;;  %vm662_vm1 = vcmask 130048  }
  0xea   : > { %972 = vmatprep.subr.bf16.mxu0 %v1126_v0  ;;  %v421_v2 = vld [vmem:[%s1772_s8] sm:$0xff]  ;;  %v422_v3 = vld [vmem:[%s1772_s8 + $0x8] sm:$0xff]  ;;  %v423_v4 = vld [vmem:[%s1772_s8 + $0x10] sm:$0xff]  ;;  %1006 = vmatprep.subr.bf16.mxu1 %v1126_v0  ;;  %s404_s14 = scalar_lea.vmem [#allocation14], %s1760_s10  ;;  %s954_s23 = sshll.u32 %s1490_s30, 10 }
  0xeb   : > { %973 = vmatpush3.bf16.msra.mxu0 %v1126_v0  ;;  %v429_v5 = vpack.c.bf16 %v422_v3, %v421_v2  ;;  %v424_v6 = vld [vmem:[%s1772_s8 + $0x18] sm:$0xff]  ;;  %1008 = vmatpush3.bf16.msra.mxu1 %v1126_v0  ;;  %v1128_v7 = vld [vmem:[#allocation7] sm:$0xff]   ;;  %v410_v9 = vld [vmem:[%s1764_s21 + $0x8] sm:$0xff]  ;;  %s762_s20 = sshll.u32 %s404_s14, 4  ;;  %s1828_s9 = scalar_lea.hbm %s1884_s7, %s954_s23  ;;  %s1830_s20 = int_to_ptr.vmem [resolvable:$true] %s762_s20 }
  0xec   : > { %974 = vmatprep.subr.bf16.mxu0 %v1127_v1  ;;  %1007 = vmatprep.subr.bf16.mxu1 %v1127_v1  ;;  %v409_v8 = vld [vmem:[%s1764_s21] sm:$0xff]  ;;  %v430_v10 = vpack.c.bf16 %v424_v6, %v423_v4  ;;  %v426_v13 = vld [vmem:[%s1772_s8 + $0x28] sm:$0xff]  ;;  %v427_v14 = vld [vmem:[%s1772_s8 + $0x30] sm:$0xff]  ;;  %s749_s30 = scalar_lea.sflag [#allocation4], %s1757_s4  ;;  %s1331_s12 = scalar_lea.vmem %s1830_s20, 1024 }
  0xed   : > { %976 = vmatprep.mubr.msk.bf16.mxu0 %vm453_vm0, %v429_v5  ;;  %v425_v11 = vld [vmem:[%s1772_s8 + $0x20] sm:$0xff]  ;;  %v417_v12 = vpack.c.bf16 %v410_v9, %v409_v8  ;;  %v428_v15 = vld [vmem:[%s1772_s8 + $0x38] sm:$0xff]  ;;  %v1129_v16 = vld [vmem:[#allocation7 + $0x8] sm:$0xff]   ;;  %p1332_p7 = scmp.ne.s32.totalorder %s1830_s20, %s1331_s12  ;;  %p1913_p2 = scmp.ne.s32.totalorder %s1901_s22, 0 }
  0xee   : > { %v431_v17 = vpack.c.bf16 %v426_v13, %v425_v11  ;;  %v432_v18 = vpack.c.bf16 %v428_v15, %v427_v14  ;;  %v411_v19 = vld [vmem:[%s1764_s21 + $0x10] sm:$0xff]  ;;  %v412_v20 = vld [vmem:[%s1764_s21 + $0x18] sm:$0xff]  ;;  %v413_v21 = vld [vmem:[%s1764_s21 + $0x20] sm:$0xff]  ;;  %s1426_s2 = smov [#allocation14]  }
  0xef   : > { %975 = vmatpush3.bf16.msra.mxu0 %v1127_v1  ;;  %1009 = vmatpush3.bf16.msra.mxu1 %v1127_v1  ;;  %v414_v22 = vld [vmem:[%s1764_s21 + $0x28] sm:$0xff]  ;;  %v418_v23 = vpack.c.bf16 %v412_v20, %v411_v19  ;;  %v415_v25 = vld [vmem:[%s1764_s21 + $0x30] sm:$0xff]  ;;  %v416_v26 = vld [vmem:[%s1764_s21 + $0x38] sm:$0xff]  ;;  %p1333_p6 = pnand %p1332_p7, %p1913_p2  ;;  %s1335_s16 = sshll.u32 %s1426_s2, 4  ;;  %s1336_s16 = int_to_ptr.vmem [resolvable:$false] %s1335_s16 }
  0xf0   : > { %984 = vmatprep.subr.bf16.mxu0 %v1128_v7  ;;  %980 = vmatprep.mubr.msk.bf16.mxu1 %vm453_vm0, %v431_v17  ;;  %v419_v24 = vpack.c.bf16 %v414_v22, %v413_v21  ;;  %v420_v27 = vpack.c.bf16 %v416_v26, %v415_v25  ;;  %v1130_v28 = vld [vmem:[#allocation11] sm:$0xff]   ;;  %v940_v33 = vld [vmem:[#allocation10] ss:$0 sm:$0xff]  ;;  %v941_v2 = vld [vmem:[#allocation13] ss:$0 sm:$0xff]  ;;  %s1337_s28 = scalar_lea.vmem %s1336_s16, 2048  ;;  %p1338_p5 = scmp.lt.s32.totalorder %s1830_s20, %s1336_s16 }
  0xf1   : > { %996 = vmatprep.subr.bf16.mxu1 %v1130_v28  ;;  %p1334_p10 = pneg %p1333_p6  ;;  %p1339_p9 = scmp.lt.s32.totalorder %s1337_s28, %s1331_s12 }
  0xf2   : > { %977 = vmatmul.mubr.msk.bf16.vlgmr.msra.gmra.mrb[0].mxu0 %vm453_vm0, %v430_v10  ;;  %981 = vmatmul.mubr.msk.bf16.vlgmr.msra.gmra.mrb[0].mxu1 %vm453_vm0, %v432_v18 }
  0xf3   : > { %985 = vmatpush3.bf16.msra.mxu0 %v1128_v7  ;;  %988 = vmatprep.mubr.msk.bf16.mxu0 %vm453_vm0, %v417_v12  ;;  %p1340_p4 = por %p1339_p9, %p1338_p5 }
  0xf4   : > { %986 = vmatprep.subr.bf16.mxu0 %v1129_v16  ;;  %997 = vmatpush3.bf16.msra.mxu1 %v1130_v28 }
  0xf5   : > { %p1341_p8 = pnand %p1340_p4, %p1334_p10 }
  0xf7   : > { %987 = vmatpush3.bf16.msra.mxu0 %v1129_v16 }
  0xfe   : > { %989 = vmatmul.mubr.msk.bf16.vlgmr.msra.gmra.mrb[0].mxu0 %vm453_vm0, %v418_v23 }
  0xff   : > { %992 = vmatprep.mubr.msk.bf16.mxu0 %vm453_vm0, %v419_v24 }
 0x106   : > { %993 = vmatmul.mubr.msk.bf16.gmra.mrb[4].mxu0 %vm453_vm0, %v420_v27 }
 0x1c5   : > { %v982_v29 = vpop.f32.mrb[0].mxu1 }
 0x1c6   : > { %v516_v30 = vpop.f32.mrb[1].mxu1 }
 0x1c7   : > { %v983_v31 = vpop.f32.mrb[2].mxu1 }
 0x1c8   : > { %v519_v32 = vpop.f32.mrb[3].mxu1 }
 0x1d1   : > { %v990_v34 = vpop.f32.mrb[0].mxu0 }
 0x1d2   : > { %v629_v35 = vadd.f32 %v990_v34, %v940_v33  ;;  %v589_v36 = vpop.f32.mrb[1].mxu0 }
 0x1d3   : > { %v627_v37 = vadd.f32 %v940_v33, %v589_v36  ;;  %v991_v38 = vpop.f32.mrb[2].mxu0 }
 0x1d4   : > { %v630_v39 = vadd.f32 %v991_v38, %v940_v33  ;;  %v592_v40 = vpop.f32.mrb[3].mxu0  ;;  %v637_v42 = vmax.f32 %v629_v35, 0.0 }
 0x1d5   : > { %v628_v41 = vadd.f32 %v940_v33, %v592_v40  ;;  %v635_v44 = vmax.f32 %v627_v37, 0.0 }
 0x1d6   : > { %v638_v43 = vmax.f32 %v630_v39, 0.0 }
 0x1d7   : > { %v636_v45 = vmax.f32 %v628_v41, 0.0 }
 0x1d8   : > { %v644_v46 = vpack.c.bf16 %v638_v43, %v637_v42 }
 0x1d9   : > { %v643_v47 = vpack.c.bf16 %v636_v45, %v635_v44  ;;  %v994_v48 = vpop.f32.mrb[4].mxu0 }
 0x1da   : > { %v614_v49 = vadd.f32 %v994_v48, %v982_v29  ;;  %v605_v50 = vpop.f32.mrb[5].mxu0 }
 0x1db   : > { %v606_v51 = vadd.f32 %v605_v50, %v516_v30  ;;  %v995_v52 = vpop.f32.mrb[6].mxu0  ;;  %998 = vmatprep.mubr.msk.bf16.mxu1 %vm662_vm1, %v643_v47 }
 0x1dc   : > { %v633_v53 = vadd.f32 %v940_v33, %v614_v49  ;;  %v617_v54 = vadd.f32 %v995_v52, %v983_v31  ;;  %v608_v55 = vpop.f32.mrb[7].mxu0  ;;  %999 = vmatmul.mubr.msk.bf16.vlgmr.msra.gmra.mrb[4].mxu1 %vm662_vm1, %v644_v46 }
 0x1dd   : > { %v631_v56 = vadd.f32 %v940_v33, %v606_v51  ;;  %v609_v57 = vadd.f32 %v608_v55, %v519_v32 }
 0x1de   : > { %v634_v58 = vadd.f32 %v940_v33, %v617_v54  ;;  %v641_v60 = vmax.f32 %v633_v53, 0.0 }
 0x1df   : > { %v632_v59 = vadd.f32 %v940_v33, %v609_v57  ;;  %v639_v62 = vmax.f32 %v631_v56, 0.0 }
 0x1e0   : > { %v642_v61 = vmax.f32 %v634_v58, 0.0 }
 0x1e1   : > { %v640_v63 = vmax.f32 %v632_v59, 0.0 }
 0x1e2   : > { %v646_v0 = vpack.c.bf16 %v642_v61, %v641_v60 }
 0x1e3   : > { %v645_v1 = vpack.c.bf16 %v640_v63, %v639_v62 }
 0x1e5   : > { %1002 = vmatprep.mubr.msk.bf16.mxu1 %vm662_vm1, %v645_v1 }
 0x1e6   : > { %1003 = vmatmul.mubr.msk.bf16.gmra.mrb[8].mxu1 %vm662_vm1, %v646_v0 }
 0x2af   : > { %v1000_v3 = vpop.f32.mrb[4].mxu1 }
 0x2b0   : > { %v718_v4 = vadd.f32 %v1000_v3, %v941_v2  ;;  %v709_v5 = vpop.f32.mrb[5].mxu1 }
 0x2b1   : > { %v710_v6 = vadd.f32 %v941_v2, %v709_v5  ;;  %v1001_v7 = vpop.f32.mrb[6].mxu1 }
 0x2b2   : > { %742 = vst.msk [vmem:[%s404_s14 + $0x10] sm:$0xff] %vm453_vm0, %v718_v4  ;;  %v721_v8 = vadd.f32 %v1001_v7, %v941_v2  ;;  %v712_v9 = vpop.f32.mrb[7].mxu1 }
 0x2b3   : > { %740 = vst.msk [vmem:[%s404_s14] sm:$0xff] %vm453_vm0, %v710_v6  ;;  %v713_v10 = vadd.f32 %v941_v2, %v712_v9 }
 0x2b4   : > { %743 = vst.msk [vmem:[%s404_s14 + $0x18] sm:$0xff] %vm453_vm0, %v721_v8 }
 0x2b5   : > { %741 = vst.msk [vmem:[%s404_s14 + $0x8] sm:$0xff] %vm453_vm0, %v713_v10 }
 0x2b9   : > { %v1004_v11 = vpop.f32.mrb[8].mxu1 }
 0x2ba   : > { %v734_v12 = vadd.f32 %v1004_v11, %v941_v2  ;;  %v725_v13 = vpop.f32.mrb[9].mxu1 }
 0x2bb   : > { %v726_v14 = vadd.f32 %v941_v2, %v725_v13  ;;  %v1005_v15 = vpop.f32.mrb[10].mxu1 }
 0x2bc   : > { %746 = vst.msk [vmem:[%s404_s14 + $0x30] sm:$0xff] %vm453_vm0, %v734_v12  ;;  %v737_v16 = vadd.f32 %v1005_v15, %v941_v2  ;;  %v728_v17 = vpop.f32.mrb[11].mxu1 }
 0x2bd   : > { %744 = vst.msk [vmem:[%s404_s14 + $0x20] sm:$0xff] %vm453_vm0, %v726_v14  ;;  %v729_v18 = vadd.f32 %v941_v2, %v728_v17 }
 0x2be   : > { %747 = vst.msk [vmem:[%s404_s14 + $0x38] sm:$0xff] %vm453_vm0, %v737_v16 }
 0x2bf   : > { %745 = vst.msk [vmem:[%s404_s14 + $0x28] sm:$0xff] %vm453_vm0, %v729_v18 }
 0x2c0   : > { %1344 = shalt.err (!%p1341_p8)
}
 0x2c1   : > { %s1345_s17 = scalar_lea.hbm %s1828_s9, 1024  ;;  %s1349_s21 = scalar_lea.hbm %s1884_s7, 2048 }
 0x2c2   : > { %p1346_p11 = scmp.ne.s32.totalorder %s1828_s9, %s1345_s17  ;;  %p1350_p13 = scmp.lt.u32.totalorder %s1828_s9, %s1884_s7 }
 0x2c3   : > { %p1351_p1 = scmp.lt.u32.totalorder %s1349_s21, %s1345_s17  ;;  %p1353_p7 = scmp.lt.u32.totalorder %s1345_s17, %s1828_s9 }
 0x2c4   : > { %p1347_p0 = pnand %p1346_p11, %p1913_p2 }
 0x2c5   : > { %p1352_p3 = por %p1351_p1, %p1350_p13 }
 0x2c6   : > { %p1348_p12 = pneg %p1347_p0 }
 0x2c7   : > { %p1354_p6 = por %p1353_p7, %p1352_p3 }
 0x2c9   : > { %p1355_p10 = pnand %p1354_p6, %p1348_p12 }
 0x2cb   : > { %1358 = shalt.err (!%p1355_p10)
}
 0x2cc   : > { %s1427_s8 = smov 128   ;;  %s1428_s14 = smov 8  }
 0x2cd   : > { %1042 = dma.vmem_to_hbm [thread:$0]  (%p1913_p2), %s1830_s20, 1024, %s1828_s9, %s749_s30, %s1427_s8, %s1427_s8, %s1428_s14  }
 0x2ce PF: > { %s777_s23 = sand.u32 1, %s1401_s24   ;;  %p1914_p5 = scmp.ne.s32.totalorder %s1902_s15, 0 }
 0x2cf   : > { %p1915_p9 = scmp.ge.s32.totalorder %s1413_s27, 2  ;;  %s778_s18 = scalar_lea.sflag [#allocation4], %s777_s23 }
 0x2d1   : > { %p1068_p4 = pnand %p1915_p9, %p1914_p5 }
 0x2d3   : > { %1396 = dma.done.wait (!%p1068_p4), %s778_s18, 1024  }
 0x2d4   : > { %1398 = vsyncadd (!%p1068_p4), %s778_s18, 4294966272  ;;  %p25_p8 = scmp.ge.s32.totalorder %s1636_s11, 4   ;;  %s1916_s24 = smov %s1405_s25 }
 0x2d5   : > { %s1917_s25 = smov %s1409_s26  ;;  %s1918_s26 = smov %s1648_s29 }
 0x2d6   : > { %s1919_s27 = smov %s1636_s11  ;;  %27 = sbr.rel (!%p25_p8) target bundleno = 14 (0xe), region = 126 }
 0x2dd   :  { %783 = vsyncpa [#allocation3], 1 }
 0x2de   :  { %785 = vsyncpa [#allocation3 + $0x1], 1 }
 0x2df   :  { %786 = vsyncpa [#allocation6], 1 }
 0x2e0   :  { %788 = vsyncpa [#allocation6 + $0x1], 1 }
 0x2e1   :  { %789 = vsyncpa [#allocation9], 1 }
 0x2e2   :  { %790 = vsyncpa [#allocation12], 1 }
 0x2e3   :  { %791 = vsyncpa [#allocation4], 1 }
 0x2e4   :  { %793 = vsyncpa [#allocation4 + $0x1], 1 }

// kernel: adapter_block_v6_forward.7
= control target key start
LH: loop header
LB: loop body
LE: loop exit
PB: predicated region body
PF: predicated region fallthrough
CT: control target
= control target key end

     0   :  { %s2410_s0 = inlined_call_operand.hbm [shape: f32[128,32], index: 0, kind: input, shape index: {}]   ;;  %s2411_s1 = inlined_call_operand.hbm [shape: bf16[32,24], index: 1, kind: input, shape index: {}]   ;;  %s2412_s2 = inlined_call_operand.hbm [shape: f32[1,24], index: 2, kind: input, shape index: {}]   ;;  %s2413_s3 = inlined_call_operand.hbm [shape: bf16[24,32], index: 3, kind: input, shape index: {}]   ;;  %s2414_s4 = inlined_call_operand.hbm [shape: f32[3,32], index: 4, kind: input, shape index: {}]   ;;  %s2415_s5 = inlined_call_operand.hbm [shape: bf16[128,32], index: 5, kind: output, shape index: {0}]   ;;  %s2416_s6 = inlined_call_operand.hbm [shape: bf16[128,32], index: 6, kind: output, shape index: {1}]   ;;  %s2417_s7 = inlined_call_operand.hbm [shape: bf16[128,32], index: 7, kind: output, shape index: {2}]  }
   0x1   :  { %2423 = sst [smem:[#allocation21_spill]] %s2410_s0 }
   0x2   :  { %13 = vsyncpa [#allocation3], 0 }
   0x3   :  { %15 = vsyncpa [#allocation3 + $0x1], 0 }
   0x4   :  { %16 = vsyncpa [#allocation6], 0 }
   0x5   :  { %17 = vsyncpa [#allocation9], 0 }
   0x6   :  { %18 = vsyncpa [#allocation4], 0 }
   0x7   :  { %20 = vsyncpa [#allocation4 + $0x1], 0 }
   0x8   :  { %21 = vsyncpa [#allocation13], 0 }
   0x9   :  { %23 = vsyncpa [#allocation13 + $0x1], 0  ;;  %s1878_s24 = smov 0   ;;  %s1880_s25 = smov 0  }
   0xa   :  { %s1882_s26 = smov 0   ;;  %s1884_s27 = smov 0  }
   0xb LB: > { %s1899_s28 = sadd.s32 4294967295, %s1820_s27   ;;  %s2419_s29 = sadd.s32 4294967294, %s1820_s27   ;;  %s1820_s27 = sphi %s1884_s27, %s2447_s27   ;;  %s1816_s26 = sphi %s1882_s26, %s2446_s26   ;;  %s1812_s25 = sphi %s1880_s25, %s2445_s25   ;;  %s1808_s24 = sphi %s1878_s24, %s2444_s24  }
   0xc   : > { %p49_p0 = scmp.ne.s32.totalorder %s1812_s25, %s1808_s24  ;;  %p2418_p1 = scmp.eq.s32.totalorder %s1899_s28, 0 }
   0xd   : > { %p163_p3 = scmp.eq.s32.totalorder %s2419_s29, 1  ;;  %p1239_p5 = scmp.ge.s32.totalorder %s1820_s27, 1 }
   0xe   : > { %p1910_p4 = por %p2418_p1, %p49_p0  ;;  %p222_p7 = scmp.lt.s32.totalorder %s1820_s27, 3 }
   0xf   : > { %p1915_p6 = por %p163_p3, %p49_p0  ;;  %s1822_s10 = smov [#allocation5]  }
  0x10   : > { %s2424_s30 = scalar_select %p1910_p4, 1, 0 }
  0x11   : > { %s2425_s8 = scalar_select %p1915_p6, 1, 0 }
  0x12   : > { %p1920_p8 = pnand %p1239_p5, %p222_p7  ;;  %s234_s11 = sshll.u32 %s1822_s10, 4  ;;  %s1924_s11 = int_to_ptr.vmem [resolvable:$true] %s234_s11 }
  0x13   : > { %2426 = sst [smem:[#allocation20_spill]] %s2425_s8  ;;  %s1823_s13 = smov [#allocation8]  }
  0x14   : > { %s2427_s9 = scalar_select %p1920_p8, 1, 0 }
  0x15   : > { %p1429_p9 = pneg %p1920_p8  ;;  %s258_s14 = sshll.u32 %s1823_s13, 4  ;;  %s1935_s14 = int_to_ptr.vmem [resolvable:$true] %s258_s14 }
  0x16   : > { %s1824_s15 = smov [#allocation7]   ;;  %s1544_s19 = scalar_lea.hbm %s2411_s1, 256 }
  0x17   : > { %p1931_p11 = pnand %p1429_p9, %p2418_p1  ;;  %s1937_s16 = sshll.u32 %s1824_s15, 4  ;;  %s249_s16 = int_to_ptr.vmem [resolvable:$true] %s1937_s16 }
  0x18   : > { %p1545_p12 = scmp.ne.s32.totalorder %s2411_s1, %s1544_s19  ;;  %p1551_p5 = scmp.lt.u32.totalorder %s1544_s19, %s2411_s1 }
  0x19   : > { %p1947_p13 = pneg %p1931_p11 }
  0x1b   : > { %p1547_p0 = pnand %p1947_p13, %p1545_p12 }
  0x1d   : > { %p1548_p3 = pneg %p1547_p0 }
  0x1f   : > { %p1553_p7 = pnand %p1551_p5, %p1548_p3 }
  0x21   : > { %1556 = shalt.err (!%p1553_p7)
}
  0x22   : > { %s1557_s13 = scalar_lea.vmem %s1924_s11, 256  ;;  %p1565_p2 = scmp.lt.s32.totalorder %s1924_s11, %s1924_s11 }
  0x23   : > { %p1558_p9 = scmp.ne.s32.totalorder %s1924_s11, %s1557_s13  ;;  %p1566_p6 = scmp.lt.s32.totalorder %s1557_s13, %s1557_s13 }
  0x25   : > { %p1560_p10 = pnand %p1558_p9, %p1947_p13  ;;  %p1567_p12 = por %p1566_p6, %p1565_p2 }
  0x27   : > { %p1561_p1 = pneg %p1560_p10 }
  0x29   : > { %p1568_p0 = pnand %p1567_p12, %p1561_p1 }
  0x2b   : > { %1571 = shalt.err (!%p1568_p0)
}
  0x2c   : > { %s1825_s15 = smov 64   ;;  %s1826_s17 = smov 4  }
  0x2d   : > { %1432 = dma.hbm_to_vmem [thread:$0]  (!%p1931_p11), %s2411_s1, 256, %s1924_s11, [#allocation6], %s1825_s15, %s1825_s15, %s1826_s17  }
  0x2e   : > { %s1572_s23 = scalar_lea.hbm %s2413_s3, 192 }
  0x2f   : > { %p1573_p2 = scmp.ne.s32.totalorder %s2413_s3, %s1572_s23  ;;  %p1579_p10 = scmp.lt.u32.totalorder %s1572_s23, %s2413_s3 }
  0x31   : > { %p1575_p1 = pnand %p1573_p2, %p1947_p13 }
  0x33   : > { %p1576_p6 = pneg %p1575_p1 }
  0x35   : > { %p1581_p3 = pnand %p1579_p10, %p1576_p6 }
  0x37   : > { %1584 = shalt.err (!%p1581_p3)
}
  0x38   : > { %s1585_s11 = scalar_lea.vmem %s1935_s14, 192  ;;  %p1593_p12 = scmp.lt.s32.totalorder %s1935_s14, %s1935_s14 }
  0x39   : > { %p1586_p5 = scmp.ne.s32.totalorder %s1935_s14, %s1585_s11  ;;  %p1594_p0 = scmp.lt.s32.totalorder %s1585_s11, %s1585_s11 }
  0x3b   : > { %p1588_p7 = pnand %p1586_p5, %p1947_p13  ;;  %p1595_p2 = por %p1594_p0, %p1593_p12 }
  0x3d   : > { %p1589_p9 = pneg %p1588_p7 }
  0x3f   : > { %p1596_p1 = pnand %p1595_p2, %p1589_p9 }
  0x41   : > { %1599 = shalt.err (!%p1596_p1)
}
  0x42   : > { %1438 = dma.hbm_to_vmem [thread:$0]  (!%p1931_p11), %s2413_s3, 192, %s1935_s14, [#allocation9], %s1825_s15, %s1825_s15, %s1826_s17  }
  0x43   : > { %s1600_s20 = scalar_lea.hbm %s2412_s2, 16 }
  0x44   : > { %p1601_p6 = scmp.ne.s32.totalorder %s2412_s2, %s1600_s20  ;;  %p1607_p5 = scmp.lt.u32.totalorder %s1600_s20, %s2412_s2 }
  0x46   : > { %p1603_p10 = pnand %p1601_p6, %p1947_p13 }
  0x48   : > { %p1604_p3 = pneg %p1603_p10 }
  0x4a   : > { %p1609_p7 = pnand %p1607_p5, %p1604_p3 }
  0x4c   : > { %1612 = shalt.err (!%p1609_p7)
}
  0x4d   : > { %s1613_s11 = scalar_lea.vmem %s249_s16, 16  ;;  %s1620_s14 = scalar_lea.vmem %s249_s16, 32 }
  0x4e   : > { %p1614_p9 = scmp.ne.s32.totalorder %s249_s16, %s1613_s11  ;;  %p1621_p2 = scmp.lt.s32.totalorder %s249_s16, %s249_s16 }
  0x4f   : > { %p1622_p1 = scmp.lt.s32.totalorder %s1620_s14, %s1613_s11 }
  0x50   : > { %p1616_p12 = pnand %p1614_p9, %p1947_p13 }
  0x51   : > { %p1623_p4 = por %p1622_p1, %p1621_p2 }
  0x52   : > { %p1617_p0 = pneg %p1616_p12 }
  0x54   : > { %p1624_p8 = pnand %p1623_p4, %p1617_p0 }
  0x56   : > { %1627 = shalt.err (!%p1624_p8)
}
  0x57   : > { %1435 = dma.hbm_to_vmem [thread:$0]  (!%p1931_p11), %s2412_s2, 16, %s249_s16, [#allocation6]  }
  0x58   : > { %s1827_s29 = smov [#allocation10]   ;;  %s1628_s20 = scalar_lea.hbm %s2414_s4, 64 }
  0x59   : > { %s272_s8 = sshll.u32 %s1827_s29, 4  ;;  %p1629_p6 = scmp.ne.s32.totalorder %s2414_s4, %s1628_s20  ;;  %s273_s8 = int_to_ptr.vmem [resolvable:$true] %s272_s8 }
  0x5a   : > { %p1635_p10 = scmp.lt.u32.totalorder %s1628_s20, %s2414_s4 }
  0x5b   : > { %p1631_p4 = pnand %p1629_p6, %p1947_p13 }
  0x5d   : > { %p1632_p8 = pneg %p1631_p4 }
  0x5f   : > { %p1637_p3 = pnand %p1635_p10, %p1632_p8 }
  0x61   : > { %1640 = shalt.err (!%p1637_p3)
}
  0x62   : > { %s1641_s16 = scalar_lea.vmem %s273_s8, 64  ;;  %p1649_p12 = scmp.lt.s32.totalorder %s273_s8, %s273_s8 }
  0x63   : > { %p1642_p5 = scmp.ne.s32.totalorder %s273_s8, %s1641_s16  ;;  %p1650_p0 = scmp.lt.s32.totalorder %s1641_s16, %s1641_s16 }
  0x65   : > { %p1644_p7 = pnand %p1642_p5, %p1947_p13  ;;  %p1651_p2 = por %p1650_p0, %p1649_p12 }
  0x67   : > { %p1645_p9 = pneg %p1644_p7 }
  0x69   : > { %p1652_p1 = pnand %p1651_p2, %p1645_p9 }
  0x6b   : > { %1655 = shalt.err (!%p1652_p1)
}
  0x6c   : > { %1441 = dma.hbm_to_vmem [thread:$0]  (!%p1931_p11), %s2414_s4, 64, %s273_s8, [#allocation9]  }
  0x6d   : > { %s2029_s22 = sadd.s32 1, %s1820_s27   ;;  %s36_s15 = sadd.s32 1, %s1816_s26 }
  0x6e   : > { %s33_s12 = ssub.s32 %s1820_s27, %s2029_s22  ;;  %p43_p13 = scmp.ne.s32.totalorder %s1816_s26, %s1812_s25 }
  0x6f   : > { %p34_p6 = scmp.eq.s32.totalorder %s33_s12, 0  ;;  %p44_p4 = scmp.eq.s32.totalorder %s1820_s27, 0 }
  0x70   : > { %p2430_p8 = scmp.eq.s32.totalorder %s1899_s28, 1  ;;  %p1460_p3 = scmp.lt.s32.totalorder %s1820_s27, 2 }
  0x71   : > { %s2045_s29 = scalar_select %p34_p6, %s1816_s26, %s36_s15  }
  0x72   : > { %p2039_p10 = por %p2430_p8, %p43_p13  ;;  %p45_p5 = por %p44_p4, %p43_p13 }
  0x73   : > { %s283_s18 = sand.u32 1, %s1816_s26   ;;  %s1311_s8 = sshll.u32 %s1820_s27, 10 }
  0x74   : > { %s1245_s19 = sshll.u32 %s283_s18, 6  ;;  %s2432_s0 = sld [smem:[#allocation21_spill]] }
  0x75   : > { %s287_s10 = scalar_lea.vmem [#allocation2], %s1245_s19  ;;  %p2056_p11 = pnand %p1460_p3, %p45_p5 }
  0x76   : > { %s294_s13 = sshll.u32 %s287_s10, 4  ;;  %s2060_s11 = scalar_lea.sflag [#allocation3], %s283_s18  ;;  %s2054_s13 = int_to_ptr.vmem [resolvable:$true] %s294_s13 }
  0x77   : > { %p1658_p9 = pneg %p2056_p11 }
  0x7a   : > { %s2052_s23 = scalar_lea.hbm %s2432_s0, %s1311_s8  ;;  %s1661_s19 = scalar_lea.hbm %s2432_s0, 2048 }
  0x7b   : > { %s1656_s14 = scalar_lea.hbm %s2052_s23, 1024  ;;  %p1662_p2 = scmp.lt.u32.totalorder %s2052_s23, %s2432_s0 }
  0x7c   : > { %p1657_p7 = scmp.ne.s32.totalorder %s2052_s23, %s1656_s14  ;;  %p1663_p1 = scmp.lt.u32.totalorder %s1661_s19, %s1656_s14 }
  0x7d   : > { %p1665_p6 = scmp.lt.u32.totalorder %s1656_s14, %s2052_s23 }
  0x7e   : > { %p1659_p12 = pnand %p1658_p9, %p1657_p7  ;;  %p1664_p13 = por %p1663_p1, %p1662_p2 }
  0x80   : > { %p1660_p0 = pneg %p1659_p12  ;;  %p1666_p4 = por %p1665_p6, %p1664_p13 }
  0x82   : > { %p1667_p8 = pnand %p1666_p4, %p1660_p0 }
  0x84   : > { %1670 = shalt.err (!%p1667_p8)
}
  0x85   : > { %s1671_s18 = scalar_lea.vmem %s2054_s13, 1024  ;;  %s1828_s21 = smov [#allocation2]  }
  0x86   : > { %p1672_p3 = scmp.ne.s32.totalorder %s2054_s13, %s1671_s18  ;;  %s1676_s10 = sshll.u32 %s1828_s21, 4  ;;  %s1677_s10 = int_to_ptr.vmem [resolvable:$false] %s1676_s10 }
  0x87   : > { %s1678_s15 = scalar_lea.vmem %s1677_s10, 2048  ;;  %p1679_p12 = scmp.lt.s32.totalorder %s2054_s13, %s1677_s10 }
  0x88   : > { %p1674_p5 = pnand %p1672_p3, %p1658_p9  ;;  %p1680_p2 = scmp.lt.s32.totalorder %s1678_s15, %s1671_s18 }
  0x8a   : > { %p1675_p7 = pneg %p1674_p5  ;;  %p1681_p1 = por %p1680_p2, %p1679_p12 }
  0x8c   : > { %p1682_p13 = pnand %p1681_p1, %p1675_p7 }
  0x8e   : > { %1685 = shalt.err (!%p1682_p13)
}
  0x8f   : > { %s1829_s14 = smov 128   ;;  %s1830_s12 = smov 8  }
  0x90   : > { %1445 = dma.hbm_to_vmem [thread:$0]  (!%p2056_p11), %s2052_s23, 1024, %s2054_s13, %s2060_s11, %s1829_s14, %s1829_s14, %s1830_s12  }
  0x91   : > { %p2434_p9 = scmp.ne.s32.totalorder %s2427_s9, 0 }
  0x92   : > { %s2091_s19 = sand.u32 (!%p2434_p9), 1, %s1812_s25   ;;  %p2435_p0 = scmp.ne.s32.totalorder (!%p2434_p9), %s2424_s30, 0 }
  0x93   : > { %306 = sbr.rel (%p2434_p9) target bundleno = 969 (0x3c9), region = 40  ;;  %s1249_s8 = sshll.u32 (!%p2434_p9), %s2091_s19, 6 }
  0x94   : > { %s309_s20 = scalar_lea.sflag (!%p2434_p9), [#allocation3], %s2091_s19  ;;  %s312_s18 = scalar_lea.vmem (!%p2434_p9), [#allocation2], %s1249_s8 }
  0x9a   : > { %1787 = dma.done.wait (%p2435_p0), %s309_s20, 1024  }
  0x9b   : > { %1789 = vsyncadd (%p2435_p0), %s309_s20, 4294966272  ;;  %p2436_p6 = scmp.eq.s32.totalorder %s1899_s28, 0 }
  0x9d   : > { %1791 = dma.done.wait (%p2436_p6), [#allocation6], 272   ;;  %p2437_p11 = pmov %p2436_p6 }
  0x9e   : > { %p2438_p4 = pmov %p2436_p6 }
  0x9f   : > { %1793 = vsyncadd (%p2437_p11), [#allocation6], 4294967024 }
  0xa0   : > { %1795 = dma.done.wait (%p2438_p4), [#allocation9], 256   ;;  %p2439_p8 = pmov %p2438_p4 }
  0xa1   : > { %v1510_v0 = vld [vmem:[#allocation5] sm:$0xff]   ;;  %v1511_v1 = vld [vmem:[#allocation5 + $0x8] sm:$0xff]   ;;  %vm409_vm0 = vcmask 261120   ;;  %v376_v5 = vld [vmem:[%s312_s18 + $0x10] sm:$0xff]  ;;  %vm520_vm1 = vcmask 1043456   ;;  %vm507_vm2 = vcmask 64512   ;;  %v503_v57 = vlaneseq }
  0xa2   : > { %1797 = vsyncadd (%p2439_p8), [#allocation9], 4294967040  ;;  %1360 = vmatprep.subr.bf16.mxu0 %v1510_v0  ;;  %v374_v2 = vld [vmem:[%s312_s18] sm:$0xff]  ;;  %v375_v3 = vld [vmem:[%s312_s18 + $0x8] sm:$0xff]  ;;  %s1831_s30 = smov 120   ;;  %s1832_s9 = smov 112  }
  0xa3   : > { %1361 = vmatpush3.bf16.msra.mxu0 %v1510_v0  ;;  %v382_v4 = vpack.c.bf16 %v375_v3, %v374_v2  ;;  %v377_v6 = vld [vmem:[%s312_s18 + $0x18] sm:$0xff]  ;;  %v378_v7 = vld [vmem:[%s312_s18 + $0x20] sm:$0xff]  ;;  %v379_v8 = vld [vmem:[%s312_s18 + $0x28] sm:$0xff]  ;;  %v504_v58 = vshrl.u32 %v503_v57, 7  ;;  %s2189_s23 = sshll.u32 %s2091_s19, 5  ;;  %vm677_vm3 = vcmask 257024  }
  0xa4   : > { %1362 = vmatprep.subr.bf16.mxu0 %v1511_v1  ;;  %v383_v9 = vpack.c.bf16 %v377_v6, %v376_v5  ;;  %v384_v10 = vpack.c.bf16 %v379_v8, %v378_v7  ;;  %v380_v11 = vld [vmem:[%s312_s18 + $0x30] sm:$0xff]  ;;  %v381_v12 = vld [vmem:[%s312_s18 + $0x38] sm:$0xff]  ;;  %s2204_s13 = scalar_lea.vmem [#allocation14], %s2189_s23  ;;  %s2234_s16 = scalar_lea.vmem [#allocation11], %s2189_s23 }
  0xa5   : > { %1364 = vmatprep.mubr.msk.bf16.mxu0 %vm409_vm0, %v382_v4  ;;  %v385_v13 = vpack.c.bf16 %v381_v12, %v380_v11  ;;  %v499_v14 = vld [vmem:[#allocation8] sm:$0xf]  ;;  %v500_v16 = vld [vmem:[#allocation8 + $0x4] sm:$0xf]  ;;  %v1257_v17 = vld [vmem:[#allocation7] ss:$0 sm:$0xff] }
  0xa6   : > { %1402 = vmatprep.subr.msk.bf16.mxu1 %vm520_vm1, %v499_v14  ;;  %v522_v15 = vsel %vm520_vm1, %v499_v14, 0  ;;  %v715_v35 = vsel %vm520_vm1, %v500_v16, 0  ;;  %v501_v36 = vld [vmem:[#allocation8 + $0x8] sm:$0xf]  ;;  %v505_v59 = vsub.s32 0, %v504_v58  ;;  %s2255_s11 = scalar_lea.vmem [#allocation12], %s2189_s23 }
  0xa7   : > { %1363 = vmatpush3.bf16.msra.mxu0 %v1511_v1  ;;  %1373 = vmatpush3.bf16.msra.mxu1 %v522_v15  ;;  %v903_v39 = vsel %vm520_vm1, %v501_v36, 0  ;;  %v502_v60 = vld [vmem:[#allocation10] sm:$0x7]  ;;  %s1066_s21 = sshll.u32 %s2204_s13, 4  ;;  %s1015_s10 = sand.u32 1, %s1899_s28   ;;  %s2274_s21 = int_to_ptr.vmem [resolvable:$true] %s1066_s21 }
  0xa8   : > { %1403 = vmatprep.subr.msk.bf16.mxu1 %vm520_vm1, %v500_v16  ;;  %1404 = vmatprep.subr.msk.bf16.mxu0 %vm520_vm1, %v501_v36  ;;  %v506_v61 = vrot.slane %v502_v60, %v505_v59  ;;  %s1336_s15 = sshll.u32 %s1899_s28, 9  ;;  %s1050_s14 = sshll.u32 %s2255_s11, 4  ;;  %s2290_s14 = int_to_ptr.vmem [resolvable:$true] %s1050_s14 }
  0xa9   : > { %s1034_s12 = sshll.u32 %s2234_s16, 4  ;;  %s2288_s18 = scalar_lea.hbm %s2416_s6, %s1336_s15  ;;  %s2305_s12 = int_to_ptr.vmem [resolvable:$true] %s1034_s12 }
  0xaa   : > { %1365 = vmatmul.mubr.msk.bf16.vlgmr.msra.gmra.mrb[0].mxu0 %vm409_vm0, %v383_v9  ;;  %s2303_s8 = scalar_lea.hbm %s2415_s5, %s1336_s15  ;;  %s2309_s20 = scalar_lea.sflag [#allocation13], %s1015_s10 }
  0xab   : > { %1368 = vmatprep.mubr.msk.bf16.mxu0 %vm409_vm0, %v384_v10  ;;  %1393 = vmatpush3.bf16.msra.mxu0 %v903_v39  ;;  %v880_v39 = vsub.s32 2, %v504_v58  ;;  %s1686_s0 = scalar_lea.vmem %s2290_s14, 512  ;;  %s1833_s28 = smov [#allocation12]  }
  0xac   : > { %p1687_p3 = scmp.ne.s32.totalorder %s2290_s14, %s1686_s0 }
  0xae   : > { %p1688_p5 = pnand %p1687_p3, %p2039_p10 }
  0xb0   : > { %p1689_p7 = pneg %p1688_p5 }
  0xb2   : > { %1369 = vmatmul.mubr.msk.bf16.gmra.mrb[4].mxu0 %vm409_vm0, %v385_v13 }
 0x17d   : > { %v1366_v18 = vpop.f32.mrb[0].mxu0 }
 0x17e   : > { %v465_v19 = vadd.f32 %v1366_v18, %v1257_v17  ;;  %v456_v20 = vpop.f32.mrb[1].mxu0 }
 0x17f   : > { %v457_v21 = vadd.f32 %v1257_v17, %v456_v20  ;;  %v1367_v22 = vpop.f32.mrb[2].mxu0 }
 0x180   : > { %v468_v23 = vadd.f32 %v1367_v22, %v1257_v17  ;;  %v459_v24 = vpop.f32.mrb[3].mxu0  ;;  %v489_v26 = vmax.f32 %v465_v19, 0.0 }
 0x181   : > { %v460_v25 = vadd.f32 %v1257_v17, %v459_v24  ;;  %v487_v28 = vmax.f32 %v457_v21, 0.0 }
 0x182   : > { %v490_v27 = vmax.f32 %v468_v23, 0.0 }
 0x183   : > { %v488_v29 = vmax.f32 %v460_v25, 0.0 }
 0x184   : > { %v496_v30 = vpack.c.bf16 %v490_v27, %v489_v26  ;;  %v688_v26 = vsub.s32 1, %v504_v58 }
 0x185   : > { %v495_v31 = vpack.c.bf16 %v488_v29, %v487_v28  ;;  %v1370_v32 = vpop.f32.mrb[4].mxu0 }
 0x186   : > { %v481_v33 = vadd.f32 %v1370_v32, %v1257_v17  ;;  %v472_v34 = vpop.f32.mrb[5].mxu0  ;;  %v689_v27 = vrot.slane %v502_v60, %v688_v26 }
 0x187   : > { %v473_v37 = vadd.f32 %v1257_v17, %v472_v34  ;;  %v1371_v38 = vpop.f32.mrb[6].mxu0  ;;  %694 = vrot.lane.b32.xlu0 %v495_v31, %s1831_s30  ;;  %1374 = vmatprep.mubr.msk.bf16.mxu1 %vm507_vm2, %v495_v31 }
 0x188   : > { %v493_v40 = vmax.f32 %v481_v33, 0.0  ;;  %v484_v41 = vadd.f32 %v1371_v38, %v1257_v17  ;;  %v475_v42 = vpop.f32.mrb[7].mxu0  ;;  %1375 = vmatmul.mubr.msk.bf16.vlgmr.msra.gmra.mrb[0].mxu1 %vm507_vm2, %v496_v30 }
 0x189   : > { %v491_v43 = vmax.f32 %v473_v37, 0.0  ;;  %v476_v44 = vadd.f32 %v1257_v17, %v475_v42  ;;  %1383 = vmatpush3.bf16.msra.mxu1 %v715_v35 }
 0x18a   : > { %v494_v45 = vmax.f32 %v484_v41, 0.0 }
 0x18b   : > { %v492_v46 = vmax.f32 %v476_v44, 0.0  ;;  %696 = vrot.lane.b32.xlu0 %v496_v30, %s1831_s30 }
 0x18c   : > { %v498_v47 = vpack.c.bf16 %v494_v45, %v493_v40 }
 0x18d   : > { %v497_v48 = vpack.c.bf16 %v492_v46, %v491_v43 }
 0x18f   : > { %698 = vrot.lane.b32.xlu1 %v497_v48, %s1831_s30  ;;  %882 = vrot.lane.b32.xlu0 %v495_v31, %s1832_s9 }
 0x190   : > { %1378 = vmatprep.mubr.msk.bf16.mxu1 %vm507_vm2, %v497_v48 }
 0x191   : > { %1379 = vmatmul.mubr.msk.bf16.gmra.mrb[4].mxu1 %vm507_vm2, %v498_v47 }
 0x193   : > { %700 = vrot.lane.b32.xlu1 %v498_v47, %s1831_s30  ;;  %886 = vrot.lane.b32.xlu0 %v497_v48, %s1832_s9 }
 0x197   : > { %884 = vrot.lane.b32.xlu1 %v496_v30, %s1832_s9 }
 0x19b   : > { %888 = vrot.lane.b32.xlu1 %v498_v47, %s1832_s9  ;;  %v881_v47 = vrot.slane %v502_v60, %v880_v39  ;;  %s2295_s9 = scalar_lea.hbm %s2417_s7, %s1336_s15 }
 0x1f9   : > { %v695_v49 = vpop.permute.xlu0 %694 }
 0x1fa   : > { %1384 = vmatprep.mubr.msk.bf16.mxu1 %vm507_vm2, %v695_v49 }
 0x1fd   : > { %v697_v50 = vpop.permute.xlu0 %696 }
 0x1fe   : > { %1385 = vmatmul.mubr.msk.bf16.vlgmr.msra.gmra.mrb[8].mxu1 %vm507_vm2, %v697_v50 }
 0x201   : > { %v699_v51 = vpop.permute.xlu1 %698  ;;  %v883_v52 = vpop.permute.xlu0 %882 }
 0x202   : > { %1388 = vmatprep.mubr.msk.bf16.mxu1 %vm507_vm2, %v699_v51  ;;  %1394 = vmatprep.mubr.msk.bf16.mxu0 %vm507_vm2, %v883_v52 }
 0x205   : > { %v701_v53 = vpop.permute.xlu1 %700  ;;  %v887_v55 = vpop.permute.xlu0 %886 }
 0x206   : > { %1389 = vmatmul.mubr.msk.bf16.gmra.mrb[12].mxu1 %vm507_vm2, %v701_v53 }
 0x209   : > { %v885_v54 = vpop.permute.xlu1 %884 }
 0x20a   : > { %1395 = vmatmul.mubr.msk.bf16.vlgmr.msra.gmra.mrb[8].mxu0 %vm507_vm2, %v885_v54 }
 0x20b   : > { %1398 = vmatprep.mubr.msk.bf16.mxu0 %vm507_vm2, %v887_v55 }
 0x20d   : > { %v889_v56 = vpop.permute.xlu1 %888 }
 0x212   : > { %1399 = vmatmul.mubr.msk.bf16.gmra.mrb[12].mxu0 %vm507_vm2, %v889_v56 }
 0x25b   : > { %v1376_v62 = vpop.f32.mrb[0].mxu1 }
 0x25c   : > { %v2129_v63 = vadd.f32 %v1376_v62, %v506_v61  ;;  %v558_v0 = vpop.f32.mrb[1].mxu1 }
 0x25d   : > { %v2131_v1 = vadd.f32 %v558_v0, %v506_v61  ;;  %v1377_v2 = vpop.f32.mrb[2].mxu1 }
 0x25e   : > { %v2133_v3 = vadd.f32 %v1377_v2, %v506_v61  ;;  %v561_v4 = vpop.f32.mrb[3].mxu1  ;;  %v591_v5 = vmul.f32 %v2129_v63, %v2129_v63 }
 0x25f   : > { %v2137_v6 = vadd.f32 %v561_v4, %v506_v61  ;;  %v589_v9 = vmul.f32 %v2131_v1, %v2131_v1 }
 0x260   : > { %v603_v7 = vsel %vm409_vm0, %v591_v5, 0.0  ;;  %v592_v8 = vmul.f32 %v2133_v3, %v2133_v3 }
 0x261   : > { %604 = vadd.xlane.f32.xlu1 %v603_v7  ;;  %v590_v11 = vmul.f32 %v2137_v6, %v2137_v6  ;;  %v597_v13 = vsel %vm409_vm0, %v589_v9, 0.0 }
 0x262   : > { %v606_v10 = vsel %vm409_vm0, %v592_v8, 0.0 }
 0x263   : > { %607 = vadd.xlane.f32.xlu0 %v606_v10  ;;  %v600_v18 = vsel %vm409_vm0, %v590_v11, 0.0 }
 0x264   : > { %v1380_v12 = vpop.f32.mrb[4].mxu1 }
 0x265   : > { %v2148_v14 = vadd.f32 %v1380_v12, %v506_v61  ;;  %v574_v15 = vpop.f32.mrb[5].mxu1  ;;  %598 = vadd.xlane.f32.xlu1 %v597_v13 }
 0x266   : > { %v2150_v16 = vadd.f32 %v574_v15, %v506_v61  ;;  %v1381_v17 = vpop.f32.mrb[6].mxu1 }
 0x267   : > { %v2153_v19 = vadd.f32 %v1381_v17, %v506_v61  ;;  %v577_v20 = vpop.f32.mrb[7].mxu1  ;;  %601 = vadd.xlane.f32.xlu0 %v600_v18  ;;  %v595_v8 = vmul.f32 %v2148_v14, %v2148_v14 }
 0x268   : > { %v2155_v21 = vadd.f32 %v577_v20, %v506_v61  ;;  %v593_v22 = vmul.f32 %v2150_v16, %v2150_v16 }
 0x26a   : > { %v609_v23 = vsel %vm409_vm0, %v593_v22, 0.0  ;;  %v594_v24 = vmul.f32 %v2155_v21, %v2155_v21  ;;  %v615_v22 = vsel %vm409_vm0, %v595_v8, 0.0 }
 0x26b   : > { %610 = vadd.xlane.f32.xlu1 %v609_v23  ;;  %v596_v23 = vmul.f32 %v2153_v19, %v2153_v19 }
 0x26c   : > { %v612_v25 = vsel %vm409_vm0, %v594_v24, 0.0 }
 0x26d   : > { %613 = vadd.xlane.f32.xlu0 %v612_v25 }
 0x2d1   : > { %v1386_v28 = vpop.f32.mrb[8].mxu1 }
 0x2d2   : > { %v2163_v29 = vadd.f32 %v1386_v28, %v689_v27  ;;  %v751_v30 = vpop.f32.mrb[9].mxu1 }
 0x2d3   : > { %v2165_v31 = vadd.f32 %v751_v30, %v689_v27  ;;  %v1387_v32 = vpop.f32.mrb[10].mxu1 }
 0x2d4   : > { %v754_v33 = vpop.f32.mrb[11].mxu1  ;;  %v784_v34 = vmul.f32 %v2163_v29, %v2163_v29  ;;  %v2169_v35 = vadd.f32 %v1387_v32, %v689_v27 }
 0x2d5   : > { %v2171_v36 = vadd.f32 %v754_v33, %v689_v27  ;;  %v782_v38 = vmul.f32 %v2165_v31, %v2165_v31 }
 0x2d6   : > { %v796_v37 = vsel %vm409_vm0, %v784_v34, 0.0  ;;  %v785_v43 = vmul.f32 %v2169_v35, %v2169_v35  ;;  %v618_v34 = vsel %vm409_vm0, %v596_v23, 0.0 }
 0x2d7   : > { %797 = vadd.xlane.f32.xlu0 %v796_v37  ;;  %v783_v40 = vmul.f32 %v2171_v36, %v2171_v36  ;;  %v790_v46 = vsel %vm409_vm0, %v782_v38, 0.0 }
 0x2d8   : > { %v799_v55 = vsel %vm409_vm0, %v785_v43, 0.0 }
 0x2d9   : > { %v1390_v41 = vpop.f32.mrb[12].mxu1  ;;  %v793_v42 = vsel %vm409_vm0, %v783_v40, 0.0 }
 0x2da   : > { %v2181_v44 = vadd.f32 %v1390_v41, %v689_v27  ;;  %v767_v45 = vpop.f32.mrb[13].mxu1  ;;  %794 = vadd.xlane.f32.xlu1 %v793_v42 }
 0x2db   : > { %v2184_v48 = vadd.f32 %v767_v45, %v689_v27  ;;  %v1391_v49 = vpop.f32.mrb[14].mxu1  ;;  %791 = vadd.xlane.f32.xlu0 %v790_v46 }
 0x2dc   : > { %v2186_v50 = vadd.f32 %v1391_v49, %v689_v27  ;;  %v770_v51 = vpop.f32.mrb[15].mxu1  ;;  %v788_v52 = vmul.f32 %v2181_v44, %v2181_v44 }
 0x2dd   : > { %v2193_v53 = vadd.f32 %v770_v51, %v689_v27  ;;  %v1396_v54 = vpop.f32.mrb[8].mxu0  ;;  %v786_v60 = vmul.f32 %v2184_v48, %v2184_v48 }
 0x2de   : > { %v948_v56 = vadd.f32 %v1396_v54, %v881_v47  ;;  %v939_v57 = vpop.f32.mrb[9].mxu0  ;;  %v808_v58 = vsel %vm409_vm0, %v788_v52, 0.0  ;;  %v789_v59 = vmul.f32 %v2186_v50, %v2186_v50 }
 0x2df   : > { %v940_v61 = vadd.f32 %v939_v57, %v881_v47  ;;  %v1397_v62 = vpop.f32.mrb[10].mxu0  ;;  %800 = vadd.xlane.f32.xlu0 %v799_v55  ;;  %809 = vadd.xlane.f32.xlu1 %v808_v58  ;;  %v802_v11 = vsel %vm409_vm0, %v786_v60, 0.0  ;;  %v787_v12 = vmul.f32 %v2193_v53, %v2193_v53 }
 0x2e0   : > { %v1330_v0 = vpack.c.bf16 %v948_v56, %v948_v56  ;;  %v951_v2 = vadd.f32 %v1397_v62, %v881_v47  ;;  %v942_v4 = vpop.f32.mrb[11].mxu0  ;;  %v811_v10 = vsel %vm409_vm0, %v789_v59, 0.0 }
 0x2e1   : > { %v1328_v5 = vpack.c.bf16 %v940_v61, %v940_v61  ;;  %v943_v7 = vadd.f32 %v942_v4, %v881_v47  ;;  %v805_v20 = vsel %vm409_vm0, %v787_v12, 0.0 }
 0x2e2   : > { %1004 = vst.msk [vmem:[%s2204_s13 + $0x8] sm:$0xf] %vm677_vm3, %v1330_v0  ;;  %v1331_v9 = vpack.c.bf16 %v951_v2, %v951_v2 }
 0x2e3   : > { %1002 = vst.msk [vmem:[%s2204_s13] sm:$0xf] %vm677_vm3, %v1328_v5  ;;  %v1329_v13 = vpack.c.bf16 %v943_v7, %v943_v7  ;;  %812 = vadd.xlane.f32.xlu0 %v811_v10  ;;  %803 = vadd.xlane.f32.xlu1 %v802_v11 }
 0x2e4   : > { %1005 = vst.msk [vmem:[%s2204_s13 + $0xc] sm:$0xf] %vm677_vm3, %v1331_v9 }
 0x2e5   : > { %1003 = vst.msk [vmem:[%s2204_s13 + $0x4] sm:$0xf] %vm677_vm3, %v1329_v13  ;;  %v1400_v15 = vpop.f32.mrb[12].mxu0 }
 0x2e6   : > { %v964_v17 = vadd.f32 %v1400_v15, %v881_v47  ;;  %v955_v18 = vpop.f32.mrb[13].mxu0 }
 0x2e7   : > { %v956_v24 = vadd.f32 %v955_v18, %v881_v47  ;;  %v1401_v25 = vpop.f32.mrb[14].mxu0  ;;  %806 = vadd.xlane.f32.xlu0 %v805_v20  ;;  %616 = vadd.xlane.f32.xlu1 %v615_v22 }
 0x2e8   : > { %v1334_v26 = vpack.c.bf16 %v964_v17, %v964_v17  ;;  %v967_v27 = vadd.f32 %v1401_v25, %v881_v47  ;;  %v958_v28 = vpop.f32.mrb[15].mxu0 }
 0x2e9   : > { %v1332_v30 = vpack.c.bf16 %v956_v24, %v956_v24  ;;  %v959_v32 = vadd.f32 %v958_v28, %v881_v47 }
 0x2ea   : > { %1008 = vst.msk [vmem:[%s2204_s13 + $0x18] sm:$0xf] %vm677_vm3, %v1334_v26  ;;  %v1335_v33 = vpack.c.bf16 %v967_v27, %v967_v27 }
 0x2eb   : > { %1006 = vst.msk [vmem:[%s2204_s13 + $0x10] sm:$0xf] %vm677_vm3, %v1332_v30  ;;  %v1333_v37 = vpack.c.bf16 %v959_v32, %v959_v32  ;;  %619 = vadd.xlane.f32.xlu0 %v618_v34 }
 0x2ec   : > { %1009 = vst.msk [vmem:[%s2204_s13 + $0x1c] sm:$0xf] %vm677_vm3, %v1335_v33 }
 0x2ed   : > { %1007 = vst.msk [vmem:[%s2204_s13 + $0x14] sm:$0xf] %vm677_vm3, %v1333_v37 }
 0x2ee   : > { %v605_v38 = vpop.xlane.xlu1 %604 }
 0x2ef   : > { %v623_v39 = vmax.f32 %v605_v38, 1e-24 }
 0x2f0   : > { %v608_v40 = vpop.xlane.xlu0 %607 }
 0x2f1   : > { %1512 = vrsqrt.f32 %v623_v39  ;;  %v624_v41 = vmax.f32 %v608_v40, 1e-24 }
 0x2f2   : > { %v599_v42 = vpop.xlane.xlu1 %598 }
 0x2f3   : > { %1514 = vrsqrt.f32 %v624_v41  ;;  %v621_v43 = vmax.f32 %v599_v42, 1e-24 }
 0x2f4   : > { %v602_v45 = vpop.xlane.xlu0 %601 }
 0x2f5   : > { %1516 = vrsqrt.f32 %v621_v43  ;;  %v622_v46 = vmax.f32 %v602_v45, 1e-24 }
 0x2f7   : > { %1518 = vrsqrt.f32 %v622_v46 }
 0x2f8   : > { %v611_v47 = vpop.xlane.xlu1 %610 }
 0x2f9   : > { %v625_v49 = vmax.f32 %v611_v47, 1e-24 }
 0x2fa   : > { %v614_v51 = vpop.xlane.xlu0 %613 }
 0x2fb   : > { %v1513_v52 = vpop.eup %1512  ;;  %1520 = vrsqrt.f32 %v625_v49  ;;  %v626_v54 = vmax.f32 %v614_v51, 1e-24 }
 0x2fc   : > { %v639_v55 = vmul.f32 %v1513_v52, %v2129_v63 }
 0x2fd   : > { %v1515_v56 = vpop.eup %1514  ;;  %1522 = vrsqrt.f32 %v626_v54 }
 0x2fe   : > { %v1314_v57 = vpack.c.bf16 %v639_v55, %v639_v55  ;;  %v640_v58 = vmul.f32 %v1515_v56, %v2133_v3 }
 0x2ff   : > { %v1517_v59 = vpop.eup %1516 }
 0x300   : > { %680 = vst.msk [vmem:[%s2234_s16 + $0x8] sm:$0xf] %vm677_vm3, %v1314_v57  ;;  %v1315_v60 = vpack.c.bf16 %v640_v58, %v640_v58  ;;  %v637_v61 = vmul.f32 %v1517_v59, %v2131_v1 }
 0x301   : > { %v1519_v63 = vpop.eup %1518 }
 0x302   : > { %681 = vst.msk [vmem:[%s2234_s16 + $0xc] sm:$0xf] %vm677_vm3, %v1315_v60  ;;  %v1312_v62 = vpack.c.bf16 %v637_v61, %v637_v61  ;;  %v638_v3 = vmul.f32 %v1519_v63, %v2137_v6 }
 0x304   : > { %678 = vst.msk [vmem:[%s2234_s16] sm:$0xf] %vm677_vm3, %v1312_v62  ;;  %v1313_v0 = vpack.c.bf16 %v638_v3, %v638_v3 }
 0x305   : > { %v1521_v2 = vpop.eup %1520 }
 0x306   : > { %679 = vst.msk [vmem:[%s2234_s16 + $0x4] sm:$0xf] %vm677_vm3, %v1313_v0  ;;  %v641_v4 = vmul.f32 %v1521_v2, %v2150_v16 }
 0x307   : > { %v1523_v5 = vpop.eup %1522 }
 0x308   : > { %v1316_v7 = vpack.c.bf16 %v641_v4, %v641_v4  ;;  %v642_v8 = vmul.f32 %v1523_v5, %v2155_v21 }
 0x30a   : > { %682 = vst.msk [vmem:[%s2234_s16 + $0x10] sm:$0xf] %vm677_vm3, %v1316_v7  ;;  %v1317_v1 = vpack.c.bf16 %v642_v8, %v642_v8 }
 0x30c   : > { %683 = vst.msk [vmem:[%s2234_s16 + $0x14] sm:$0xf] %vm677_vm3, %v1317_v1 }
 0x364   : > { %v798_v9 = vpop.xlane.xlu0 %797 }
 0x365   : > { %v816_v10 = vmax.f32 %v798_v9, 1e-24 }
 0x367   : > { %1524 = vrsqrt.f32 %v816_v10  ;;  %v795_v6 = vpop.xlane.xlu1 %794 }
 0x368   : > { %v815_v11 = vmax.f32 %v795_v6, 1e-24  ;;  %v792_v12 = vpop.xlane.xlu0 %791 }
 0x369   : > { %v814_v13 = vmax.f32 %v792_v12, 1e-24 }
 0x36a   : > { %1526 = vrsqrt.f32 %v815_v11 }
 0x36b   : > { %1528 = vrsqrt.f32 %v814_v13 }
 0x36c   : > { %v801_v15 = vpop.xlane.xlu0 %800  ;;  %v810_v16 = vpop.xlane.xlu1 %809 }
 0x36d   : > { %v817_v17 = vmax.f32 %v801_v15, 1e-24  ;;  %v820_v18 = vmax.f32 %v810_v16, 1e-24 }
 0x36f   : > { %1530 = vrsqrt.f32 %v817_v17 }
 0x370   : > { %1532 = vrsqrt.f32 %v820_v18  ;;  %v813_v21 = vpop.xlane.xlu0 %812  ;;  %v804_v20 = vpop.xlane.xlu1 %803 }
 0x371   : > { %v1525_v22 = vpop.eup %1524  ;;  %v821_v23 = vmax.f32 %v813_v21, 1e-24  ;;  %v818_v24 = vmax.f32 %v804_v20, 1e-24 }
 0x372   : > { %v832_v25 = vmul.f32 %v1525_v22, %v2163_v29 }
 0x373   : > { %1534 = vrsqrt.f32 %v821_v23 }
 0x374   : > { %v1527_v26 = vpop.eup %1526  ;;  %v1322_v27 = vpack.c.bf16 %v832_v25, %v832_v25  ;;  %1536 = vrsqrt.f32 %v818_v24  ;;  %v807_v28 = vpop.xlane.xlu0 %806 }
 0x375   : > { %v617_v30 = vpop.xlane.xlu1 %616  ;;  %v1529_v32 = vpop.eup %1528  ;;  %v831_v33 = vmul.f32 %v1527_v26, %v2171_v36  ;;  %v819_v34 = vmax.f32 %v807_v28, 1e-24 }
 0x376   : > { %v627_v37 = vmax.f32 %v617_v30, 1e-24  ;;  %872 = vst.msk [vmem:[%s2255_s11 + $0x8] sm:$0xf] %vm677_vm3, %v1322_v27  ;;  %v830_v29 = vmul.f32 %v1529_v32, %v2165_v31 }
 0x377   : > { %v1321_v38 = vpack.c.bf16 %v831_v33, %v831_v33  ;;  %1538 = vrsqrt.f32 %v819_v34 }
 0x378   : > { %v1320_v39 = vpack.c.bf16 %v830_v29, %v830_v29  ;;  %1540 = vrsqrt.f32 %v627_v37  ;;  %v620_v40 = vpop.xlane.xlu0 %619 }
 0x379   : > { %v1531_v36 = vpop.eup %1530  ;;  %871 = vst.msk [vmem:[%s2255_s11 + $0x4] sm:$0xf] %vm677_vm3, %v1321_v38  ;;  %v628_v41 = vmax.f32 %v620_v40, 1e-24 }
 0x37a   : > { %v1533_v42 = vpop.eup %1532  ;;  %870 = vst.msk [vmem:[%s2255_s11] sm:$0xf] %vm677_vm3, %v1320_v39  ;;  %v833_v43 = vmul.f32 %v1531_v36, %v2169_v35 }
 0x37b   : > { %v836_v31 = vmul.f32 %v1533_v42, %v2181_v44  ;;  %1542 = vrsqrt.f32 %v628_v41 }
 0x37c   : > { %v1323_v45 = vpack.c.bf16 %v833_v43, %v833_v43 }
 0x37d   : > { %v1535_v46 = vpop.eup %1534  ;;  %v1326_v47 = vpack.c.bf16 %v836_v31, %v836_v31 }
 0x37e   : > { %v1537_v49 = vpop.eup %1536  ;;  %873 = vst.msk [vmem:[%s2255_s11 + $0xc] sm:$0xf] %vm677_vm3, %v1323_v45  ;;  %v837_v51 = vmul.f32 %v1535_v46, %v2186_v50 }
 0x37f   : > { %876 = vst.msk [vmem:[%s2255_s11 + $0x18] sm:$0xf] %vm677_vm3, %v1326_v47  ;;  %v834_v35 = vmul.f32 %v1537_v49, %v2184_v48 }
 0x380   : > { %v1327_v44 = vpack.c.bf16 %v837_v51, %v837_v51 }
 0x381   : > { %v1539_v52 = vpop.eup %1538  ;;  %v1324_v54 = vpack.c.bf16 %v834_v35, %v834_v35 }
 0x382   : > { %v1541_v55 = vpop.eup %1540  ;;  %877 = vst.msk [vmem:[%s2255_s11 + $0x1c] sm:$0xf] %vm677_vm3, %v1327_v44  ;;  %v835_v56 = vmul.f32 %v1539_v52, %v2193_v53 }
 0x383   : > { %874 = vst.msk [vmem:[%s2255_s11 + $0x10] sm:$0xf] %vm677_vm3, %v1324_v54  ;;  %v643_v50 = vmul.f32 %v1541_v55, %v2148_v14 }
 0x384   : > { %v1325_v48 = vpack.c.bf16 %v835_v56, %v835_v56 }
 0x385   : > { %v1543_v57 = vpop.eup %1542  ;;  %v1318_v58 = vpack.c.bf16 %v643_v50, %v643_v50 }
 0x386   : > { %875 = vst.msk [vmem:[%s2255_s11 + $0x14] sm:$0xf] %vm677_vm3, %v1325_v48  ;;  %v644_v14 = vmul.f32 %v1543_v57, %v2153_v19  ;;  %s1690_s11 = sshll.u32 %s1833_s28, 4  ;;  %s1691_s11 = int_to_ptr.vmem [resolvable:$false] %s1690_s11 }
 0x387   : > { %684 = vst.msk [vmem:[%s2234_s16 + $0x18] sm:$0xf] %vm677_vm3, %v1318_v58  ;;  %s1692_s30 = scalar_lea.vmem %s1691_s11, 1024  ;;  %p1693_p12 = scmp.lt.s32.totalorder %s2290_s14, %s1691_s11 }
 0x388   : > { %p1694_p2 = scmp.lt.s32.totalorder %s1692_s30, %s1686_s0 }
 0x38a   : > { %p1695_p1 = por %p1694_p2, %p1693_p12 }
 0x38c   : > { %p1696_p13 = pnand %p1695_p1, %p1689_p7 }
 0x38e   : > { %1699 = shalt.err (!%p1696_p13)
}
 0x38f   : > { %s1700_s10 = scalar_lea.hbm %s2288_s18, 512  ;;  %s1704_s13 = scalar_lea.hbm %s2416_s6, 1024 }
 0x390   : > { %p1701_p9 = scmp.ne.s32.totalorder %s2288_s18, %s1700_s10  ;;  %p1705_p11 = scmp.lt.u32.totalorder %s2288_s18, %s2416_s6 }
 0x391   : > { %p1706_p4 = scmp.lt.u32.totalorder %s1704_s13, %s1700_s10  ;;  %p1708_p3 = scmp.lt.u32.totalorder %s1700_s10, %s2288_s18 }
 0x392   : > { %p1702_p0 = pnand %p1701_p9, %p2039_p10 }
 0x393   : > { %p1707_p8 = por %p1706_p4, %p1705_p11 }
 0x394   : > { %p1703_p6 = pneg %p1702_p0 }
 0x395   : > { %p1709_p5 = por %p1708_p3, %p1707_p8 }
 0x397   : > { %p1710_p7 = pnand %p1709_p5, %p1703_p6 }
 0x399   : > { %1713 = shalt.err (!%p1710_p7)
}
 0x39a   : > { %s1834_s0 = smov 64   ;;  %s1835_s30 = smov 4   ;;  %v1319_v19 = vpack.c.bf16 %v644_v14, %v644_v14 }
 0x39b   : > { %1424 = dma.vmem_to_hbm [thread:$0]  (%p2039_p10), %s2290_s14, 512, %s2288_s18, %s2309_s20, %s1834_s0, %s1834_s0, %s1835_s30  }
 0x39c   : > { %s1714_s10 = scalar_lea.vmem %s2274_s21, 512  ;;  %s1836_s15 = smov [#allocation14]  }
 0x39d   : > { %p1715_p12 = scmp.ne.s32.totalorder %s2274_s21, %s1714_s10  ;;  %s1718_s23 = sshll.u32 %s1836_s15, 4  ;;  %s1719_s23 = int_to_ptr.vmem [resolvable:$false] %s1718_s23 }
 0x39e   : > { %s1720_s13 = scalar_lea.vmem %s1719_s23, 1024  ;;  %p1721_p13 = scmp.lt.s32.totalorder %s2274_s21, %s1719_s23 }
 0x39f   : > { %p1716_p2 = pnand %p1715_p12, %p2039_p10  ;;  %p1722_p9 = scmp.lt.s32.totalorder %s1720_s13, %s1714_s10 }
 0x3a1   : > { %p1717_p1 = pneg %p1716_p2  ;;  %p1723_p0 = por %p1722_p9, %p1721_p13 }
 0x3a3   : > { %p1724_p6 = pnand %p1723_p0, %p1717_p1 }
 0x3a5   : > { %1727 = shalt.err (!%p1724_p6)
}
 0x3a6   : > { %s1728_s14 = scalar_lea.hbm %s2295_s9, 512  ;;  %s1732_s11 = scalar_lea.hbm %s2417_s7, 1024 }
 0x3a7   : > { %p1729_p11 = scmp.ne.s32.totalorder %s2295_s9, %s1728_s14  ;;  %p1733_p3 = scmp.lt.u32.totalorder %s2295_s9, %s2417_s7 }
 0x3a8   : > { %p1734_p5 = scmp.lt.u32.totalorder %s1732_s11, %s1728_s14  ;;  %p1736_p12 = scmp.lt.u32.totalorder %s1728_s14, %s2295_s9 }
 0x3a9   : > { %p1730_p4 = pnand %p1729_p11, %p2039_p10 }
 0x3aa   : > { %p1735_p7 = por %p1734_p5, %p1733_p3 }
 0x3ab   : > { %p1731_p8 = pneg %p1730_p4 }
 0x3ac   : > { %p1737_p2 = por %p1736_p12, %p1735_p7 }
 0x3ae   : > { %p1738_p1 = pnand %p1737_p2, %p1731_p8 }
 0x3b0   : > { %1741 = shalt.err (!%p1738_p1)
}
 0x3b1   : > { %1425 = dma.vmem_to_hbm [thread:$0]  (%p2039_p10), %s2274_s21, 512, %s2295_s9, %s2309_s20, %s1834_s0, %s1834_s0, %s1835_s30  }
 0x3b2   : > { %685 = vst.msk [vmem:[%s2234_s16 + $0x1c] sm:$0xf] %vm677_vm3, %v1319_v19  ;;  %s1011_s10 = scalar_lea.sflag [#allocation4], %s2091_s19  ;;  %s1742_s13 = scalar_lea.vmem %s2305_s12, 512 }
 0x3b3   : > { %p1743_p13 = scmp.ne.s32.totalorder %s2305_s12, %s1742_s13  ;;  %s1837_s14 = smov [#allocation11]  }
 0x3b4   : > { %s1746_s18 = sshll.u32 %s1837_s14, 4  ;;  %s1747_s18 = int_to_ptr.vmem [resolvable:$false] %s1746_s18 }
 0x3b5   : > { %p1744_p9 = pnand %p1743_p13, %p2039_p10  ;;  %s1748_s28 = scalar_lea.vmem %s1747_s18, 1024 }
 0x3b6   : > { %p1749_p6 = scmp.lt.s32.totalorder %s2305_s12, %s1747_s18  ;;  %p1750_p11 = scmp.lt.s32.totalorder %s1748_s28, %s1742_s13 }
 0x3b7   : > { %p1745_p0 = pneg %p1744_p9 }
 0x3b8   : > { %p1751_p4 = por %p1750_p11, %p1749_p6 }
 0x3ba   : > { %p1752_p8 = pnand %p1751_p4, %p1745_p0 }
 0x3bc   : > { %1755 = shalt.err (!%p1752_p8)
}
 0x3bd   : > { %s1756_s16 = scalar_lea.hbm %s2303_s8, 512  ;;  %s1760_s20 = scalar_lea.hbm %s2415_s5, 1024 }
 0x3be   : > { %p1757_p3 = scmp.ne.s32.totalorder %s2303_s8, %s1756_s16  ;;  %p1761_p12 = scmp.lt.u32.totalorder %s2303_s8, %s2415_s5 }
 0x3bf   : > { %p1762_p2 = scmp.lt.u32.totalorder %s1760_s20, %s1756_s16  ;;  %p1764_p13 = scmp.lt.u32.totalorder %s1756_s16, %s2303_s8 }
 0x3c0   : > { %p1758_p5 = pnand %p1757_p3, %p2039_p10 }
 0x3c1   : > { %p1763_p1 = por %p1762_p2, %p1761_p12 }
 0x3c2   : > { %p1759_p7 = pneg %p1758_p5 }
 0x3c3   : > { %p1765_p9 = por %p1764_p13, %p1763_p1 }
 0x3c5   : > { %p1766_p0 = pnand %p1765_p9, %p1759_p7 }
 0x3c7   : > { %1769 = shalt.err (!%p1766_p0)
}
 0x3c8   : > { %1423 = dma.vmem_to_hbm [thread:$0]  (%p2039_p10), %s2305_s12, 512, %s2303_s8, %s1011_s10, %s1834_s0, %s1834_s0, %s1835_s30  }
 0x3c9 PF: > { %s2440_s23 = sld [smem:[#allocation20_spill]]  ;;  %s1081_s13 = sand.u32 1, %s1808_s24  }
 0x3ca   : > { %p2442_p11 = scmp.ge.s32.totalorder %s1820_s27, 2  ;;  %s1082_s14 = scalar_lea.sflag [#allocation4], %s1081_s13 }
 0x3cf   : > { %p2441_p6 = scmp.ne.s32.totalorder %s2440_s23, 0 }
 0x3d1   : > { %p1447_p4 = pnand %p2442_p11, %p2441_p6 }
 0x3d3   : > { %1799 = dma.done.wait (!%p1447_p4), %s1082_s14, 512  }
 0x3d4   : > { %1801 = vsyncadd (!%p1447_p4), %s1082_s14, 4294966784  ;;  %s2443_s17 = sadd.s32 4294967294, %s1820_s27  }
 0x3d5   : > { %s1090_s18 = sand.u32 1, %s2443_s17  }
 0x3d6   : > { %s1091_s28 = scalar_lea.sflag [#allocation13], %s1090_s18 }
 0x3d7   : > { %1803 = dma.done.wait (!%p1447_p4), %s1091_s28, 1024  }
 0x3d8   : > { %1805 = vsyncadd (!%p1447_p4), %s1091_s28, 4294966272  ;;  %p26_p10 = scmp.ge.s32.totalorder %s2029_s22, 4   ;;  %s2444_s24 = smov %s1812_s25 }
 0x3d9   : > { %s2445_s25 = smov %s1816_s26  ;;  %s2446_s26 = smov %s2045_s29 }
 0x3da   : > { %s2447_s27 = smov %s2029_s22  ;;  %28 = sbr.rel (!%p26_p10) target bundleno = 11 (0xb), region = 133 }
 0x3e1   :  { %1105 = vsyncpa [#allocation3], 1 }
 0x3e2   :  { %1107 = vsyncpa [#allocation3 + $0x1], 1 }
 0x3e3   :  { %1108 = vsyncpa [#allocation6], 1 }
 0x3e4   :  { %1109 = vsyncpa [#allocation9], 1 }
 0x3e5   :  { %1110 = vsyncpa [#allocation4], 1 }
 0x3e6   :  { %1112 = vsyncpa [#allocation4 + $0x1], 1 }
 0x3e7   :  { %1113 = vsyncpa [#allocation13], 1 }
 0x3e8   :  { %1115 = vsyncpa [#allocation13 + $0x1], 1 }

// kernel: adapter_block_v6_forward.12
= control target key start
LH: loop header
LB: loop body
LE: loop exit
PB: predicated region body
PF: predicated region fallthrough
CT: control target
= control target key end

     0   :  { %s3557_s0 = inlined_call_operand.hbm [shape: bf16[2,64,32], index: 0, kind: input, shape index: {}]   ;;  %s3558_s1 = inlined_call_operand.hbm [shape: bf16[2,64,32], index: 1, kind: input, shape index: {}]   ;;  %s3559_s2 = inlined_call_operand.hbm [shape: bf16[2,64,32], index: 2, kind: input, shape index: {}]   ;;  %s3560_s3 = inlined_call_operand.hbm [shape: f32[2,64,32], index: 3, kind: input, shape index: {}]   ;;  %s3561_s4 = inlined_call_operand.hbm [shape: f32[1,32], index: 4, kind: input, shape index: {}]   ;;  %s3562_s5 = inlined_call_operand.hbm [shape: f32[1,32], index: 5, kind: input, shape index: {}]   ;;  %s3563_s6 = inlined_call_operand.hbm [shape: bf16[32,8], index: 6, kind: input, shape index: {}]   ;;  %s3564_s7 = inlined_call_operand.hbm [shape: f32[1,8], index: 7, kind: input, shape index: {}]   ;;  %s3565_s8 = inlined_call_operand.hbm [shape: bf16[8,32], index: 8, kind: input, shape index: {}]   ;;  %s3566_s9 = inlined_call_operand.hbm [shape: f32[1,32], index: 9, kind: input, shape index: {}]   ;;  %s3567_s10 = inlined_call_operand.hbm [shape: f32[2,64,32], index: 10, kind: output, shape index: {}]  }
   0x1   :  { %3594 = sst [smem:[#allocation42_spill]] %s3558_s1 }
   0x2   :  { %3595 = sst [smem:[#allocation43_spill]] %s3561_s4 }
   0x3   :  { %3596 = sst [smem:[#allocation44_spill]] %s3562_s5 }
   0x4   :  { %3597 = sst [smem:[#allocation45_spill]] %s3564_s7 }
   0x5   :  { %3598 = sst [smem:[#allocation46_spill]] %s3567_s10 }
   0x6   :  { %15 = vsyncpa [#allocation6], 0 }
   0x7   :  { %17 = vsyncpa [#allocation6 + $0x1], 0 }
   0x8   :  { %18 = vsyncpa [#allocation9], 0 }
   0x9   :  { %20 = vsyncpa [#allocation9 + $0x1], 0 }
   0xa   :  { %21 = vsyncpa [#allocation12], 0 }
   0xb   :  { %23 = vsyncpa [#allocation12 + $0x1], 0 }
   0xc   :  { %24 = vsyncpa [#allocation15], 0 }
   0xd   :  { %25 = vsyncpa [#allocation18], 0 }
   0xe   :  { %26 = vsyncpa [#allocation21], 0 }
   0xf   :  { %27 = vsyncpa [#allocation7], 0 }
  0x10   :  { %29 = vsyncpa [#allocation7 + $0x1], 0  ;;  %s2729_s13 = smov 0   ;;  %s2731_s14 = smov 0  }
  0x11   :  { %s2733_s15 = smov 0   ;;  %s2735_s16 = smov 0  }
  0x12   :  { %s2737_s17 = smov 0   ;;  %s2739_s18 = smov 0  }
  0x13 LB: > { %3599 = sst [smem:[#allocation31_spill]] %s2632_s13  ;;  %s2760_s19 = sadd.s32 4294967295, %s2652_s18   ;;  %s2652_s18 = sphi %s2739_s18, %s35_s18   ;;  %s2648_s17 = sphi %s2737_s17, %s3656_s17   ;;  %s2644_s16 = sphi %s2735_s16, %s3655_s16   ;;  %s2640_s15 = sphi %s2733_s15, %s3653_s15   ;;  %s2636_s14 = sphi %s2731_s14, %s3652_s14   ;;  %s2632_s13 = sphi %s2729_s13, %s3651_s13  }
  0x14   : > { %3600 = sst [smem:[#allocation32_spill]] %s2636_s14  ;;  %p1866_p0 = scmp.ge.s32.totalorder %s2652_s18, 1 }
  0x15   : > { %3601 = sst [smem:[#allocation33_spill]] %s2640_s15  ;;  %p3568_p1 = scmp.eq.s32.totalorder %s2760_s19, 0 }
  0x16   : > { %3602 = sst [smem:[#allocation34_spill]] %s2644_s16  ;;  %p325_p2 = scmp.lt.s32.totalorder %s2652_s18, 3 }
  0x17   : > { %3603 = sst [smem:[#allocation35_spill]] %s2760_s19  ;;  %s2654_s21 = smov [#allocation13]  }
  0x18   : > { %p2765_p3 = pnand %p1866_p0, %p325_p2  ;;  %s338_s22 = sshll.u32 %s2654_s21, 4  ;;  %s339_s22 = int_to_ptr.vmem [resolvable:$true] %s338_s22 }
  0x19   : > { %s2655_s23 = smov [#allocation14]   ;;  %s2656_s26 = smov [#allocation17]  }
  0x1a   : > { %s3604_s20 = scalar_select %p2765_p3, 1, 0 }
  0x1b   : > { %p2065_p5 = pneg %p2765_p3  ;;  %s349_s24 = sshll.u32 %s2655_s23, 4  ;;  %s2778_s24 = int_to_ptr.vmem [resolvable:$true] %s349_s24 }
  0x1c   : > { %3605 = sst [smem:[#allocation36_spill]] %s3604_s20  ;;  %s373_s27 = sshll.u32 %s2656_s26, 4  ;;  %s2780_s27 = int_to_ptr.vmem [resolvable:$true] %s373_s27 }
  0x1d   : > { %p2774_p6 = pnand %p2065_p5, %p3568_p1  ;;  %s3607_s4 = sld [smem:[#allocation43_spill]] }
  0x1f   : > { %s3606_s25 = scalar_select %p2774_p6, 1, 0 }
  0x20   : > { %p2790_p8 = pneg %p2774_p6 }
  0x22   : > { %s3608_s21 = scalar_select %p2790_p8, 1, 0 }
  0x23   : > { %s2258_s30 = scalar_lea.hbm %s3607_s4, 16 }
  0x24   : > { %p2259_p7 = scmp.ne.s32.totalorder %s3607_s4, %s2258_s30  ;;  %p2265_p11 = scmp.lt.u32.totalorder %s2258_s30, %s3607_s4 }
  0x26   : > { %p2261_p9 = pnand %p2790_p8, %p2259_p7 }
  0x28   : > { %p2262_p10 = pneg %p2261_p9 }
  0x2a   : > { %p2267_p12 = pnand %p2265_p11, %p2262_p10 }
  0x2c   : > { %2270 = shalt.err (!%p2267_p12)
}
  0x2d   : > { %s2271_s28 = scalar_lea.vmem %s339_s22, 16  ;;  %s2278_s29 = scalar_lea.vmem %s339_s22, 32 }
  0x2e   : > { %p2272_p13 = scmp.ne.s32.totalorder %s339_s22, %s2271_s28  ;;  %p2279_p5 = scmp.lt.s32.totalorder %s339_s22, %s339_s22 }
  0x2f   : > { %p2280_p4 = scmp.lt.s32.totalorder %s2278_s29, %s2271_s28 }
  0x30   : > { %p2274_p0 = pnand %p2272_p13, %p2790_p8 }
  0x31   : > { %p2281_p1 = por %p2280_p4, %p2279_p5 }
  0x32   : > { %p2275_p2 = pneg %p2274_p0 }
  0x34   : > { %p2282_p3 = pnand %p2281_p1, %p2275_p2 }
  0x36   : > { %2285 = shalt.err (!%p2282_p3)
}
  0x37   : > { %2068 = dma.hbm_to_vmem [thread:$0]  (!%p2774_p6), %s3607_s4, 16, %s339_s22, [#allocation12]  }
  0x38   : > { %s3609_s5 = sld [smem:[#allocation44_spill]] }
  0x3e   : > { %s2286_s26 = scalar_lea.hbm %s3609_s5, 16 }
  0x3f   : > { %p2287_p7 = scmp.ne.s32.totalorder %s3609_s5, %s2286_s26  ;;  %p2293_p1 = scmp.lt.u32.totalorder %s2286_s26, %s3609_s5 }
  0x41   : > { %p2289_p9 = pnand %p2287_p7, %p2790_p8 }
  0x43   : > { %p2290_p4 = pneg %p2289_p9 }
  0x45   : > { %p2295_p3 = pnand %p2293_p1, %p2290_p4 }
  0x47   : > { %2298 = shalt.err (!%p2295_p3)
}
  0x48   : > { %s2299_s22 = scalar_lea.vmem %s2778_s24, 16  ;;  %s2306_s10 = scalar_lea.vmem %s2778_s24, 32 }
  0x49   : > { %p2300_p10 = scmp.ne.s32.totalorder %s2778_s24, %s2299_s22  ;;  %p2307_p13 = scmp.lt.s32.totalorder %s2778_s24, %s2778_s24 }
  0x4a   : > { %p2308_p0 = scmp.lt.s32.totalorder %s2306_s10, %s2299_s22 }
  0x4b   : > { %p2302_p11 = pnand %p2300_p10, %p2790_p8 }
  0x4c   : > { %p2309_p2 = por %p2308_p0, %p2307_p13 }
  0x4d   : > { %p2303_p12 = pneg %p2302_p11 }
  0x4f   : > { %p2310_p5 = pnand %p2309_p2, %p2303_p12 }
  0x51   : > { %2313 = shalt.err (!%p2310_p5)
}
  0x52   : > { %2071 = dma.hbm_to_vmem [thread:$0]  (!%p2774_p6), %s3609_s5, 16, %s2778_s24, [#allocation15]  }
  0x53   : > { %s3610_s7 = sld [smem:[#allocation45_spill]] }
  0x59   : > { %s2314_s23 = scalar_lea.hbm %s3610_s7, 16 }
  0x5a   : > { %p2315_p7 = scmp.ne.s32.totalorder %s3610_s7, %s2314_s23  ;;  %p2321_p1 = scmp.lt.u32.totalorder %s2314_s23, %s3610_s7 }
  0x5c   : > { %p2317_p9 = pnand %p2315_p7, %p2790_p8 }
  0x5e   : > { %p2318_p4 = pneg %p2317_p9 }
  0x60   : > { %p2323_p3 = pnand %p2321_p1, %p2318_p4 }
  0x62   : > { %2326 = shalt.err (!%p2323_p3)
}
  0x63   : > { %s2327_s24 = scalar_lea.vmem %s2780_s27, 16  ;;  %s2334_s10 = scalar_lea.vmem %s2780_s27, 32 }
  0x64   : > { %p2328_p10 = scmp.ne.s32.totalorder %s2780_s27, %s2327_s24  ;;  %p2335_p13 = scmp.lt.s32.totalorder %s2780_s27, %s2780_s27 }
  0x65   : > { %p2336_p0 = scmp.lt.s32.totalorder %s2334_s10, %s2327_s24 }
  0x66   : > { %p2330_p11 = pnand %p2328_p10, %p2790_p8 }
  0x67   : > { %p2337_p2 = por %p2336_p0, %p2335_p13 }
  0x68   : > { %p2331_p12 = pneg %p2330_p11 }
  0x6a   : > { %p2338_p5 = pnand %p2337_p2, %p2331_p12 }
  0x6c   : > { %2341 = shalt.err (!%p2338_p5)
}
  0x6d   : > { %2077 = dma.hbm_to_vmem [thread:$0]  (!%p2774_p6), %s3610_s7, 16, %s2780_s27, [#allocation18]  }
  0x6e   : > { %s1865_s12 = sadd.s32 4294967294, %s2652_s18   ;;  %s54_s30 = sadd.s32 1, %s2648_s17 }
  0x6f   : > { %s63_s23 = sadd.s32 1, %s2640_s15  ;;  %p56_p7 = scmp.ge.s32.totalorder %s54_s30, 2 }
  0x70   : > { %p70_p9 = scmp.ne.s32.totalorder %s2640_s15, %s2636_s14  ;;  %p71_p4 = scmp.eq.s32.totalorder %s2652_s18, 0 }
  0x71   : > { %p76_p1 = scmp.ne.s32.totalorder %s2636_s14, %s2632_s13  ;;  %s3658_s30 = smov (%p56_p7, %s54_s30), 0 }
  0x72   : > { %3611 = sst [smem:[#allocation37_spill]] %s3658_s30  ;;  %p2864_p3 = por %p71_p4, %p70_p9 }
  0x73   : > { %p3613_p10 = scmp.eq.s32.totalorder %s2760_s19, 0  ;;  %s58_s28 = ssub.s32 %s2648_s17, %s3658_s30 }
  0x74   : > { %p312_p12 = scmp.eq.s32.totalorder %s2760_s19, 1  ;;  %p61_p13 = scmp.eq.s32.totalorder %s58_s28, 0 }
  0x75   : > { %p2870_p11 = por %p3613_p10, %p76_p1  ;;  %p318_p0 = scmp.eq.s32.totalorder %s1865_s12, 1 }
  0x76   : > { %p2877_p2 = por %p312_p12, %p70_p9  ;;  %p2107_p7 = scmp.lt.s32.totalorder %s2652_s18, 2 }
  0x77   : > { %s3614_s27 = scalar_select %p2870_p11, 1, 0 }
  0x78   : > { %s3616_s29 = scalar_select %p2877_p2, 1, 0 }
  0x79   : > { %3615 = sst [smem:[#allocation38_spill]] %s3614_s27  ;;  %p2884_p5 = por %p318_p0, %p76_p1 }
  0x7a   : > { %3617 = sst [smem:[#allocation39_spill]] %s3616_s29  ;;  %s2890_s10 = sand.u32 1, %s2640_s15  }
  0x7b   : > { %s2882_s22 = scalar_select %p61_p13, %s2640_s15, %s63_s23  }
  0x7c   : > { %s3619_s24 = scalar_select %p2884_p5, 1, 0 }
  0x7d   : > { %3618 = sst [smem:[#allocation40_spill]] %s2882_s22  ;;  %s2893_s16 = sshll.u32 %s2890_s10, 5 }
  0x7e   : > { %3620 = sst [smem:[#allocation41_spill]] %s3619_s24  ;;  %s2896_s11 = sshll.u32 %s2648_s17, 9 }
  0x7f   : > { %p2900_p9 = pnand %p2107_p7, %p2864_p3  ;;  %s3576_s23 = sand.u32 1, %s2652_s18  }
  0x80   : > { %s3622_s1 = sld [smem:[#allocation42_spill]]  ;;  %s433_s7 = scalar_lea.vmem [#allocation8], %s2893_s16 }
  0x81   : > { %s3621_s12 = scalar_select %p2900_p9, 1, 0 }
  0x82   : > { %s442_s30 = sshll.u32 %s433_s7, 4  ;;  %s2916_s26 = scalar_lea.sflag [#allocation9], %s3576_s23  ;;  %s2912_s30 = int_to_ptr.vmem [resolvable:$true] %s442_s30 }
  0x83   : > { %p2922_p1 = pneg %p2900_p9 }
  0x85   : > { %s3623_s15 = scalar_select %p2922_p1, 1, 0 }
  0x86   : > { %s2909_s5 = scalar_lea.hbm %s3622_s1, %s2896_s11  ;;  %s2347_s7 = scalar_lea.hbm %s3622_s1, 1024 }
  0x87   : > { %s2342_s22 = scalar_lea.hbm %s2909_s5, 512  ;;  %p2348_p12 = scmp.lt.u32.totalorder %s2909_s5, %s3622_s1 }
  0x88   : > { %p2343_p4 = scmp.ne.s32.totalorder %s2909_s5, %s2342_s22  ;;  %p2349_p13 = scmp.lt.u32.totalorder %s2347_s7, %s2342_s22 }
  0x89   : > { %p2351_p7 = scmp.lt.u32.totalorder %s2342_s22, %s2909_s5 }
  0x8a   : > { %p2345_p3 = pnand %p2922_p1, %p2343_p4  ;;  %p2350_p0 = por %p2349_p13, %p2348_p12 }
  0x8c   : > { %p2346_p10 = pneg %p2345_p3  ;;  %p2352_p5 = por %p2351_p7, %p2350_p0 }
  0x8e   : > { %p2353_p2 = pnand %p2352_p5, %p2346_p10 }
  0x90   : > { %2356 = shalt.err (!%p2353_p2)
}
  0x91   : > { %s2357_s23 = scalar_lea.vmem %s2912_s30, 512  ;;  %s2657_s4 = smov [#allocation8]  }
  0x92   : > { %p2358_p4 = scmp.ne.s32.totalorder %s2912_s30, %s2357_s23  ;;  %s2362_s28 = sshll.u32 %s2657_s4, 4  ;;  %s2363_s28 = int_to_ptr.vmem [resolvable:$false] %s2362_s28 }
  0x93   : > { %s2364_s13 = scalar_lea.vmem %s2363_s28, 1024  ;;  %p2365_p6 = scmp.lt.s32.totalorder %s2912_s30, %s2363_s28 }
  0x94   : > { %p2360_p3 = pnand %p2358_p4, %p2922_p1  ;;  %p2366_p8 = scmp.lt.s32.totalorder %s2364_s13, %s2357_s23 }
  0x96   : > { %p2361_p11 = pneg %p2360_p3  ;;  %p2367_p12 = por %p2366_p8, %p2365_p6 }
  0x98   : > { %p2368_p13 = pnand %p2367_p12, %p2361_p11 }
  0x9a   : > { %2371 = shalt.err (!%p2368_p13)
}
  0x9b   : > { %s2658_s22 = smov 64   ;;  %s2659_s24 = smov 4  }
  0x9c   : > { %2090 = dma.hbm_to_vmem [thread:$0]  (!%p2900_p9), %s2909_s5, 512, %s2912_s30, %s2916_s26, %s2658_s22, %s2658_s22, %s2659_s24  }
  0x9d   : > { %s2660_s7 = smov [#allocation16]   ;;  %s2661_s28 = smov [#allocation19]  }
  0x9e   : > { %s359_s4 = sshll.u32 %s2660_s7, 4  ;;  %s384_s23 = sshll.u32 %s2661_s28, 4  ;;  %s360_s4 = int_to_ptr.vmem [resolvable:$true] %s359_s4  ;;  %s385_s23 = int_to_ptr.vmem [resolvable:$true] %s384_s23 }
  0x9f   : > { %s2372_s29 = scalar_lea.hbm %s3563_s6, 256  ;;  %p3624_p8 = scmp.ne.s32.totalorder %s3608_s21, 0 }
  0xa0   : > { %p2373_p6 = scmp.ne.s32.totalorder %s3563_s6, %s2372_s29  ;;  %p2379_p5 = scmp.lt.u32.totalorder %s2372_s29, %s3563_s6 }
  0xa2   : > { %p2375_p11 = pnand %p2373_p6, %p3624_p8 }
  0xa4   : > { %p2376_p2 = pneg %p2375_p11 }
  0xa6   : > { %p2381_p10 = pnand %p2379_p5, %p2376_p2 }
  0xa8   : > { %2384 = shalt.err (!%p2381_p10)
}
  0xa9   : > { %s2385_s5 = scalar_lea.vmem %s360_s4, 256  ;;  %p2393_p3 = scmp.lt.s32.totalorder %s360_s4, %s360_s4 }
  0xaa   : > { %p2386_p0 = scmp.ne.s32.totalorder %s360_s4, %s2385_s5  ;;  %p2394_p12 = scmp.lt.s32.totalorder %s2385_s5, %s2385_s5 }
  0xac   : > { %p2388_p7 = pnand %p2386_p0, %p3624_p8  ;;  %p2395_p13 = por %p2394_p12, %p2393_p3 }
  0xae   : > { %p2389_p4 = pneg %p2388_p7 }
  0xb0   : > { %p2396_p9 = pnand %p2395_p13, %p2389_p4 }
  0xb2   : > { %2399 = shalt.err (!%p2396_p9)
}
  0xb3   : > { %p3625_p6 = scmp.ne.s32.totalorder %s3606_s25, 0  ;;  %s2400_s30 = scalar_lea.hbm %s3565_s8, 64 }
  0xb4   : > { %p2401_p11 = scmp.ne.s32.totalorder %s3565_s8, %s2400_s30  ;;  %p2407_p5 = scmp.lt.u32.totalorder %s2400_s30, %s3565_s8 }
  0xb5   : > { %2074 = dma.hbm_to_vmem [thread:$0]  (!%p3625_p6), %s3563_s6, 256, %s360_s4, [#allocation15], %s2658_s22, %s2658_s22, %s2659_s24  }
  0xb6   : > { %p2403_p9 = pnand %p2401_p11, %p3624_p8 }
  0xb8   : > { %p2404_p2 = pneg %p2403_p9 }
  0xba   : > { %p2409_p10 = pnand %p2407_p5, %p2404_p2 }
  0xbc   : > { %2412 = shalt.err (!%p2409_p10)
}
  0xbd   : > { %s2413_s13 = scalar_lea.vmem %s385_s23, 64  ;;  %p2421_p3 = scmp.lt.s32.totalorder %s385_s23, %s385_s23 }
  0xbe   : > { %p2414_p0 = scmp.ne.s32.totalorder %s385_s23, %s2413_s13  ;;  %p2422_p12 = scmp.lt.s32.totalorder %s2413_s13, %s2413_s13 }
  0xc0   : > { %p2416_p7 = pnand %p2414_p0, %p3624_p8  ;;  %p2423_p13 = por %p2422_p12, %p2421_p3 }
  0xc2   : > { %p2417_p4 = pneg %p2416_p7 }
  0xc4   : > { %p2424_p1 = pnand %p2423_p13, %p2417_p4 }
  0xc6   : > { %2427 = shalt.err (!%p2424_p1)
}
  0xc7   : > { %2080 = dma.hbm_to_vmem [thread:$0]  (!%p3625_p6), %s3565_s8, 64, %s385_s23, [#allocation18]  }
  0xc8   : > { %s2662_s1 = smov [#allocation20]   ;;  %s2428_s30 = scalar_lea.hbm %s3566_s9, 16 }
  0xc9   : > { %s395_s14 = sshll.u32 %s2662_s1, 4  ;;  %p2429_p11 = scmp.ne.s32.totalorder %s3566_s9, %s2428_s30  ;;  %s396_s14 = int_to_ptr.vmem [resolvable:$true] %s395_s14 }
  0xca   : > { %p2435_p2 = scmp.lt.u32.totalorder %s2428_s30, %s3566_s9 }
  0xcb   : > { %p2431_p1 = pnand %p2429_p11, %p3624_p8 }
  0xcd   : > { %p2432_p9 = pneg %p2431_p1 }
  0xcf   : > { %p2437_p5 = pnand %p2435_p2, %p2432_p9 }
  0xd1   : > { %2440 = shalt.err (!%p2437_p5)
}
  0xd2   : > { %s2441_s23 = scalar_lea.vmem %s396_s14, 16  ;;  %s2448_s13 = scalar_lea.vmem %s396_s14, 32 }
  0xd3   : > { %p2442_p10 = scmp.ne.s32.totalorder %s396_s14, %s2441_s23  ;;  %p2449_p4 = scmp.lt.s32.totalorder %s396_s14, %s396_s14 }
  0xd4   : > { %p2450_p3 = scmp.lt.s32.totalorder %s2448_s13, %s2441_s23 }
  0xd5   : > { %p2444_p0 = pnand %p2442_p10, %p3624_p8 }
  0xd6   : > { %p2451_p12 = por %p2450_p3, %p2449_p4 }
  0xd7   : > { %p2445_p7 = pneg %p2444_p0 }
  0xd9   : > { %p2452_p13 = pnand %p2451_p12, %p2445_p7 }
  0xdb   : > { %2455 = shalt.err (!%p2452_p13)
}
  0xdc   : > { %2083 = dma.hbm_to_vmem [thread:$0]  (!%p3625_p6), %s3566_s9, 16, %s396_s14, [#allocation21]  }
  0xdd   : > { %s3010_s19 = scalar_lea.hbm %s3557_s0, %s2896_s11  ;;  %s410_s20 = scalar_lea.vmem [#allocation5], %s2893_s16 }
  0xde   : > { %s419_s30 = sshll.u32 %s410_s20, 4  ;;  %s407_s25 = scalar_lea.sflag [#allocation6], %s2890_s10  ;;  %s3013_s30 = int_to_ptr.vmem [resolvable:$true] %s419_s30 }
  0xdf   : > { %s2456_s27 = scalar_lea.hbm %s3010_s19, 512  ;;  %p3626_p11 = scmp.ne.s32.totalorder %s3623_s15, 0 }
  0xe0   : > { %p2457_p8 = scmp.ne.s32.totalorder %s3010_s19, %s2456_s27  ;;  %s2461_s7 = scalar_lea.hbm %s3557_s0, 1024 }
  0xe1   : > { %p2462_p6 = scmp.lt.u32.totalorder %s3010_s19, %s3557_s0  ;;  %p2463_p2 = scmp.lt.u32.totalorder %s2461_s7, %s2456_s27 }
  0xe2   : > { %p2459_p1 = pnand %p2457_p8, %p3626_p11  ;;  %p2465_p10 = scmp.lt.u32.totalorder %s2456_s27, %s3010_s19 }
  0xe3   : > { %p2464_p5 = por %p2463_p2, %p2462_p6 }
  0xe4   : > { %p2460_p9 = pneg %p2459_p1 }
  0xe5   : > { %p2466_p0 = por %p2465_p10, %p2464_p5 }
  0xe7   : > { %p2467_p7 = pnand %p2466_p0, %p2460_p9 }
  0xe9   : > { %2470 = shalt.err (!%p2467_p7)
}
  0xea   : > { %s2471_s13 = scalar_lea.vmem %s3013_s30, 512  ;;  %s2663_s4 = smov [#allocation5]  }
  0xeb   : > { %p2472_p4 = scmp.ne.s32.totalorder %s3013_s30, %s2471_s13  ;;  %s2476_s5 = sshll.u32 %s2663_s4, 4  ;;  %s2477_s5 = int_to_ptr.vmem [resolvable:$false] %s2476_s5 }
  0xec   : > { %s2478_s1 = scalar_lea.vmem %s2477_s5, 1024  ;;  %p2479_p13 = scmp.lt.s32.totalorder %s3013_s30, %s2477_s5 }
  0xed   : > { %p2474_p3 = pnand %p2472_p4, %p3626_p11  ;;  %p2480_p8 = scmp.lt.s32.totalorder %s2478_s1, %s2471_s13 }
  0xef   : > { %p2475_p12 = pneg %p2474_p3  ;;  %p2481_p1 = por %p2480_p8, %p2479_p13 }
  0xf1   : > { %p2482_p6 = pnand %p2481_p1, %p2475_p12 }
  0xf3   : > { %2485 = shalt.err (!%p2482_p6)
}
  0xf4   : > { %p3627_p9 = scmp.ne.s32.totalorder %s3621_s12, 0  ;;  %s3046_s27 = scalar_lea.hbm %s3559_s2, %s2896_s11 }
  0xf5   : > { %s456_s14 = scalar_lea.vmem [#allocation10], %s2893_s16  ;;  %s1883_s7 = sshll.u32 %s2890_s10, 6 }
  0xf6   : > { %2087 = dma.hbm_to_vmem [thread:$0]  (!%p3627_p9), %s3010_s19, 512, %s3013_s30, %s407_s25, %s2658_s22, %s2658_s22, %s2659_s24  }
  0xf7   : > { %s465_s29 = sshll.u32 %s456_s14, 4  ;;  %s2486_s28 = scalar_lea.hbm %s3046_s27, 512  ;;  %s3049_s29 = int_to_ptr.vmem [resolvable:$true] %s465_s29 }
  0xf8   : > { %p2487_p2 = scmp.ne.s32.totalorder %s3046_s27, %s2486_s28  ;;  %s2491_s25 = scalar_lea.hbm %s3559_s2, 1024 }
  0xf9   : > { %p2492_p0 = scmp.lt.u32.totalorder %s3046_s27, %s3559_s2  ;;  %p2493_p7 = scmp.lt.u32.totalorder %s2491_s25, %s2486_s28 }
  0xfa   : > { %p2489_p5 = pnand %p2487_p2, %p3626_p11  ;;  %p2495_p3 = scmp.lt.u32.totalorder %s2486_s28, %s3046_s27 }
  0xfb   : > { %p2494_p4 = por %p2493_p7, %p2492_p0 }
  0xfc   : > { %p2490_p10 = pneg %p2489_p5 }
  0xfd   : > { %p2496_p12 = por %p2495_p3, %p2494_p4 }
  0xff   : > { %p2497_p13 = pnand %p2496_p12, %p2490_p10 }
 0x101   : > { %2500 = shalt.err (!%p2497_p13)
}
 0x102   : > { %s2501_s16 = scalar_lea.vmem %s3049_s29, 512  ;;  %s2664_s13 = smov [#allocation10]  }
 0x103   : > { %p2502_p8 = scmp.ne.s32.totalorder %s3049_s29, %s2501_s16  ;;  %s2506_s4 = sshll.u32 %s2664_s13, 4  ;;  %s2507_s4 = int_to_ptr.vmem [resolvable:$false] %s2506_s4 }
 0x104   : > { %s2508_s5 = scalar_lea.vmem %s2507_s4, 1024  ;;  %p2509_p2 = scmp.lt.s32.totalorder %s3049_s29, %s2507_s4 }
 0x105   : > { %p2504_p1 = pnand %p2502_p8, %p3626_p11  ;;  %p2510_p5 = scmp.lt.s32.totalorder %s2508_s5, %s2501_s16 }
 0x107   : > { %p2505_p6 = pneg %p2504_p1  ;;  %p2511_p0 = por %p2510_p5, %p2509_p2 }
 0x109   : > { %p2512_p7 = pnand %p2511_p0, %p2505_p6 }
 0x10b   : > { %2515 = shalt.err (!%p2512_p7)
}
 0x10c   : > { %2093 = dma.hbm_to_vmem [thread:$0]  (!%p3627_p9), %s3046_s27, 512, %s3049_s29, %s2916_s26, %s2658_s22, %s2658_s22, %s2659_s24  }
 0x10d   : > { %s1940_s1 = sshll.u32 %s2648_s17, 10  ;;  %s479_s28 = scalar_lea.vmem [#allocation11], %s1883_s7 }
 0x10e   : > { %s3081_s14 = scalar_lea.hbm %s3560_s3, %s1940_s1  ;;  %s488_s19 = sshll.u32 %s479_s28, 4  ;;  %s3085_s19 = int_to_ptr.vmem [resolvable:$true] %s488_s19 }
 0x10f   : > { %s3628_s30 = sand.u32 1, %s2652_s18   ;;  %s2516_s11 = scalar_lea.hbm %s3081_s14, 1024 }
 0x110   : > { %s3089_s25 = scalar_lea.sflag [#allocation12], %s3628_s30  ;;  %p2517_p10 = scmp.ne.s32.totalorder %s3081_s14, %s2516_s11 }
 0x111   : > { %s2521_s10 = scalar_lea.hbm %s3560_s3, 2048  ;;  %p2522_p12 = scmp.lt.u32.totalorder %s3081_s14, %s3560_s3 }
 0x112   : > { %p2519_p4 = pnand %p2517_p10, %p3626_p11  ;;  %p2523_p13 = scmp.lt.u32.totalorder %s2521_s10, %s2516_s11 }
 0x113   : > { %p2525_p1 = scmp.lt.u32.totalorder %s2516_s11, %s3081_s14 }
 0x114   : > { %p2520_p3 = pneg %p2519_p4  ;;  %p2524_p8 = por %p2523_p13, %p2522_p12 }
 0x116   : > { %p2526_p6 = por %p2525_p1, %p2524_p8 }
 0x118   : > { %p2527_p2 = pnand %p2526_p6, %p2520_p3 }
 0x11a   : > { %2530 = shalt.err (!%p2527_p2)
}
 0x11b   : > { %s2531_s29 = scalar_lea.vmem %s3085_s19, 1024  ;;  %s2665_s7 = smov [#allocation11]  }
 0x11c   : > { %p2532_p5 = scmp.ne.s32.totalorder %s3085_s19, %s2531_s29  ;;  %s2536_s23 = sshll.u32 %s2665_s7, 4  ;;  %s2537_s23 = int_to_ptr.vmem [resolvable:$false] %s2536_s23 }
 0x11d   : > { %s2538_s16 = scalar_lea.vmem %s2537_s23, 2048  ;;  %p2539_p10 = scmp.lt.s32.totalorder %s3085_s19, %s2537_s23 }
 0x11e   : > { %p2534_p0 = pnand %p2532_p5, %p3626_p11  ;;  %p2540_p4 = scmp.lt.s32.totalorder %s2538_s16, %s2531_s29 }
 0x120   : > { %p2535_p7 = pneg %p2534_p0  ;;  %p2541_p12 = por %p2540_p4, %p2539_p10 }
 0x122   : > { %p2542_p13 = pnand %p2541_p12, %p2535_p7 }
 0x124   : > { %2545 = shalt.err (!%p2542_p13)
}
 0x125   : > { %s2666_s13 = smov 128   ;;  %s2667_s4 = smov 8  }
 0x126   : > { %2096 = dma.hbm_to_vmem [thread:$0]  (!%p3627_p9), %s3081_s14, 1024, %s3085_s19, %s3089_s25, %s2666_s13, %s2666_s13, %s2667_s4  }
 0x127   : > { %s3629_s15 = sld [smem:[#allocation36_spill]] }
 0x12d   : > { %p3630_p11 = scmp.ne.s32.totalorder %s3629_s15, 0 }
 0x12e   : > { %s3631_s5 = sld [smem:[#allocation32_spill]] (!%p3630_p11) }
 0x12f   : > { %500 = sbr.rel (%p3630_p11) target bundleno = 1969 (0x7b1), region = 60  ;;  %s3632_s1 = sld [smem:[#allocation38_spill]] (!%p3630_p11) }
 0x134   : > { %s3116_s21 = sand.u32 (!%p3630_p11), 1, %s3631_s5  }
 0x135   : > { %s1887_s20 = sshll.u32 (!%p3630_p11), %s3116_s21, 5  ;;  %s503_s28 = scalar_lea.sflag (!%p3630_p11), [#allocation6], %s3116_s21 }
 0x136   : > { %s3120_s30 = scalar_lea.vmem [#allocation5], %s1887_s20  ;;  %p3633_p3 = scmp.ne.s32.totalorder %s3632_s1, 0 }
 0x138   : > { %2599 = dma.done.wait (%p3633_p3), %s503_s28, 512  }
 0x139   : > { %2601 = vsyncadd (%p3633_p3), %s503_s28, 4294966784  ;;  %s3634_s12 = sld [smem:[#allocation35_spill]]  ;;  %s3127_s25 = scalar_lea.vmem [#allocation8], %s1887_s20 }
 0x13f   : > { %s511_s14 = sand.u32 1, %s3634_s12  }
 0x140   : > { %s512_s19 = scalar_lea.sflag [#allocation9], %s511_s14 }
 0x141   : > { %2603 = dma.done.wait (%p3633_p3), %s512_s19, 1024  }
 0x142   : > { %2605 = vsyncadd (%p3633_p3), %s512_s19, 4294966272  ;;  %s1890_s11 = sshll.u32 %s3116_s21, 6  ;;  %s3134_s26 = scalar_lea.vmem [#allocation10], %s1887_s20 }
 0x143   : > { %s530_s22 = scalar_lea.sflag [#allocation12], %s511_s14  ;;  %s3138_s10 = scalar_lea.vmem [#allocation11], %s1890_s11 }
 0x144   : > { %2607 = dma.done.wait (%p3633_p3), %s530_s22, 1024  }
 0x145   : > { %2609 = vsyncadd (%p3633_p3), %s530_s22, 4294966272  ;;  %p3635_p9 = scmp.eq.s32.totalorder %s3634_s12, 0 }
 0x147   : > { %2611 = dma.done.wait (%p3635_p9), [#allocation12], 16   ;;  %p3636_p8 = pmov %p3635_p9 }
 0x149   : > { %2613 = vsyncadd (%p3636_p8), [#allocation12], 4294967280  ;;  %p3637_p1 = pmov %p3636_p8 }
 0x14b   : > { %2615 = dma.done.wait (%p3637_p1), [#allocation15], 272   ;;  %p3638_p6 = pmov %p3637_p1 }
 0x14c   : > { %p3639_p2 = pmov %p3637_p1 }
 0x14d   : > { %2617 = vsyncadd (%p3638_p6), [#allocation15], 4294967024 }
 0x14e   : > { %2619 = dma.done.wait (%p3639_p2), [#allocation18], 80   ;;  %p3640_p5 = pmov %p3637_p1 }
 0x14f   : > { %p3641_p0 = pmov %p3637_p1 }
 0x150   : > { %2621 = vsyncadd (%p3640_p5), [#allocation18], 4294967216 }
 0x151   : > { %2623 = dma.done.wait (%p3641_p0), [#allocation21], 16   ;;  %p3642_p7 = pmov %p3641_p0 }
 0x152   : > { %vm636_vm0 = vcmask 261120   ;;  %v2180_v0 = vld [vmem:[%s3127_s25] sm:$0xff]   ;;  %v2181_v1 = vld [vmem:[%s3127_s25 + $0x8] sm:$0xff]   ;;  %v2182_v5 = vld [vmem:[%s3127_s25 + $0x10] sm:$0xff]   ;;  %vm619_vm1 = vcmask 7168   ;;  %v2668_v12 = vmov -inf  }
 0x153   : > { %2625 = vsyncadd (%p3642_p7), [#allocation21], 4294967280  ;;  %2025 = vmatprep.subr.msk.bf16.mxu0 %vm636_vm0, %v2180_v0  ;;  %v723_v2 = vsel %vm636_vm0, %v2180_v0, 0  ;;  %v2184_v3 = vld [vmem:[%s3120_s30] sm:$0xff]   ;;  %v726_v4 = vsel %vm636_vm0, %v2181_v1, 0  ;;  %v729_v6 = vsel %vm636_vm0, %v2182_v5, 0 }
 0x154   : > { %1970 = vmatpush3.bf16.xpose.msra.mxu0 %v723_v2  ;;  %1977 = vmatprep.mubr.msk.bf16.mxu0 %vm636_vm0, %v2184_v3  ;;  %v2183_v7 = vld [vmem:[%s3127_s25 + $0x18] sm:$0xff]   ;;  %v2185_v9 = vld [vmem:[%s3120_s30 + $0x8] sm:$0xff]   ;;  %v2186_v10 = vld [vmem:[%s3120_s30 + $0x10] sm:$0xff]   ;;  %622 = vst.msk [vmem:[#allocation2 + $0x10] sm:$0xff] %vm619_vm1, %v2668_v12  ;;  %vm815_vm2 = vcmask 523264   ;;  %v2669_v37 = vmov 0  }
 0x155   : > { %2026 = vmatprep.subr.msk.bf16.mxu0 %vm636_vm0, %v2181_v1  ;;  %v732_v8 = vsel %vm636_vm0, %v2183_v7, 0  ;;  %v2187_v11 = vld [vmem:[%s3120_s30 + $0x18] sm:$0xff]   ;;  %620 = vst.msk [vmem:[#allocation2] sm:$0xff] %vm619_vm1, %v2668_v12  ;;  %621 = vst.msk [vmem:[#allocation2 + $0x8] sm:$0xff] %vm619_vm1, %v2668_v12  ;;  %2178 = vset.pattern.permute.xlu0 %v2669_v37  ;;  %v2670_v38 = vmov 0.0   ;;  %v2188_v61 = vld [vmem:[%s3134_s26] sm:$0xff]  }
 0x156   : > { %623 = vst.msk [vmem:[#allocation2 + $0x18] sm:$0xff] %vm619_vm1, %v2668_v12  ;;  %624 = vst.msk [vmem:[#allocation2 + $0x20] sm:$0xff] %vm619_vm1, %v2668_v12  ;;  %2179 = vset.pattern.permute.xlu1 %v2669_v37  ;;  %1985 = vmatprep.subr.bf16.mxu1 %v2188_v61  ;;  %vm1541_vm3 = vcmask 1043456   ;;  %vm1528_vm4 = vcmask 64512   ;;  %s3643_s24 = sld [smem:[#allocation34_spill]]  ;;  %s608_s27 = scalar_lea.vmem [#allocation22], %s1890_s11 }
 0x157   : > { %625 = vst.msk [vmem:[#allocation2 + $0x28] sm:$0xff] %vm619_vm1, %v2668_v12  ;;  %626 = vst.msk [vmem:[#allocation2 + $0x30] sm:$0xff] %vm619_vm1, %v2668_v12  ;;  %1986 = vmatpush3.bf16.msra.mxu1 %v2188_v61  ;;  %s1642_s7 = sshll.u32 %s608_s27, 4  ;;  %s3644_s23 = sld [smem:[#allocation39_spill]]  ;;  %s3504_s7 = int_to_ptr.vmem [resolvable:$true] %s1642_s7 }
 0x158   : > { %627 = vst.msk [vmem:[#allocation2 + $0x38] sm:$0xff] %vm619_vm1, %v2668_v12  ;;  %628 = vst.msk [vmem:[#allocation3] sm:$0xff] %vm619_vm1, %v2670_v38  ;;  %s3645_s4 = sld [smem:[#allocation46_spill]]  ;;  %s1627_s5 = scalar_lea.sflag [#allocation7], %s3116_s21 }
 0x159   : > { %629 = vst.msk [vmem:[#allocation3 + $0x8] sm:$0xff] %vm619_vm1, %v2670_v38  ;;  %630 = vst.msk [vmem:[#allocation3 + $0x10] sm:$0xff] %vm619_vm1, %v2670_v38  ;;  %s2546_s1 = scalar_lea.vmem %s3504_s7, 1024  ;;  %s2671_s20 = smov [#allocation22]  }
 0x15a   : > { %631 = vst.msk [vmem:[#allocation3 + $0x18] sm:$0xff] %vm619_vm1, %v2670_v38  ;;  %632 = vst.msk [vmem:[#allocation3 + $0x20] sm:$0xff] %vm619_vm1, %v2670_v38  ;;  %p2547_p10 = scmp.ne.s32.totalorder %s3504_s7, %s2546_s1  ;;  %s2550_s28 = sshll.u32 %s2671_s20, 4  ;;  %s2551_s28 = int_to_ptr.vmem [resolvable:$false] %s2550_s28 }
 0x15b   : > { %633 = vst.msk [vmem:[#allocation3 + $0x28] sm:$0xff] %vm619_vm1, %v2670_v38  ;;  %634 = vst.msk [vmem:[#allocation3 + $0x30] sm:$0xff] %vm619_vm1, %v2670_v38  ;;  %v3236_v39 = vld [vmem:[#allocation2 + $0x10] sm:$0xff]  ;;  %s2552_s30 = scalar_lea.vmem %s2551_s28, 2048  ;;  %p2553_p11 = scmp.lt.s32.totalorder %s3504_s7, %s2551_s28 }
 0x15c   : > { %1972 = vmatpush3.bf16.xpose.msra.mxu0 %v726_v4  ;;  %635 = vst.msk [vmem:[#allocation3 + $0x38] sm:$0xff] %vm619_vm1, %v2670_v38  ;;  %v3238_v40 = vld [vmem:[#allocation2] sm:$0xff]  ;;  %v3253_v47 = vld [vmem:[#allocation2 + $0x8] sm:$0xff]  ;;  %s1941_s29 = sshll.u32 %s3643_s24, 10  ;;  %p2554_p3 = scmp.lt.s32.totalorder %s2552_s30, %s2546_s1 }
 0x15d   : > { %2027 = vmatprep.subr.msk.bf16.mxu0 %vm636_vm0, %v2182_v5  ;;  %637 = vst.msk [vmem:[#allocation4] sm:$0xff] %vm636_vm0, %v2670_v38  ;;  %638 = vst.msk [vmem:[#allocation4 + $0x8] sm:$0xff] %vm636_vm0, %v2670_v38  ;;  %v3246_v45 = vld [vmem:[#allocation2 + $0x18] sm:$0xff]  ;;  %v3271_v54 = vld [vmem:[#allocation2 + $0x20] sm:$0xff]  ;;  %p3646_p4 = scmp.ne.s32.totalorder %s3644_s23, 0 }
 0x15e   : > { %639 = vst.msk [vmem:[#allocation4 + $0x10] sm:$0xff] %vm636_vm0, %v2670_v38  ;;  %640 = vst.msk [vmem:[#allocation4 + $0x18] sm:$0xff] %vm636_vm0, %v2670_v38  ;;  %v3277_v57 = vld [vmem:[#allocation2 + $0x28] sm:$0xff]  ;;  %v3283_v60 = vld [vmem:[#allocation2 + $0x30] sm:$0xff]  ;;  %s3502_s15 = scalar_lea.hbm %s3645_s4, %s1941_s29  ;;  %p2555_p9 = por %p2554_p3, %p2553_p11 }
 0x15f   : > { %641 = vst.msk [vmem:[#allocation4 + $0x20] sm:$0xff] %vm636_vm0, %v2670_v38  ;;  %642 = vst.msk [vmem:[#allocation4 + $0x28] sm:$0xff] %vm636_vm0, %v2670_v38  ;;  %v3293_v1 = vld [vmem:[#allocation2 + $0x38] sm:$0xff]  ;;  %v2189_v5 = vld [vmem:[%s3134_s26 + $0x8] sm:$0xff]   ;;  %p2548_p12 = pnand %p2547_p10, %p3646_p4 }
 0x160   : > { %643 = vst.msk [vmem:[#allocation4 + $0x30] sm:$0xff] %vm636_vm0, %v2670_v38  ;;  %644 = vst.msk [vmem:[#allocation4 + $0x38] sm:$0xff] %vm636_vm0, %v2670_v38  ;;  %1987 = vmatprep.subr.bf16.mxu1 %v2189_v5 }
 0x161   : > { %1988 = vmatpush3.bf16.msra.mxu1 %v2189_v5  ;;  %p2549_p13 = pneg %p2548_p12 }
 0x163   : > { %p2556_p8 = pnand %p2555_p9, %p2549_p13 }
 0x164   : > { %1974 = vmatpush3.bf16.xpose.msra.mxu0 %v729_v6 }
 0x165   : > { %2028 = vmatprep.subr.msk.bf16.mxu0 %vm636_vm0, %v2183_v7 }
 0x16c   : > { %1976 = vmatpush3.bf16.xpose.msra.mxu0 %v732_v8 }
 0x173   : > { %1978 = vmatmul.mubr.msk.bf16.vlgmr.msra.gmra.mrb[0].mxu0 %vm636_vm0, %v2185_v9  ;;  %v2190_v9 = vld [vmem:[%s3134_s26 + $0x10] sm:$0xff]  }
 0x174   : > { %1981 = vmatprep.mubr.msk.bf16.mxu0 %vm636_vm0, %v2186_v10  ;;  %1989 = vmatprep.subr.bf16.mxu1 %v2190_v9  ;;  %v2191_v10 = vld [vmem:[%s3134_s26 + $0x18] sm:$0xff]  }
 0x175   : > { %1990 = vmatpush3.bf16.msra.mxu1 %v2190_v9 }
 0x176   : > { %1991 = vmatprep.subr.bf16.mxu1 %v2191_v10 }
 0x179   : > { %1992 = vmatpush3.bf16.msra.mxu1 %v2191_v10 }
 0x17b   : > { %1982 = vmatmul.mubr.msk.bf16.gmra.mrb[4].mxu0 %vm636_vm0, %v2187_v11 }
 0x246   : > { %v1979_v13 = vpop.f32.mrb[0].mxu0 }
 0x247   : > { %v3188_v14 = vmul.f32 0.17677669, %v1979_v13  ;;  %v768_v15 = vpop.f32.mrb[1].mxu0 }
 0x248   : > { %v3190_v16 = vmul.f32 0.17677669, %v768_v15  ;;  %v1980_v17 = vpop.f32.mrb[2].mxu0 }
 0x249   : > { %v3192_v18 = vmul.f32 0.17677669, %v1980_v17  ;;  %v771_v19 = vpop.f32.mrb[3].mxu0  ;;  %v822_v20 = vsel %vm815_vm2, %v3188_v14, -inf }
 0x24a   : > { %v3196_v21 = vmul.f32 0.17677669, %v771_v19  ;;  %823 = vmax.xlane.f32.xlu1 %v822_v20  ;;  %v816_v22 = vsel %vm815_vm2, %v3190_v16, -inf }
 0x24b   : > { %817 = vmax.xlane.f32.xlu0 %v816_v22  ;;  %v825_v23 = vsel %vm815_vm2, %v3192_v18, -inf }
 0x24c   : > { %v819_v25 = vsel %vm815_vm2, %v3196_v21, -inf }
 0x24e   : > { %826 = vmax.xlane.f32.xlu1 %v825_v23  ;;  %v1983_v24 = vpop.f32.mrb[4].mxu0 }
 0x24f   : > { %820 = vmax.xlane.f32.xlu0 %v819_v25  ;;  %v784_v26 = vpop.f32.mrb[5].mxu0  ;;  %v3206_v30 = vmul.f32 0.17677669, %v1983_v24 }
 0x250   : > { %v3204_v27 = vmul.f32 0.17677669, %v784_v26  ;;  %v1984_v28 = vpop.f32.mrb[6].mxu0 }
 0x251   : > { %v787_v29 = vpop.f32.mrb[7].mxu0  ;;  %v3212_v33 = vmul.f32 0.17677669, %v1984_v28  ;;  %v834_v35 = vsel %vm815_vm2, %v3206_v30, -inf }
 0x252   : > { %v3208_v31 = vmul.f32 0.17677669, %v787_v29  ;;  %v828_v32 = vsel %vm815_vm2, %v3204_v27, -inf }
 0x253   : > { %829 = vmax.xlane.f32.xlu0 %v828_v32  ;;  %v837_v36 = vsel %vm815_vm2, %v3212_v33, -inf }
 0x254   : > { %v831_v34 = vsel %vm815_vm2, %v3208_v31, -inf }
 0x255   : > { %832 = vmax.xlane.f32.xlu1 %v831_v34 }
 0x257   : > { %835 = vmax.xlane.f32.xlu0 %v834_v35 }
 0x259   : > { %838 = vmax.xlane.f32.xlu1 %v837_v36 }
 0x2d7   : > { %v824_v41 = vpop.xlane.xlu1 %823 }
 0x2d8   : > { %v3241_v42 = vmax.f32 %v3236_v39, %v824_v41  ;;  %v818_v43 = vpop.xlane.xlu0 %817 }
 0x2d9   : > { %v3244_v44 = vmax.f32 %v3238_v40, %v818_v43 }
 0x2da   : > { %v850_v46 = vsub.f32 %v3236_v39, %v3241_v42  ;;  %1172 = vst.msk [vmem:[#allocation2 + $0x10] sm:$0xff] %vm619_vm1, %v3241_v42  ;;  %884 = vperm.xlu1 %2179, %v3241_v42  }
 0x2db   : > { %v848_v48 = vsub.f32 %v3238_v40, %v3244_v44  ;;  %1170 = vst.msk [vmem:[#allocation2] sm:$0xff] %vm619_vm1, %v3244_v44  ;;  %v827_v49 = vpop.xlane.xlu1 %826  ;;  %874 = vperm.xlu0 %2178, %v3244_v44  }
 0x2dc   : > { %v3261_v50 = vmax.f32 %v3246_v45, %v827_v49  ;;  %v821_v51 = vpop.xlane.xlu0 %820 }
 0x2dd   : > { %v3264_v52 = vmax.f32 %v3253_v47, %v821_v51 }
 0x2de   : > { %v851_v53 = vsub.f32 %v3246_v45, %v3261_v50  ;;  %1173 = vst.msk [vmem:[#allocation2 + $0x18] sm:$0xff] %vm619_vm1, %v3261_v50  ;;  %889 = vperm.xlu1 %2179, %v3261_v50   ;;  %v936_v50 = vld [vmem:[#allocation3] sm:$0xff] }
 0x2df   : > { %v849_v55 = vsub.f32 %v3253_v47, %v3264_v52  ;;  %1171 = vst.msk [vmem:[#allocation2 + $0x8] sm:$0xff] %vm619_vm1, %v3264_v52 }
 0x2e0   : > { %v830_v56 = vpop.xlane.xlu0 %829 }
 0x2e1   : > { %v3280_v58 = vmax.f32 %v3271_v54, %v830_v56 }
 0x2e2   : > { %v833_v59 = vpop.xlane.xlu1 %832  ;;  %879 = vperm.xlu1 %2179, %v3264_v52  }
 0x2e3   : > { %v852_v62 = vsub.f32 %v3271_v54, %v3280_v58  ;;  %1174 = vst.msk [vmem:[#allocation2 + $0x20] sm:$0xff] %vm619_vm1, %v3280_v58  ;;  %v3291_v63 = vmax.f32 %v3277_v57, %v833_v59  ;;  %v939_v54 = vld [vmem:[#allocation3 + $0x18] sm:$0xff] }
 0x2e4   : > { %v836_v0 = vpop.xlane.xlu0 %835 }
 0x2e5   : > { %v853_v2 = vsub.f32 %v3277_v57, %v3291_v63  ;;  %1175 = vst.msk [vmem:[#allocation2 + $0x28] sm:$0xff] %vm619_vm1, %v3291_v63  ;;  %v3300_v3 = vmax.f32 %v3283_v60, %v836_v0  ;;  %v864_v47 = vmul.f32 1.442695, %v852_v62  ;;  %v937_v62 = vld [vmem:[#allocation3 + $0x8] sm:$0xff] }
 0x2e6   : > { %v839_v4 = vpop.xlane.xlu1 %838 }
 0x2e7   : > { %v854_v6 = vsub.f32 %v3283_v60, %v3300_v3  ;;  %1176 = vst.msk [vmem:[#allocation2 + $0x30] sm:$0xff] %vm619_vm1, %v3300_v3  ;;  %v3308_v7 = vmax.f32 %v3293_v1, %v839_v4  ;;  %904 = vperm.xlu1 %2179, %v3300_v3   ;;  %v866_v40 = vmul.f32 1.442695, %v853_v2 }
 0x2e9   : > { %v855_v8 = vsub.f32 %v3293_v1, %v3308_v7  ;;  %1177 = vst.msk [vmem:[#allocation2 + $0x38] sm:$0xff] %vm619_vm1, %v3308_v7  ;;  %v868_v57 = vmul.f32 1.442695, %v854_v6 }
 0x2eb   : > { %894 = vperm.xlu1 %2179, %v3280_v58  }
 0x2ef   : > { %899 = vperm.xlu1 %2179, %v3291_v63  }
 0x2f3   : > { %909 = vperm.xlu1 %2179, %v3308_v7  }
 0x359   : > { %v885_v11 = vpop.permute.xlu1 %884 }
 0x35a   : > { %v875_v12 = vpop.permute.xlu0 %874  ;;  %v914_v20 = vsub.f32 %v3188_v14, %v885_v11 }
 0x35b   : > { %v912_v13 = vsub.f32 %v3190_v16, %v875_v12 }
 0x35c   : > { %v924_v25 = vmul.f32 1.442695, %v914_v20  ;;  %v860_v20 = vmul.f32 1.442695, %v850_v46 }
 0x35d   : > { %v920_v15 = vmul.f32 1.442695, %v912_v13  ;;  %v890_v17 = vpop.permute.xlu1 %889 }
 0x35e   : > { %v915_v19 = vsub.f32 %v3192_v18, %v890_v17  ;;  %v858_v17 = vmul.f32 1.442695, %v849_v55 }
 0x35f   : > { %2194 = vpow2.f32 %v920_v15 }
 0x360   : > { %v926_v22 = vmul.f32 1.442695, %v915_v19  ;;  %v856_v19 = vmul.f32 1.442695, %v848_v48 }
 0x361   : > { %v880_v23 = vpop.permute.xlu1 %879 }
 0x362   : > { %2196 = vpow2.f32 %v926_v22  ;;  %v913_v24 = vsub.f32 %v3196_v21, %v880_v23  ;;  %v862_v22 = vmul.f32 1.442695, %v851_v53  ;;  %v870_v23 = vmul.f32 1.442695, %v855_v8  ;;  %v941_v8 = vld [vmem:[#allocation3 + $0x28] sm:$0xff] }
 0x364   : > { %v922_v26 = vmul.f32 1.442695, %v913_v24 }
 0x366   : > { %2198 = vpow2.f32 %v922_v26  ;;  %v905_v28 = vpop.permute.xlu1 %904  ;;  %v938_v26 = vld [vmem:[#allocation3 + $0x10] sm:$0xff] }
 0x367   : > { %2200 = vpow2.f32 %v924_v25  ;;  %v918_v16 = vsub.f32 %v3206_v30, %v905_v28 }
 0x369   : > { %v2195_v29 = vpop.eup %2194  ;;  %v932_v35 = vmul.f32 1.442695, %v918_v16 }
 0x36a   : > { %v895_v32 = vpop.permute.xlu1 %894  ;;  %v952_v34 = vsel %vm815_vm2, %v2195_v29, 0.0 }
 0x36b   : > { %v916_v18 = vsub.f32 %v3204_v27, %v895_v32  ;;  %953 = vadd.xlane.f32.xlu1 %v952_v34  ;;  %v942_v34 = vld [vmem:[#allocation3 + $0x30] sm:$0xff] }
 0x36c   : > { %v2197_v14 = vpop.eup %2196 }
 0x36d   : > { %v928_v36 = vmul.f32 1.442695, %v916_v18  ;;  %v961_v37 = vsel %vm815_vm2, %v2197_v14, 0.0 }
 0x36e   : > { %v900_v21 = vpop.permute.xlu1 %899 }
 0x36f   : > { %2202 = vpow2.f32 %v928_v36  ;;  %v917_v38 = vsub.f32 %v3208_v31, %v900_v21  ;;  %962 = vadd.xlane.f32.xlu1 %v961_v37 }
 0x370   : > { %v2199_v41 = vpop.eup %2198  ;;  %2204 = vpow2.f32 %v932_v35 }
 0x371   : > { %v2201_v43 = vpop.eup %2200  ;;  %v930_v30 = vmul.f32 1.442695, %v917_v38  ;;  %v955_v49 = vsel %vm815_vm2, %v2199_v41, 0.0  ;;  %v1049_v51 = vpack.c.bf16 %v2199_v41, %v2195_v29  ;;  %v940_v29 = vld [vmem:[#allocation3 + $0x20] sm:$0xff]  ;;  %v943_v41 = vld [vmem:[#allocation3 + $0x38] sm:$0xff] }
 0x372   : > { %v910_v56 = vpop.permute.xlu1 %909  ;;  %956 = vadd.xlane.f32.xlu0 %v955_v49  ;;  %v1050_v27 = vpack.c.bf16 %v2197_v14, %v2201_v43  ;;  %v958_v31 = vsel %vm815_vm2, %v2201_v43, 0.0 }
 0x373   : > { %2206 = vpow2.f32 %v930_v30  ;;  %v919_v59 = vsub.f32 %v3212_v33, %v910_v56  ;;  %1993 = vmatprep.mubr.msk.bf16.mxu1 %vm815_vm2, %v1049_v51 }
 0x374   : > { %1994 = vmatmul.mubr.msk.bf16.vlgmr.msra.gmra.mrb[0].mxu1 %vm815_vm2, %v1050_v27 }
 0x375   : > { %v934_v61 = vmul.f32 1.442695, %v919_v59 }
 0x376   : > { %959 = vadd.xlane.f32.xlu0 %v958_v31 }
 0x377   : > { %2208 = vpow2.f32 %v934_v61 }
 0x378   : > { %2210 = vpow2.f32 %v858_v17 }
 0x379   : > { %v2203_v0 = vpop.eup %2202  ;;  %2212 = vpow2.f32 %v856_v19 }
 0x37a   : > { %v964_v4 = vsel %vm815_vm2, %v2203_v0, 0.0  ;;  %v2205_v5 = vpop.eup %2204  ;;  %2214 = vpow2.f32 %v860_v20 }
 0x37b   : > { %965 = vadd.xlane.f32.xlu0 %v964_v4  ;;  %v970_v10 = vsel %vm815_vm2, %v2205_v5, 0.0  ;;  %2216 = vpow2.f32 %v862_v22 }
 0x37c   : > { %2218 = vpow2.f32 %v864_v47 }
 0x37d   : > { %v2207_v9 = vpop.eup %2206  ;;  %2220 = vpow2.f32 %v866_v40 }
 0x37e   : > { %v967_v11 = vsel %vm815_vm2, %v2207_v9, 0.0  ;;  %v1051_v33 = vpack.c.bf16 %v2207_v9, %v2203_v0  ;;  %2222 = vpow2.f32 %v868_v57 }
 0x37f   : > { %971 = vadd.xlane.f32.xlu0 %v970_v10  ;;  %968 = vadd.xlane.f32.xlu1 %v967_v11  ;;  %2224 = vpow2.f32 %v870_v23  ;;  %v995_v10 = vld [vmem:[#allocation4 + $0x10] sm:$0xff] }
 0x380   : > { %1997 = vmatprep.mubr.msk.bf16.mxu1 %vm815_vm2, %v1051_v33  ;;  %v993_v33 = vld [vmem:[#allocation4] sm:$0xff] }
 0x381   : > { %v2209_v12 = vpop.eup %2208 }
 0x382   : > { %v973_v13 = vsel %vm815_vm2, %v2209_v12, 0.0  ;;  %v1052_v15 = vpack.c.bf16 %v2209_v12, %v2205_v5  ;;  %v2211_v39 = vpop.eup %2210  ;;  %v996_v12 = vld [vmem:[#allocation4 + $0x18] sm:$0xff] }
 0x383   : > { %974 = vadd.xlane.f32.xlu1 %v973_v13  ;;  %v2213_v42 = vpop.eup %2212  ;;  %v945_v24 = vmul.f32 %v2211_v39, %v937_v62 }
 0x384   : > { %1998 = vmatmul.mubr.msk.bf16.gmra.mrb[4].mxu1 %vm815_vm2, %v1052_v15  ;;  %v2215_v44 = vpop.eup %2214  ;;  %v944_v52 = vmul.f32 %v2213_v42, %v936_v50  ;;  %v994_v15 = vld [vmem:[#allocation4 + $0x8] sm:$0xff]  ;;  %v997_v50 = vld [vmem:[#allocation4 + $0x20] sm:$0xff] }
 0x385   : > { %v2217_v46 = vpop.eup %2216  ;;  %v946_v60 = vmul.f32 %v2215_v44, %v938_v26 }
 0x386   : > { %v2219_v45 = vpop.eup %2218  ;;  %v947_v58 = vmul.f32 %v2217_v46, %v939_v54 }
 0x387   : > { %v2221_v48 = vpop.eup %2220  ;;  %v948_v32 = vmul.f32 %v2219_v45, %v940_v29 }
 0x388   : > { %v2223_v1 = vpop.eup %2222  ;;  %v949_v35 = vmul.f32 %v2221_v48, %v941_v8 }
 0x389   : > { %v950_v36 = vmul.f32 %v2223_v1, %v942_v34  ;;  %v2225_v37 = vpop.eup %2224  ;;  %v1254_v34 = vld [vmem:[%s3138_s10 + $0x8] sm:$0xff] }
 0x38a   : > { %v951_v51 = vmul.f32 %v2225_v37, %v943_v41  ;;  %v1255_v41 = vld [vmem:[%s3138_s10 + $0x10] sm:$0xff] }
 0x394   : > { %1008 = vperm.xlu1 %2179, %v2211_v39  }
 0x395   : > { %1003 = vperm.xlu0 %2178, %v2213_v42  }
 0x398   : > { %1013 = vperm.xlu1 %2179, %v2215_v44  }
 0x399   : > { %1018 = vperm.xlu0 %2178, %v2217_v46  }
 0x39c   : > { %1023 = vperm.xlu1 %2179, %v2219_v45  }
 0x39d   : > { %1028 = vperm.xlu0 %2178, %v2221_v48  }
 0x3f8   : > { %v954_v53 = vpop.xlane.xlu1 %953 }
 0x3f9   : > { %v976_v55 = vadd.f32 %v954_v53, %v944_v52  ;;  %v998_v53 = vld [vmem:[#allocation4 + $0x28] sm:$0xff] }
 0x3fb   : > { %985 = vst.msk [vmem:[#allocation3] sm:$0xff] %vm619_vm1, %v976_v55 }
 0x3fc   : > { %v963_v63 = vpop.xlane.xlu1 %962 }
 0x3fd   : > { %v979_v2 = vadd.f32 %v963_v63, %v947_v58 }
 0x3ff   : > { %988 = vst.msk [vmem:[#allocation3 + $0x18] sm:$0xff] %vm619_vm1, %v979_v2  ;;  %v957_v25 = vpop.xlane.xlu0 %956 }
 0x400   : > { %v977_v28 = vadd.f32 %v957_v25, %v945_v24 }
 0x402   : > { %986 = vst.msk [vmem:[#allocation3 + $0x8] sm:$0xff] %vm619_vm1, %v977_v28  ;;  %v1189_v59 = vld [vmem:[#allocation3] sm:$0xff]  ;;  %v1000_v28 = vld [vmem:[#allocation4 + $0x38] sm:$0xff] }
 0x403   : > { %v960_v3 = vpop.xlane.xlu0 %959 }
 0x404   : > { %v978_v6 = vadd.f32 %v960_v3, %v946_v60 }
 0x406   : > { %987 = vst.msk [vmem:[#allocation3 + $0x10] sm:$0xff] %vm619_vm1, %v978_v6  ;;  %v1192_v16 = vld [vmem:[#allocation3 + $0x18] sm:$0xff] }
 0x407   : > { %1214 = vperm.xlu0 %2178, %v1192_v16  }
 0x408   : > { %v966_v7 = vpop.xlane.xlu0 %965 }
 0x409   : > { %v980_v18 = vadd.f32 %v966_v7, %v948_v32  ;;  %v1190_v14 = vld [vmem:[#allocation3 + $0x8] sm:$0xff]  ;;  %v999_v32 = vld [vmem:[#allocation4 + $0x30] sm:$0xff] }
 0x40b   : > { %989 = vst.msk [vmem:[#allocation3 + $0x20] sm:$0xff] %vm619_vm1, %v980_v18  ;;  %1204 = vperm.xlu0 %2178, %v1190_v14  }
 0x40c   : > { %v969_v21 = vpop.xlane.xlu1 %968  ;;  %v972_v38 = vpop.xlane.xlu0 %971 }
 0x40d   : > { %v981_v43 = vadd.f32 %v969_v21, %v949_v35  ;;  %v982_v30 = vadd.f32 %v972_v38, %v950_v36  ;;  %v1191_v49 = vld [vmem:[#allocation3 + $0x10] sm:$0xff] }
 0x40e   : > { %1209 = vperm.xlu1 %2179, %v1191_v49  }
 0x40f   : > { %990 = vst.msk [vmem:[#allocation3 + $0x28] sm:$0xff] %vm619_vm1, %v981_v43  ;;  %991 = vst.msk [vmem:[#allocation3 + $0x30] sm:$0xff] %vm619_vm1, %v982_v30  ;;  %1038 = vperm.xlu0 %2178, %v2225_v37  }
 0x410   : > { %v975_v56 = vpop.xlane.xlu1 %974 }
 0x411   : > { %v983_v27 = vadd.f32 %v975_v56, %v951_v51 }
 0x412   : > { %1199 = vperm.xlu1 %2179, %v1189_v59   ;;  %v1193_v31 = vld [vmem:[#allocation3 + $0x20] sm:$0xff] }
 0x413   : > { %992 = vst.msk [vmem:[#allocation3 + $0x38] sm:$0xff] %vm619_vm1, %v983_v27 }
 0x414   : > { %v1009_v5 = vpop.permute.xlu1 %1008  ;;  %v1004_v9 = vpop.permute.xlu0 %1003 }
 0x415   : > { %v1041_v19 = vmul.f32 %v1004_v9, %v993_v33  ;;  %v1042_v39 = vmul.f32 %v1009_v5, %v994_v15 }
 0x416   : > { %1033 = vperm.xlu1 %2179, %v2223_v1   ;;  %v1194_v61 = vld [vmem:[#allocation3 + $0x28] sm:$0xff]  ;;  %v1195_v4 = vld [vmem:[#allocation3 + $0x30] sm:$0xff] }
 0x417   : > { %1224 = vperm.xlu0 %2178, %v1194_v61  }
 0x418   : > { %v1014_v11 = vpop.permute.xlu1 %1013  ;;  %v1019_v13 = vpop.permute.xlu0 %1018 }
 0x419   : > { %v1043_v17 = vmul.f32 %v1014_v11, %v995_v10  ;;  %v1044_v22 = vmul.f32 %v1019_v13, %v996_v12  ;;  %v1256_v11 = vld [vmem:[%s3138_s10 + $0x18] sm:$0xff] }
 0x41a   : > { %1219 = vperm.xlu1 %2179, %v1193_v31   ;;  %v1196_v0 = vld [vmem:[#allocation3 + $0x38] sm:$0xff]  ;;  %v1253_v31 = vld [vmem:[%s3138_s10] sm:$0xff] }
 0x41b   : > { %1234 = vperm.xlu0 %2178, %v1196_v0  }
 0x41c   : > { %v1024_v52 = vpop.permute.xlu1 %1023  ;;  %v1029_v54 = vpop.permute.xlu0 %1028 }
 0x41d   : > { %v1045_v55 = vmul.f32 %v1024_v52, %v997_v50  ;;  %v1046_v62 = vmul.f32 %v1029_v54, %v998_v53  ;;  %v1260_v50 = vld [vmem:[%s3138_s10 + $0x38] sm:$0xff] }
 0x41e   : > { %1229 = vperm.xlu1 %2179, %v1195_v4  }
 0x447   : > { %v1995_v20 = vpop.f32.mrb[0].mxu1 }
 0x448   : > { %v1156_v47 = vadd.f32 %v1995_v20, %v1043_v17  ;;  %v1123_v40 = vpop.f32.mrb[1].mxu1  ;;  %v1258_v20 = vld [vmem:[%s3138_s10 + $0x28] sm:$0xff] }
 0x449   : > { %v1154_v42 = vadd.f32 %v1123_v40, %v1041_v19  ;;  %v1996_v44 = vpop.f32.mrb[2].mxu1  ;;  %v1257_v40 = vld [vmem:[%s3138_s10 + $0x20] sm:$0xff] }
 0x44a   : > { %1164 = vst.msk [vmem:[#allocation4 + $0x10] sm:$0xff] %vm636_vm0, %v1156_v47  ;;  %v1157_v46 = vadd.f32 %v1996_v44, %v1044_v22  ;;  %v1126_v45 = vpop.f32.mrb[3].mxu1 }
 0x44b   : > { %1162 = vst.msk [vmem:[#allocation4] sm:$0xff] %vm636_vm0, %v1154_v42  ;;  %v1155_v48 = vadd.f32 %v1126_v45, %v1042_v39 }
 0x44c   : > { %1165 = vst.msk [vmem:[#allocation4 + $0x18] sm:$0xff] %vm636_vm0, %v1157_v46 }
 0x44d   : > { %1163 = vst.msk [vmem:[#allocation4 + $0x8] sm:$0xff] %vm636_vm0, %v1155_v48 }
 0x451   : > { %v1183_v38 = vld [vmem:[#allocation4 + $0x10] sm:$0xff] }
 0x452   : > { %v1181_v61 = vld [vmem:[#allocation4] sm:$0xff] }
 0x453   : > { %v1184_v0 = vld [vmem:[#allocation4 + $0x18] sm:$0xff] }
 0x454   : > { %v1182_v8 = vld [vmem:[#allocation4 + $0x8] sm:$0xff] }
 0x457   : > { %v1999_v57 = vpop.f32.mrb[4].mxu1 }
 0x458   : > { %v1139_v58 = vpop.f32.mrb[5].mxu1 }
 0x459   : > { %v1158_v63 = vadd.f32 %v1139_v58, %v1045_v55  ;;  %v2000_v2 = vpop.f32.mrb[6].mxu1  ;;  %v1259_v55 = vld [vmem:[%s3138_s10 + $0x30] sm:$0xff] }
 0x45a   : > { %v1142_v23 = vpop.f32.mrb[7].mxu1 }
 0x45b   : > { %1166 = vst.msk [vmem:[#allocation4 + $0x20] sm:$0xff] %vm636_vm0, %v1158_v63  ;;  %v1159_v24 = vadd.f32 %v1142_v23, %v1046_v62 }
 0x45d   : > { %1167 = vst.msk [vmem:[#allocation4 + $0x28] sm:$0xff] %vm636_vm0, %v1159_v24 }
 0x462   : > { %v1185_v47 = vld [vmem:[#allocation4 + $0x20] sm:$0xff] }
 0x464   : > { %v1186_v17 = vld [vmem:[#allocation4 + $0x28] sm:$0xff] }
 0x486   : > { %v1215_v25 = vpop.permute.xlu0 %1214 }
 0x48a   : > { %v1205_v26 = vpop.permute.xlu0 %1204 }
 0x48b   : > { %2226 = vrcp.f32 %v1205_v26 }
 0x48d   : > { %v1210_v60 = vpop.permute.xlu1 %1209 }
 0x48e   : > { %2228 = vrcp.f32 %v1210_v60  ;;  %v1039_v3 = vpop.permute.xlu0 %1038 }
 0x48f   : > { %v1048_v6 = vmul.f32 %v1039_v3, %v1000_v28  ;;  %2230 = vrcp.f32 %v1215_v25 }
 0x491   : > { %v1161_v29 = vadd.f32 %v2000_v2, %v1048_v6  ;;  %v1200_v16 = vpop.permute.xlu1 %1199 }
 0x492   : > { %2232 = vrcp.f32 %v1200_v16 }
 0x493   : > { %1169 = vst.msk [vmem:[#allocation4 + $0x38] sm:$0xff] %vm636_vm0, %v1161_v29 }
 0x495   : > { %v2227_v1 = vpop.eup %2226  ;;  %v1034_v7 = vpop.permute.xlu1 %1033 }
 0x496   : > { %v1047_v18 = vmul.f32 %v1034_v7, %v999_v32  ;;  %v1225_v14 = vpop.permute.xlu0 %1224  ;;  %v1240_v35 = vmul.f32 %v2227_v1, %v1182_v8 }
 0x497   : > { %2234 = vrcp.f32 %v1225_v14 }
 0x498   : > { %v2229_v36 = vpop.eup %2228  ;;  %v1160_v37 = vadd.f32 %v1999_v57, %v1047_v18  ;;  %v3380_v21 = vadd.f32 %v1254_v34, %v1240_v35 }
 0x499   : > { %v1220_v43 = vpop.permute.xlu1 %1219  ;;  %v1242_v30 = vmul.f32 %v2229_v36, %v1183_v38  ;;  %v2231_v49 = vpop.eup %2230 }
 0x49a   : > { %1168 = vst.msk [vmem:[#allocation4 + $0x30] sm:$0xff] %vm636_vm0, %v1160_v37  ;;  %2236 = vrcp.f32 %v1220_v43  ;;  %v1235_v51 = vpop.permute.xlu0 %1234  ;;  %v1272_v56 = vsel %vm636_vm0, %v3380_v21, 0.0  ;;  %v1244_v10 = vmul.f32 %v2231_v49, %v1184_v0  ;;  %v1188_v45 = vld [vmem:[#allocation4 + $0x38] sm:$0xff] }
 0x49b   : > { %2238 = vrcp.f32 %v1235_v51  ;;  %1273 = vadd.xlane.f32.xlu0 %v1272_v56  ;;  %v3386_v27 = vadd.f32 %v1255_v41, %v1242_v30 }
 0x49c   : > { %v2233_v59 = vpop.eup %2232  ;;  %v3396_v15 = vadd.f32 %v1256_v11, %v1244_v10 }
 0x49d   : > { %v1230_v4 = vpop.permute.xlu1 %1229  ;;  %v1275_v5 = vsel %vm636_vm0, %v3386_v27, 0.0  ;;  %v1238_v9 = vmul.f32 %v2233_v59, %v1181_v61 }
 0x49e   : > { %2240 = vrcp.f32 %v1230_v4  ;;  %v1278_v42 = vsel %vm636_vm0, %v3396_v15, 0.0 }
 0x49f   : > { %1276 = vadd.xlane.f32.xlu0 %v1275_v5  ;;  %v3392_v33 = vadd.f32 %v1253_v31, %v1238_v9 }
 0x4a1   : > { %v2235_v12 = vpop.eup %2234  ;;  %v1269_v13 = vsel %vm636_vm0, %v3392_v33, 0.0  ;;  %v1187_v54 = vld [vmem:[#allocation4 + $0x30] sm:$0xff] }
 0x4a2   : > { %1270 = vadd.xlane.f32.xlu1 %v1269_v13  ;;  %v1248_v19 = vmul.f32 %v2235_v12, %v1186_v17 }
 0x4a4   : > { %v2237_v22 = vpop.eup %2236  ;;  %v3402_v44 = vadd.f32 %v1258_v20, %v1248_v19 }
 0x4a5   : > { %v2239_v39 = vpop.eup %2238  ;;  %v1246_v46 = vmul.f32 %v2237_v22, %v1185_v47  ;;  %v2192_v47 = vld [vmem:[#allocation16] sm:$0xff]  }
 0x4a6   : > { %1279 = vadd.xlane.f32.xlu1 %v1278_v42  ;;  %v1252_v48 = vmul.f32 %v2239_v39, %v1188_v45  ;;  %v1284_v57 = vsel %vm636_vm0, %v3402_v44, 0.0  ;;  %2001 = vmatprep.subr.bf16.mxu1 %v2192_v47 }
 0x4a7   : > { %v3405_v52 = vadd.f32 %v1257_v40, %v1246_v46  ;;  %2002 = vmatpush3.bf16.msra.mxu1 %v2192_v47  ;;  %v2193_v40 = vld [vmem:[#allocation16 + $0x8] sm:$0xff]  }
 0x4a8   : > { %v2241_v53 = vpop.eup %2240  ;;  %v3412_v62 = vadd.f32 %v1260_v50, %v1252_v48  ;;  %2003 = vmatprep.subr.bf16.mxu1 %v2193_v40 }
 0x4a9   : > { %v1281_v58 = vsel %vm636_vm0, %v3405_v52, 0.0  ;;  %v1250_v63 = vmul.f32 %v2241_v53, %v1187_v54 }
 0x4aa   : > { %1285 = vadd.xlane.f32.xlu1 %v1284_v57  ;;  %1282 = vadd.xlane.f32.xlu0 %v1281_v58  ;;  %v1290_v23 = vsel %vm636_vm0, %v3412_v62, 0.0 }
 0x4ab   : > { %v3414_v2 = vadd.f32 %v1259_v55, %v1250_v63  ;;  %2004 = vmatpush3.bf16.msra.mxu1 %v2193_v40 }
 0x4ad   : > { %v1287_v24 = vsel %vm636_vm0, %v3414_v2, 0.0 }
 0x4ae   : > { %1291 = vadd.xlane.f32.xlu1 %v1290_v23  ;;  %1288 = vadd.xlane.f32.xlu0 %v1287_v24 }
 0x528   : > { %v1274_v25 = vpop.xlane.xlu0 %1273 }
 0x529   : > { %v1295_v26 = vmul.f32 0.03125, %v1274_v25 }
 0x52b   : > { %v3421_v28 = vsub.f32 %v3380_v21, %v1295_v26 }
 0x52c   : > { %v1277_v60 = vpop.xlane.xlu0 %1276 }
 0x52d   : > { %v1311_v3 = vmul.f32 %v3421_v28, %v3421_v28  ;;  %v1296_v6 = vmul.f32 0.03125, %v1277_v60 }
 0x52f   : > { %v1271_v29 = vpop.xlane.xlu1 %1270  ;;  %v1321_v16 = vsel %vm636_vm0, %v1311_v3, 0.0  ;;  %v3427_v1 = vsub.f32 %v3386_v27, %v1296_v6 }
 0x530   : > { %v1294_v32 = vmul.f32 0.03125, %v1271_v29  ;;  %1322 = vadd.xlane.f32.xlu1 %v1321_v16 }
 0x531   : > { %v1312_v36 = vmul.f32 %v3427_v1, %v3427_v1 }
 0x532   : > { %v3430_v7 = vsub.f32 %v3392_v33, %v1294_v32 }
 0x533   : > { %v1280_v8 = vpop.xlane.xlu1 %1279  ;;  %v1324_v56 = vsel %vm636_vm0, %v1312_v36, 0.0 }
 0x534   : > { %v1297_v34 = vmul.f32 0.03125, %v1280_v8  ;;  %v1310_v18 = vmul.f32 %v3430_v7, %v3430_v7  ;;  %v1918_v8 = vld [vmem:[#allocation13] ss:$0 sm:$0xff] }
 0x536   : > { %v3435_v14 = vsub.f32 %v3396_v15, %v1297_v34  ;;  %v1318_v35 = vsel %vm636_vm0, %v1310_v18, 0.0 }
 0x537   : > { %v1283_v37 = vpop.xlane.xlu0 %1282  ;;  %1319 = vadd.xlane.f32.xlu0 %v1318_v35  ;;  %v1286_v38 = vpop.xlane.xlu1 %1285 }
 0x538   : > { %v1298_v41 = vmul.f32 0.03125, %v1283_v37  ;;  %v1299_v43 = vmul.f32 0.03125, %v1286_v38  ;;  %v1313_v30 = vmul.f32 %v3435_v14, %v3435_v14 }
 0x53a   : > { %v3443_v49 = vsub.f32 %v3405_v52, %v1298_v41  ;;  %v3446_v51 = vsub.f32 %v3402_v44, %v1299_v43  ;;  %v1327_v59 = vsel %vm636_vm0, %v1313_v30, 0.0  ;;  %v1919_v43 = vld [vmem:[#allocation14] ss:$0 sm:$0xff] }
 0x53b   : > { %v1289_v61 = vpop.xlane.xlu0 %1288  ;;  %1325 = vadd.xlane.f32.xlu0 %v1324_v56  ;;  %1328 = vadd.xlane.f32.xlu1 %v1327_v59  ;;  %v1292_v31 = vpop.xlane.xlu1 %1291 }
 0x53c   : > { %v1300_v0 = vmul.f32 0.03125, %v1289_v61  ;;  %v1301_v4 = vmul.f32 0.03125, %v1292_v31  ;;  %v1314_v5 = vmul.f32 %v3443_v49, %v3443_v49  ;;  %v1315_v9 = vmul.f32 %v3446_v51, %v3446_v51 }
 0x53e   : > { %v3455_v10 = vsub.f32 %v3414_v2, %v1300_v0  ;;  %v3458_v11 = vsub.f32 %v3412_v62, %v1301_v4  ;;  %v1330_v12 = vsel %vm636_vm0, %v1314_v5, 0.0  ;;  %v1333_v13 = vsel %vm636_vm0, %v1315_v9, 0.0 }
 0x53f   : > { %1331 = vadd.xlane.f32.xlu0 %v1330_v12  ;;  %1334 = vadd.xlane.f32.xlu1 %v1333_v13 }
 0x540   : > { %v1316_v17 = vmul.f32 %v3455_v10, %v3455_v10  ;;  %v1317_v19 = vmul.f32 %v3458_v11, %v3458_v11 }
 0x542   : > { %v1336_v20 = vsel %vm636_vm0, %v1316_v17, 0.0  ;;  %v1339_v22 = vsel %vm636_vm0, %v1317_v19, 0.0 }
 0x543   : > { %1337 = vadd.xlane.f32.xlu0 %v1336_v20  ;;  %1340 = vadd.xlane.f32.xlu1 %v1339_v22 }
 0x5bd   : > { %v1323_v39 = vpop.xlane.xlu1 %1322 }
 0x5be   : > { %v1343_v42 = vmul.f32 0.03125, %v1323_v39 }
 0x5c0   : > { %v1351_v46 = vadd.f32 1e-05, %v1343_v42 }
 0x5c2   : > { %2242 = vrsqrt.f32 %v1351_v46 }
 0x5c4   : > { %v1320_v45 = vpop.xlane.xlu0 %1319 }
 0x5c5   : > { %v1342_v48 = vmul.f32 0.03125, %v1320_v45 }
 0x5c7   : > { %v1350_v50 = vadd.f32 1e-05, %v1342_v48 }
 0x5c8   : > { %v1326_v53 = vpop.xlane.xlu0 %1325  ;;  %v1329_v54 = vpop.xlane.xlu1 %1328 }
 0x5c9   : > { %2244 = vrsqrt.f32 %v1350_v50  ;;  %v1344_v55 = vmul.f32 0.03125, %v1326_v53  ;;  %v1345_v57 = vmul.f32 0.03125, %v1329_v54 }
 0x5cb   : > { %v1352_v58 = vadd.f32 1e-05, %v1344_v55  ;;  %v1353_v63 = vadd.f32 1e-05, %v1345_v57  ;;  %v1520_v55 = vld [vmem:[#allocation19] sm:$0xf] }
 0x5cc   : > { %v1332_v23 = vpop.xlane.xlu0 %1331  ;;  %v1335_v24 = vpop.xlane.xlu1 %1334  ;;  %2029 = vmatprep.subr.msk.bf16.mxu0 %vm1541_vm3, %v1520_v55  ;;  %2030 = vmatprep.subr.msk.bf16.mxu1 %vm1541_vm3, %v1520_v55 }
 0x5cd   : > { %v2243_v25 = vpop.eup %2242  ;;  %2246 = vrsqrt.f32 %v1352_v58  ;;  %v1346_v26 = vmul.f32 0.03125, %v1332_v23  ;;  %v1347_v60 = vmul.f32 0.03125, %v1335_v24 }
 0x5ce   : > { %2248 = vrsqrt.f32 %v1353_v63  ;;  %v1367_v29 = vmul.f32 %v2243_v25, %v3421_v28 }
 0x5cf   : > { %v1354_v3 = vadd.f32 1e-05, %v1346_v26  ;;  %v1355_v6 = vadd.f32 1e-05, %v1347_v60 }
 0x5d0   : > { %v1338_v16 = vpop.xlane.xlu0 %1337  ;;  %v1341_v32 = vpop.xlane.xlu1 %1340  ;;  %v1382_v41 = vmul.f32 %v1918_v8, %v1367_v29 }
 0x5d1   : > { %2250 = vrsqrt.f32 %v1354_v3  ;;  %v1348_v34 = vmul.f32 0.03125, %v1338_v16  ;;  %v1349_v18 = vmul.f32 0.03125, %v1341_v32 }
 0x5d2   : > { %2252 = vrsqrt.f32 %v1355_v6  ;;  %v1397_v31 = vadd.f32 %v1919_v43, %v1382_v41 }
 0x5d3   : > { %v2245_v35 = vpop.eup %2244  ;;  %v1356_v36 = vadd.f32 1e-05, %v1348_v34  ;;  %v1357_v37 = vadd.f32 1e-05, %v1349_v18 }
 0x5d4   : > { %v1366_v38 = vmul.f32 %v2245_v35, %v3430_v7 }
 0x5d5   : > { %2254 = vrsqrt.f32 %v1356_v36 }
 0x5d6   : > { %2256 = vrsqrt.f32 %v1357_v37  ;;  %v1381_v30 = vmul.f32 %v1918_v8, %v1366_v38 }
 0x5d7   : > { %v2247_v56 = vpop.eup %2246 }
 0x5d8   : > { %v2249_v59 = vpop.eup %2248  ;;  %v1368_v28 = vmul.f32 %v2247_v56, %v3427_v1  ;;  %v1396_v61 = vadd.f32 %v1919_v43, %v1381_v30 }
 0x5d9   : > { %v1369_v0 = vmul.f32 %v2249_v59, %v3435_v14 }
 0x5da   : > { %v1383_v4 = vmul.f32 %v1918_v8, %v1368_v28  ;;  %v1404_v5 = vpack.c.bf16 %v1397_v31, %v1396_v61 }
 0x5db   : > { %v2251_v9 = vpop.eup %2250  ;;  %v1384_v12 = vmul.f32 %v1918_v8, %v1369_v0  ;;  %v1927_v0 = vld [vmem:[#allocation20] ss:$0 sm:$0xff] }
 0x5dc   : > { %v2253_v13 = vpop.eup %2252  ;;  %v1398_v17 = vadd.f32 %v1919_v43, %v1383_v4  ;;  %v1370_v7 = vmul.f32 %v2251_v9, %v3443_v49  ;;  %2005 = vmatprep.mubr.msk.bf16.mxu1 %vm636_vm0, %v1404_v5 }
 0x5dd   : > { %v1399_v19 = vadd.f32 %v1919_v43, %v1384_v12  ;;  %v1371_v20 = vmul.f32 %v2253_v13, %v3446_v51 }
 0x5de   : > { %v1385_v22 = vmul.f32 %v1918_v8, %v1370_v7 }
 0x5df   : > { %v2255_v47 = vpop.eup %2254  ;;  %v1405_v1 = vpack.c.bf16 %v1399_v19, %v1398_v17  ;;  %v1386_v40 = vmul.f32 %v1918_v8, %v1371_v20 }
 0x5e0   : > { %v2257_v39 = vpop.eup %2256  ;;  %v1372_v14 = vmul.f32 %v2255_v47, %v3455_v10  ;;  %v1400_v42 = vadd.f32 %v1919_v43, %v1385_v22  ;;  %v1543_v10 = vsel %vm1541_vm3, %v1520_v55, 0 }
 0x5e1   : > { %v1373_v46 = vmul.f32 %v2257_v39, %v3458_v11  ;;  %2006 = vmatmul.mubr.msk.bf16.vlgmr.msra.gmra.mrb[8].mxu1 %vm636_vm0, %v1405_v1  ;;  %v1401_v45 = vadd.f32 %v1919_v43, %v1386_v40  ;;  %2014 = vmatpush3.bf16.msra.mxu0 %v1543_v10  ;;  %v1920_v11 = vld [vmem:[#allocation17] ss:$0 sm:$0xff] }
 0x5e2   : > { %v1387_v48 = vmul.f32 %v1918_v8, %v1372_v14  ;;  %2024 = vmatpush3.bf16.msra.mxu1 %v1543_v10 }
 0x5e3   : > { %v1406_v49 = vpack.c.bf16 %v1401_v45, %v1400_v42  ;;  %v1388_v50 = vmul.f32 %v1918_v8, %v1373_v46 }
 0x5e4   : > { %v1402_v53 = vadd.f32 %v1919_v43, %v1387_v48 }
 0x5e5   : > { %2009 = vmatprep.mubr.msk.bf16.mxu1 %vm636_vm0, %v1406_v49  ;;  %v1403_v51 = vadd.f32 %v1919_v43, %v1388_v50 }
 0x5e7   : > { %v1407_v54 = vpack.c.bf16 %v1403_v51, %v1402_v53 }
 0x5e9   : > { %2010 = vmatmul.mubr.msk.bf16.gmra.mrb[12].mxu1 %vm636_vm0, %v1407_v54 }
 0x6b4   : > { %v2007_v57 = vpop.f32.mrb[8].mxu1 }
 0x6b5   : > { %v1486_v58 = vadd.f32 %v2007_v57, %v1920_v11  ;;  %v1477_v63 = vpop.f32.mrb[9].mxu1 }
 0x6b6   : > { %v1478_v23 = vadd.f32 %v1920_v11, %v1477_v63  ;;  %v2008_v24 = vpop.f32.mrb[10].mxu1 }
 0x6b7   : > { %v1489_v25 = vadd.f32 %v2008_v24, %v1920_v11  ;;  %v1480_v26 = vpop.f32.mrb[11].mxu1  ;;  %v1510_v3 = vmax.f32 %v1486_v58, 0.0 }
 0x6b8   : > { %v1481_v60 = vadd.f32 %v1920_v11, %v1480_v26  ;;  %v1508_v29 = vmax.f32 %v1478_v23, 0.0 }
 0x6b9   : > { %v1511_v6 = vmax.f32 %v1489_v25, 0.0 }
 0x6ba   : > { %v1509_v16 = vmax.f32 %v1481_v60, 0.0 }
 0x6bb   : > { %v1517_v32 = vpack.c.bf16 %v1511_v6, %v1510_v3 }
 0x6bc   : > { %v1516_v8 = vpack.c.bf16 %v1509_v16, %v1508_v29  ;;  %v2011_v34 = vpop.f32.mrb[12].mxu1 }
 0x6bd   : > { %v1502_v18 = vadd.f32 %v2011_v34, %v1920_v11  ;;  %v1493_v35 = vpop.f32.mrb[13].mxu1 }
 0x6be   : > { %v1494_v36 = vadd.f32 %v1920_v11, %v1493_v35  ;;  %v2012_v37 = vpop.f32.mrb[14].mxu1  ;;  %2015 = vmatprep.mubr.msk.bf16.mxu0 %vm1528_vm4, %v1516_v8 }
 0x6bf   : > { %v1505_v38 = vadd.f32 %v2012_v37, %v1920_v11  ;;  %v1496_v41 = vpop.f32.mrb[15].mxu1  ;;  %2016 = vmatmul.mubr.msk.bf16.vlgmr.msra.gmra.mrb[8].mxu0 %vm1528_vm4, %v1517_v32  ;;  %v1514_v30 = vmax.f32 %v1502_v18, 0.0 }
 0x6c0   : > { %v1497_v43 = vadd.f32 %v1920_v11, %v1496_v41  ;;  %v1512_v59 = vmax.f32 %v1494_v36, 0.0 }
 0x6c1   : > { %v1515_v56 = vmax.f32 %v1505_v38, 0.0 }
 0x6c2   : > { %v1513_v28 = vmax.f32 %v1497_v43, 0.0 }
 0x6c3   : > { %v1519_v61 = vpack.c.bf16 %v1515_v56, %v1514_v30 }
 0x6c4   : > { %v1518_v31 = vpack.c.bf16 %v1513_v28, %v1512_v59 }
 0x6c6   : > { %2019 = vmatprep.mubr.msk.bf16.mxu1 %vm1528_vm4, %v1518_v31 }
 0x6c7   : > { %2020 = vmatmul.mubr.msk.bf16.vlgmr.msra.gmra.mrb[16].mxu1 %vm1528_vm4, %v1519_v61 }
 0x792   : > { %v2017_v4 = vpop.f32.mrb[8].mxu0 }
 0x793   : > { %v1588_v5 = vadd.f32 %v2017_v4, %v1927_v0  ;;  %v1579_v9 = vpop.f32.mrb[9].mxu0 }
 0x794   : > { %v1580_v12 = vadd.f32 %v1927_v0, %v1579_v9  ;;  %v2018_v13 = vpop.f32.mrb[10].mxu0 }
 0x795   : > { %v1612_v17 = vadd.f32 %v1588_v5, %v3386_v27  ;;  %v1591_v7 = vadd.f32 %v2018_v13, %v1927_v0  ;;  %v1582_v19 = vpop.f32.mrb[11].mxu0 }
 0x796   : > { %v1610_v20 = vadd.f32 %v1580_v12, %v3392_v33  ;;  %v1583_v22 = vadd.f32 %v1927_v0, %v1582_v19 }
 0x797   : > { %1620 = vst.msk [vmem:[%s608_s27 + $0x10] sm:$0xff] %vm636_vm0, %v1612_v17  ;;  %v1613_v47 = vadd.f32 %v1591_v7, %v3396_v15 }
 0x798   : > { %1618 = vst.msk [vmem:[%s608_s27] sm:$0xff] %vm636_vm0, %v1610_v20  ;;  %v1611_v1 = vadd.f32 %v1583_v22, %v3380_v21 }
 0x799   : > { %1621 = vst.msk [vmem:[%s608_s27 + $0x18] sm:$0xff] %vm636_vm0, %v1613_v47 }
 0x79a   : > { %1619 = vst.msk [vmem:[%s608_s27 + $0x8] sm:$0xff] %vm636_vm0, %v1611_v1  ;;  %v2021_v27 = vpop.f32.mrb[16].mxu1 }
 0x79b   : > { %v1604_v40 = vadd.f32 %v2021_v27, %v1927_v0  ;;  %v1595_v39 = vpop.f32.mrb[17].mxu1 }
 0x79c   : > { %v1596_v14 = vadd.f32 %v1927_v0, %v1595_v39  ;;  %v2022_v33 = vpop.f32.mrb[18].mxu1 }
 0x79d   : > { %v1616_v42 = vadd.f32 %v1604_v40, %v3414_v2  ;;  %v1607_v15 = vadd.f32 %v2022_v33, %v1927_v0  ;;  %v1598_v46 = vpop.f32.mrb[19].mxu1 }
 0x79e   : > { %v1614_v45 = vadd.f32 %v1596_v14, %v3405_v52  ;;  %v1599_v21 = vadd.f32 %v1927_v0, %v1598_v46 }
 0x79f   : > { %1624 = vst.msk [vmem:[%s608_s27 + $0x30] sm:$0xff] %vm636_vm0, %v1616_v42  ;;  %v1617_v48 = vadd.f32 %v1607_v15, %v3412_v62 }
 0x7a0   : > { %1622 = vst.msk [vmem:[%s608_s27 + $0x20] sm:$0xff] %vm636_vm0, %v1614_v45  ;;  %v1615_v2 = vadd.f32 %v1599_v21, %v3402_v44 }
 0x7a1   : > { %1625 = vst.msk [vmem:[%s608_s27 + $0x38] sm:$0xff] %vm636_vm0, %v1617_v48 }
 0x7a2   : > { %1623 = vst.msk [vmem:[%s608_s27 + $0x28] sm:$0xff] %vm636_vm0, %v1615_v2 }
 0x7a3   : > { %2559 = shalt.err (!%p2556_p8)
}
 0x7a4   : > { %s2560_s12 = scalar_lea.hbm %s3502_s15, 1024  ;;  %s2564_s25 = scalar_lea.hbm %s3645_s4, 2048 }
 0x7a5   : > { %p2561_p1 = scmp.ne.s32.totalorder %s3502_s15, %s2560_s12  ;;  %p2565_p5 = scmp.lt.u32.totalorder %s3502_s15, %s3645_s4 }
 0x7a6   : > { %p2566_p0 = scmp.lt.u32.totalorder %s2564_s25, %s2560_s12  ;;  %p2568_p10 = scmp.lt.u32.totalorder %s2560_s12, %s3502_s15 }
 0x7a7   : > { %p2562_p6 = pnand %p2561_p1, %p3646_p4 }
 0x7a8   : > { %p2567_p7 = por %p2566_p0, %p2565_p5 }
 0x7a9   : > { %p2563_p2 = pneg %p2562_p6 }
 0x7aa   : > { %p2569_p12 = por %p2568_p10, %p2567_p7 }
 0x7ac   : > { %p2570_p13 = pnand %p2569_p12, %p2563_p2 }
 0x7ae   : > { %2573 = shalt.err (!%p2570_p13)
}
 0x7af   : > { %s2672_s22 = smov 128   ;;  %s2673_s10 = smov 8  }
 0x7b0   : > { %2063 = dma.vmem_to_hbm [thread:$0]  (%p3646_p4), %s3504_s7, 1024, %s3502_s15, %s1627_s5, %s2672_s22, %s2672_s22, %s2673_s10  }
 0x7b1 PF: > { %s3647_s24 = sld [smem:[#allocation31_spill]]  ;;  %s3648_s27 = sld [smem:[#allocation41_spill]] }
 0x7b2   : > { %p3650_p3 = scmp.ge.s32.totalorder %s2652_s18, 2 }
 0x7b7   : > { %s1657_s29 = sand.u32 1, %s3647_s24   ;;  %p3649_p11 = scmp.ne.s32.totalorder %s3648_s27, 0 }
 0x7b8   : > { %s1658_s16 = scalar_lea.sflag [#allocation7], %s1657_s29 }
 0x7b9   : > { %p2098_p9 = pnand %p3650_p3, %p3649_p11 }
 0x7bb   : > { %2627 = dma.done.wait (!%p2098_p9), %s1658_s16, 1024  }
 0x7bc   : > { %2629 = vsyncadd (!%p2098_p9), %s1658_s16, 4294966272  ;;  %s35_s18 = sadd.s32 1, %s2652_s18   ;;  %s3651_s13 = sld [smem:[#allocation32_spill]] }
 0x7bd   : > { %p32_p8 = scmp.ge.s32.totalorder %s35_s18, 4   ;;  %s3652_s14 = sld [smem:[#allocation33_spill]] }
 0x7be   : > { %s3653_s15 = sld [smem:[#allocation40_spill]]  ;;  %s3654_s21 = sld [smem:[#allocation37_spill]] }
 0x7bf   : > { %s3655_s16 = smov %s2648_s17  ;;  %34 = sbr.rel (!%p32_p8) target bundleno = 19 (0x13), region = 174 }
 0x7c4   : > { %s3656_s17 = smov %s3654_s21 }
 0x7c6   :  { %1663 = vsyncpa [#allocation6], 1 }
 0x7c7   :  { %1665 = vsyncpa [#allocation6 + $0x1], 1 }
 0x7c8   :  { %1666 = vsyncpa [#allocation9], 1 }
 0x7c9   :  { %1668 = vsyncpa [#allocation9 + $0x1], 1 }
 0x7ca   :  { %1669 = vsyncpa [#allocation12], 1 }
 0x7cb   :  { %1671 = vsyncpa [#allocation12 + $0x1], 1 }
 0x7cc   :  { %1672 = vsyncpa [#allocation15], 1 }
 0x7cd   :  { %1673 = vsyncpa [#allocation18], 1 }
 0x7ce   :  { %1674 = vsyncpa [#allocation21], 1 }
 0x7cf   :  { %1675 = vsyncpa [#allocation7], 1 }
 0x7d0   :  { %1677 = vsyncpa [#allocation7 + $0x1], 1 }

// kernel: adapter_block_v6_forward.11
= control target key start
LH: loop header
LB: loop body
LE: loop exit
PB: predicated region body
PF: predicated region fallthrough
CT: control target
= control target key end

     0   :  { %s2206_s0 = inlined_call_operand.hbm [shape: s32[2,1,32], index: 0, kind: input, shape index: {}]   ;;  %s2207_s1 = inlined_call_operand.hbm [shape: f32[2,64,32], index: 1, kind: input, shape index: {}]   ;;  %s2208_s2 = inlined_call_operand.hbm [shape: f32[2,64,32], index: 2, kind: input, shape index: {}]   ;;  %s2209_s3 = inlined_call_operand.hbm [shape: bf16[32,8], index: 3, kind: input, shape index: {}]   ;;  %s2210_s4 = inlined_call_operand.hbm [shape: f32[1,8], index: 4, kind: input, shape index: {}]   ;;  %s2211_s5 = inlined_call_operand.hbm [shape: bf16[8,32], index: 5, kind: input, shape index: {}]   ;;  %s2212_s6 = inlined_call_operand.hbm [shape: f32[1,32], index: 6, kind: input, shape index: {}]   ;;  %s2213_s7 = inlined_call_operand.hbm [shape: f32[2,64,32], index: 7, kind: output, shape index: {}]  }
   0x1   :  { %2242 = sst [smem:[#allocation34_spill]] %s2206_s0 }
   0x2   :  { %2243 = sst [smem:[#allocation35_spill]] %s2207_s1 }
   0x3   :  { %2244 = sst [smem:[#allocation36_spill]] %s2209_s3 }
   0x4   :  { %2245 = sst [smem:[#allocation37_spill]] %s2211_s5 }
   0x5   :  { %2246 = sst [smem:[#allocation38_spill]] %s2213_s7 }
   0x6   :  { %12 = vsyncpa [#allocation5], 0 }
   0x7   :  { %14 = vsyncpa [#allocation5 + $0x1], 0 }
   0x8   :  { %15 = vsyncpa [#allocation8], 0 }
   0x9   :  { %17 = vsyncpa [#allocation8 + $0x1], 0 }
   0xa   :  { %18 = vsyncpa [#allocation11], 0 }
   0xb   :  { %19 = vsyncpa [#allocation14], 0 }
   0xc   :  { %20 = vsyncpa [#allocation6], 0 }
   0xd   :  { %22 = vsyncpa [#allocation6 + $0x1], 0  ;;  %s1724_s24 = smov 0   ;;  %s1726_s25 = smov 0  }
   0xe   :  { %s1728_s26 = smov 0   ;;  %s1730_s27 = smov 0  }
   0xf   :  { %s1732_s28 = smov 0   ;;  %s1734_s29 = smov 0  }
  0x10   :  { %s1736_s30 = smov 0   ;;  %s1738_s8 = smov 0  }
  0x11   :  { %s1740_s9 = smov 0   ;;  %s1742_s10 = smov 0  }
  0x12   :  { %s1744_s11 = smov 0  }
  0x13 LB: > { %2247 = sst [smem:[#allocation22_spill]] %s1627_s24  ;;  %s1780_s12 = sadd.s32 4294967295, %s1667_s11   ;;  %s1667_s11 = sphi %s1744_s11, %s28_s11   ;;  %s1663_s10 = sphi %s1742_s10, %s2315_s10   ;;  %s1659_s9 = sphi %s1740_s9, %s2307_s9   ;;  %s1655_s8 = sphi %s1738_s8, %s2314_s8   ;;  %s1651_s30 = sphi %s1736_s30, %s2306_s30   ;;  %s1647_s29 = sphi %s1734_s29, %s2313_s29   ;;  %s1643_s28 = sphi %s1732_s28, %s2312_s28   ;;  %s1639_s27 = sphi %s1730_s27, %s2311_s27   ;;  %s1635_s26 = sphi %s1728_s26, %s2310_s26   ;;  %s1631_s25 = sphi %s1726_s25, %s2309_s25   ;;  %s1627_s24 = sphi %s1724_s24, %s2305_s24  }
  0x14   : > { %2248 = sst [smem:[#allocation23_spill]] %s1631_s25  ;;  %p1050_p0 = scmp.ge.s32.totalorder %s1667_s11, 1 }
  0x15   : > { %2249 = sst [smem:[#allocation24_spill]] %s1651_s30  ;;  %p2215_p1 = scmp.eq.s32.totalorder %s1780_s12, 0 }
  0x16   : > { %2250 = sst [smem:[#allocation25_spill]] %s1655_s8  ;;  %p239_p3 = scmp.lt.s32.totalorder %s1667_s11, 5 }
  0x17   : > { %2251 = sst [smem:[#allocation26_spill]] %s1659_s9  ;;  %s1669_s14 = smov [#allocation10]  }
  0x18   : > { %2252 = sst [smem:[#allocation27_spill]] %s1780_s12  ;;  %p1786_p4 = pnand %p1050_p0, %p239_p3 }
  0x19   : > { %s251_s15 = sshll.u32 %s1669_s14, 4  ;;  %s1670_s17 = smov [#allocation13]   ;;  %s252_s15 = int_to_ptr.vmem [resolvable:$true] %s251_s15 }
  0x1a   : > { %s2253_s13 = scalar_select %p1786_p4, 1, 0 }
  0x1b   : > { %p1191_p5 = pneg %p1786_p4  ;;  %s276_s18 = sshll.u32 %s1670_s17, 4  ;;  %s1798_s18 = int_to_ptr.vmem [resolvable:$true] %s276_s18 }
  0x1c   : > { %2254 = sst [smem:[#allocation28_spill]] %s2253_s13  ;;  %s2256_s3 = sld [smem:[#allocation36_spill]] }
  0x1d   : > { %p1794_p6 = pnand %p1191_p5, %p2215_p1 }
  0x1f   : > { %s2255_s16 = scalar_select %p1794_p6, 1, 0 }
  0x20   : > { %p1808_p8 = pneg %p1794_p6 }
  0x22   : > { %s1331_s21 = scalar_lea.hbm %s2256_s3, 256 }
  0x23   : > { %p1332_p7 = scmp.ne.s32.totalorder %s2256_s3, %s1331_s21  ;;  %p1338_p11 = scmp.lt.u32.totalorder %s1331_s21, %s2256_s3 }
  0x25   : > { %p1334_p9 = pnand %p1808_p8, %p1332_p7 }
  0x27   : > { %p1335_p10 = pneg %p1334_p9 }
  0x29   : > { %p1340_p12 = pnand %p1338_p11, %p1335_p10 }
  0x2b   : > { %1343 = shalt.err (!%p1340_p12)
}
  0x2c   : > { %s1344_s19 = scalar_lea.vmem %s252_s15, 256  ;;  %p1352_p5 = scmp.lt.s32.totalorder %s252_s15, %s252_s15 }
  0x2d   : > { %p1345_p13 = scmp.ne.s32.totalorder %s252_s15, %s1344_s19  ;;  %p1353_p1 = scmp.lt.s32.totalorder %s1344_s19, %s1344_s19 }
  0x2f   : > { %p1347_p0 = pnand %p1345_p13, %p1808_p8  ;;  %p1354_p2 = por %p1353_p1, %p1352_p5 }
  0x31   : > { %p1348_p3 = pneg %p1347_p0 }
  0x33   : > { %p1355_p4 = pnand %p1354_p2, %p1348_p3 }
  0x35   : > { %1358 = shalt.err (!%p1355_p4)
}
  0x36   : > { %s1671_s20 = smov 64   ;;  %s1672_s22 = smov 4  }
  0x37   : > { %1194 = dma.hbm_to_vmem [thread:$0]  (!%p1794_p6), %s2256_s3, 256, %s252_s15, [#allocation11], %s1671_s20, %s1671_s20, %s1672_s22  }
  0x38   : > { %s2258_s5 = sld [smem:[#allocation37_spill]] }
  0x3e   : > { %s1359_s8 = scalar_lea.hbm %s2258_s5, 64 }
  0x3f   : > { %p1360_p7 = scmp.ne.s32.totalorder %s2258_s5, %s1359_s8  ;;  %p1366_p4 = scmp.lt.u32.totalorder %s1359_s8, %s2258_s5 }
  0x41   : > { %p1362_p1 = pnand %p1360_p7, %p1808_p8 }
  0x43   : > { %p1363_p2 = pneg %p1362_p1 }
  0x45   : > { %p1368_p9 = pnand %p1366_p4, %p1363_p2 }
  0x47   : > { %1371 = shalt.err (!%p1368_p9)
}
  0x48   : > { %s1372_s15 = scalar_lea.vmem %s1798_s18, 64  ;;  %p1380_p13 = scmp.lt.s32.totalorder %s1798_s18, %s1798_s18 }
  0x49   : > { %p1373_p10 = scmp.ne.s32.totalorder %s1798_s18, %s1372_s15  ;;  %p1381_p0 = scmp.lt.s32.totalorder %s1372_s15, %s1372_s15 }
  0x4b   : > { %p1375_p11 = pnand %p1373_p10, %p1808_p8  ;;  %p1382_p3 = por %p1381_p0, %p1380_p13 }
  0x4d   : > { %p1376_p12 = pneg %p1375_p11 }
  0x4f   : > { %p1383_p5 = pnand %p1382_p3, %p1376_p12 }
  0x51   : > { %1386 = shalt.err (!%p1383_p5)
}
  0x52   : > { %1200 = dma.hbm_to_vmem [thread:$0]  (!%p1794_p6), %s2258_s5, 64, %s1798_s18, [#allocation14]  }
  0x53   : > { %s1049_s8 = sadd.s32 4294967294, %s1667_s11   ;;  %s37_s13 = sadd.s32 1, %s1659_s9 }
  0x54   : > { %s40_s20 = sadd.s32 1, %s1663_s10  ;;  %p38_p7 = scmp.ge.s32.totalorder %s37_s13, 2 }
  0x55   : > { %p2232_p1 = scmp.eq.s32.totalorder %s1667_s11, 0  ;;  %s75_s22 = sadd.s32 1, %s1635_s26 }
  0x56   : > { %p82_p2 = scmp.ne.s32.totalorder %s1635_s26, %s1631_s25  ;;  %s2317_s13 = smov (%p38_p7, %s37_s13), 0 }
  0x57   : > { %2259 = sst [smem:[#allocation29_spill]] %s2317_s13  ;;  %s2319_s20 = smov (!%p38_p7, %s40_s20), %s1663_s10 }
  0x58   : > { %s71_s7 = ssub.s32 %s1659_s9, %s2317_s13  ;;  %p1861_p4 = por %p82_p2, %p2232_p1 }
  0x59   : > { %p42_p9 = scmp.ge.s32.totalorder %s2319_s20, 2  ;;  %p88_p10 = scmp.ne.s32.totalorder %s1631_s25, %s1627_s24 }
  0x5a   : > { %p2261_p11 = scmp.eq.s32.totalorder %s1780_s12, 3  ;;  %p232_p13 = scmp.eq.s32.totalorder %s1049_s8, 3 }
  0x5b   : > { %s2321_s20 = smov (%p42_p9, %s2319_s20), 0  ;;  %p2265_p0 = scmp.eq.s32.totalorder %s1780_s12, 0 }
  0x5c   : > { %p1869_p12 = por %p2261_p11, %p82_p2  ;;  %2264 = sst [smem:[#allocation31_spill]] %s2321_s20 }
  0x5d   : > { %p1877_p3 = por %p88_p10, %p2265_p0  ;;  %p1881_p5 = por %p232_p13, %p88_p10 }
  0x5e   : > { %s2262_s21 = scalar_select %p1869_p12, 1, 0 }
  0x5f   : > { %s2266_s23 = scalar_select %p1877_p3, 1, 0 }
  0x60   : > { %2263 = sst [smem:[#allocation30_spill]] %s2262_s21  ;;  %s1887_s19 = ssub.s32 %s1663_s10, %s2321_s20 }
  0x61   : > { %2267 = sst [smem:[#allocation32_spill]] %s2266_s23  ;;  %p2231_p7 = scmp.lt.s32.totalorder %s1667_s11, 4 }
  0x62   : > { %s2268_s17 = scalar_select %p1881_p5, 1, 0 }
  0x63   : > { %s72_s15 = sor.u32 %s71_s7, %s1887_s19  ;;  %s315_s0 = sand.u32 1, %s1667_s11  }
  0x64   : > { %2269 = sst [smem:[#allocation33_spill]] %s2268_s17  ;;  %p73_p2 = scmp.eq.s32.totalorder %s72_s15, 0 }
  0x65   : > { %s317_s30 = sand.u32 1, %s1635_s26   ;;  %s1058_s8 = sshll.u32 %s1659_s9, 2 }
  0x66   : > { %s1895_s3 = scalar_select %p73_p2, %s1635_s26, %s75_s22  }
  0x67   : > { %s1897_s5 = sshll.u32 %s317_s30, 5  ;;  %s1059_s13 = sshll.u32 %s1663_s10, 3 }
  0x68   : > { %s325_s24 = sadd.s32 %s1059_s13, %s1058_s8  ;;  %s319_s17 = scalar_lea.vmem [#allocation7], %s1897_s5 }
  0x69   : > { %s1060_s21 = sshll.u32 %s325_s24, 7  ;;  %s328_s20 = sshll.u32 %s319_s17, 4  ;;  %s1906_s20 = int_to_ptr.vmem [resolvable:$true] %s328_s20 }
  0x6a   : > { %s2270_s1 = sld [smem:[#allocation35_spill]]  ;;  %p1912_p9 = pnand %p2231_p7, %p1861_p4 }
  0x6b   : > { %s1919_s25 = scalar_lea.hbm %s2208_s2, %s1060_s21  ;;  %s1921_s7 = scalar_lea.sflag [#allocation8], %s315_s0 }
  0x6c   : > { %s2271_s22 = scalar_select %p1912_p9, 1, 0 }
  0x6d   : > { %p2238_p11 = pneg %p1912_p9 }
  0x70   : > { %s1904_s12 = scalar_lea.hbm %s2270_s1, %s1060_s21  ;;  %s1392_s15 = scalar_lea.hbm %s2270_s1, 2048 }
  0x71   : > { %s1387_s23 = scalar_lea.hbm %s1904_s12, 512  ;;  %p1393_p0 = scmp.lt.u32.totalorder %s1904_s12, %s2270_s1 }
  0x72   : > { %p1388_p10 = scmp.ne.s32.totalorder %s1904_s12, %s1387_s23  ;;  %p1394_p2 = scmp.lt.u32.totalorder %s1392_s15, %s1387_s23 }
  0x73   : > { %p1396_p1 = scmp.lt.u32.totalorder %s1387_s23, %s1904_s12 }
  0x74   : > { %p1390_p13 = pnand %p2238_p11, %p1388_p10  ;;  %p1395_p7 = por %p1394_p2, %p1393_p0 }
  0x76   : > { %p1391_p4 = pneg %p1390_p13  ;;  %p1397_p5 = por %p1396_p1, %p1395_p7 }
  0x78   : > { %p1398_p12 = pnand %p1397_p5, %p1391_p4 }
  0x7a   : > { %1401 = shalt.err (!%p1398_p12)
}
  0x7b   : > { %s1402_s21 = scalar_lea.vmem %s1906_s20, 512  ;;  %s1673_s0 = smov [#allocation7]  }
  0x7c   : > { %p1403_p10 = scmp.ne.s32.totalorder %s1906_s20, %s1402_s21  ;;  %s1407_s24 = sshll.u32 %s1673_s0, 4  ;;  %s1408_s24 = int_to_ptr.vmem [resolvable:$false] %s1407_s24 }
  0x7d   : > { %s1409_s13 = scalar_lea.vmem %s1408_s24, 1024  ;;  %p1410_p6 = scmp.lt.s32.totalorder %s1906_s20, %s1408_s24 }
  0x7e   : > { %p1405_p13 = pnand %p1403_p10, %p2238_p11  ;;  %p1411_p0 = scmp.lt.s32.totalorder %s1409_s13, %s1402_s21 }
  0x80   : > { %p1406_p3 = pneg %p1405_p13  ;;  %p1412_p2 = por %p1411_p0, %p1410_p6 }
  0x82   : > { %p1413_p1 = pnand %p1412_p2, %p1406_p3 }
  0x84   : > { %1416 = shalt.err (!%p1413_p1)
}
  0x85   : > { %s1674_s23 = smov 128   ;;  %s1675_s18 = smov 8  }
  0x86   : > { %1210 = dma.hbm_to_vmem [thread:$0]  (!%p1912_p9), %s1904_s12, 512, %s1906_s20, %s1921_s7, %s1674_s23, %s1674_s23, %s1675_s18  }
  0x87   : > { %s342_s17 = scalar_lea.vmem [#allocation9], %s1897_s5  ;;  %s1676_s30 = smov [#allocation12]  }
  0x88   : > { %s351_s15 = sshll.u32 %s342_s17, 4  ;;  %s265_s8 = sshll.u32 %s1676_s30, 4  ;;  %s1953_s15 = int_to_ptr.vmem [resolvable:$true] %s351_s15  ;;  %s266_s8 = int_to_ptr.vmem [resolvable:$true] %s265_s8 }
  0x89   : > { %s1417_s24 = scalar_lea.hbm %s2210_s4, 16 }
  0x8a   : > { %p1418_p6 = scmp.ne.s32.totalorder %s2210_s4, %s1417_s24  ;;  %p1424_p5 = scmp.lt.u32.totalorder %s1417_s24, %s2210_s4 }
  0x8c   : > { %p1420_p12 = pnand %p1418_p6, %p1808_p8 }
  0x8e   : > { %p1421_p3 = pneg %p1420_p12 }
  0x90   : > { %p1426_p7 = pnand %p1424_p5, %p1421_p3 }
  0x92   : > { %1429 = shalt.err (!%p1426_p7)
}
  0x93   : > { %s1430_s5 = scalar_lea.vmem %s266_s8, 16  ;;  %s1437_s20 = scalar_lea.vmem %s266_s8, 32 }
  0x94   : > { %p1431_p4 = scmp.ne.s32.totalorder %s266_s8, %s1430_s5  ;;  %p1438_p0 = scmp.lt.s32.totalorder %s266_s8, %s266_s8 }
  0x95   : > { %p1439_p2 = scmp.lt.s32.totalorder %s1437_s20, %s1430_s5 }
  0x96   : > { %p1433_p10 = pnand %p1431_p4, %p1808_p8 }
  0x97   : > { %p1440_p1 = por %p1439_p2, %p1438_p0 }
  0x98   : > { %p1434_p13 = pneg %p1433_p10 }
  0x9a   : > { %p1441_p11 = pnand %p1440_p1, %p1434_p13 }
  0x9c   : > { %1444 = shalt.err (!%p1441_p11)
}
  0x9d   : > { %p2272_p6 = scmp.ne.s32.totalorder %s2255_s16, 0  ;;  %s1677_s9 = smov [#allocation15]  }
  0x9e   : > { %s287_s30 = sshll.u32 %s1677_s9, 4  ;;  %s1445_s24 = scalar_lea.hbm %s2212_s6, 16  ;;  %s288_s30 = int_to_ptr.vmem [resolvable:$true] %s287_s30 }
  0x9f   : > { %1197 = dma.hbm_to_vmem [thread:$0]  (!%p2272_p6), %s2210_s4, 16, %s266_s8, [#allocation11]  }
  0xa0   : > { %p1446_p12 = scmp.ne.s32.totalorder %s2212_s6, %s1445_s24  ;;  %p1452_p5 = scmp.lt.u32.totalorder %s1445_s24, %s2212_s6 }
  0xa2   : > { %p1448_p11 = pnand %p1446_p12, %p1808_p8 }
  0xa4   : > { %p1449_p3 = pneg %p1448_p11 }
  0xa6   : > { %p1454_p7 = pnand %p1452_p5, %p1449_p3 }
  0xa8   : > { %1457 = shalt.err (!%p1454_p7)
}
  0xa9   : > { %s1458_s8 = scalar_lea.vmem %s288_s30, 16  ;;  %s1465_s1 = scalar_lea.vmem %s288_s30, 32 }
  0xaa   : > { %p1459_p4 = scmp.ne.s32.totalorder %s288_s30, %s1458_s8  ;;  %p1466_p0 = scmp.lt.s32.totalorder %s288_s30, %s288_s30 }
  0xab   : > { %p1467_p2 = scmp.lt.s32.totalorder %s1465_s1, %s1458_s8 }
  0xac   : > { %p1461_p10 = pnand %p1459_p4, %p1808_p8 }
  0xad   : > { %p1468_p1 = por %p1467_p2, %p1466_p0 }
  0xae   : > { %p1462_p13 = pneg %p1461_p10 }
  0xb0   : > { %p1469_p9 = pnand %p1468_p1, %p1462_p13 }
  0xb2   : > { %1472 = shalt.err (!%p1469_p9)
}
  0xb3   : > { %s2273_s14 = sld [smem:[#allocation27_spill]]  ;;  %p45_p8 = scmp.eq.s32.totalorder %s1887_s19, 0 }
  0xb4   : > { %1203 = dma.hbm_to_vmem [thread:$0]  (!%p2272_p6), %s2212_s6, 16, %s288_s30, [#allocation14]  }
  0xb5   : > { %s47_s16 = sadd.s32 1, %s1647_s29  ;;  %p54_p9 = scmp.ne.s32.totalorder %s1647_s29, %s1643_s28 }
  0xb6   : > { %p60_p12 = scmp.ne.s32.totalorder %s1643_s28, %s1639_s27  ;;  %p2274_p11 = scmp.eq.s32.totalorder %s1667_s11, 0 }
  0xb7   : > { %s1998_s21 = scalar_select %p45_p8, %s1647_s29, %s47_s16  }
  0xb8   : > { %p56_p3 = por %p2274_p11, %p54_p9  ;;  %s298_s24 = sand.u32 1, %s1647_s29  }
  0xb9   : > { %p2275_p5 = scmp.eq.s32.totalorder %s2273_s14, 0  ;;  %s1056_s13 = sshll.u32 %s1663_s10, 4 }
  0xba   : > { %s2277_s19 = sld [smem:[#allocation34_spill]]  ;;  %s301_s27 = scalar_lea.vmem [#allocation4], %s298_s24 }
  0xbb   : > { %p2004_p7 = por %p2275_p5, %p60_p12  ;;  %s308_s20 = sshll.u32 %s301_s27, 4  ;;  %s2017_s20 = int_to_ptr.vmem [resolvable:$true] %s308_s20 }
  0xbc   : > { %p2278_p6 = scmp.lt.s32.totalorder %s1667_s11, 4  ;;  %s1473_s1 = scalar_lea.hbm %s1919_s25, 512 }
  0xbd   : > { %s2276_s0 = scalar_select %p2004_p7, 1, 0 }
  0xbe   : > { %p2021_p4 = pnand %p2278_p6, %p56_p3  ;;  %p1474_p10 = scmp.ne.s32.totalorder %s1919_s25, %s1473_s1 }
  0xbf   : > { %p2280_p13 = scmp.ne.s32.totalorder %s2271_s22, 0  ;;  %s1478_s14 = scalar_lea.hbm %s2208_s2, 2048 }
  0xc0   : > { %s2013_s5 = scalar_lea.hbm %s2277_s19, %s1056_s13  ;;  %p1479_p8 = scmp.lt.u32.totalorder %s1919_s25, %s2208_s2 }
  0xc1   : > { %p2281_p0 = pneg %p2280_p13  ;;  %p1480_p9 = scmp.lt.u32.totalorder %s1478_s14, %s1473_s1 }
  0xc2   : > { %p1482_p11 = scmp.lt.u32.totalorder %s1473_s1, %s1919_s25 }
  0xc3   : > { %p1476_p2 = pnand %p1474_p10, %p2281_p0  ;;  %p1481_p12 = por %p1480_p9, %p1479_p8 }
  0xc5   : > { %p1477_p1 = pneg %p1476_p2  ;;  %p1483_p3 = por %p1482_p11, %p1481_p12 }
  0xc7   : > { %p1484_p5 = pnand %p1483_p3, %p1477_p1 }
  0xc9   : > { %1487 = shalt.err (!%p1484_p5)
}
  0xca   : > { %s1488_s30 = scalar_lea.vmem %s1953_s15, 512  ;;  %p2282_p10 = pmov %p2281_p0 }
  0xcb   : > { %p1489_p6 = scmp.ne.s32.totalorder %s1953_s15, %s1488_s30  ;;  %s1678_s12 = smov [#allocation9]  }
  0xcc   : > { %s1493_s27 = sshll.u32 %s1678_s12, 4  ;;  %s1494_s27 = int_to_ptr.vmem [resolvable:$false] %s1493_s27 }
  0xcd   : > { %p1491_p0 = pnand %p1489_p6, %p2282_p10  ;;  %s1495_s17 = scalar_lea.vmem %s1494_s27, 1024 }
  0xce   : > { %p1496_p7 = scmp.lt.s32.totalorder %s1953_s15, %s1494_s27  ;;  %p1497_p8 = scmp.lt.s32.totalorder %s1495_s17, %s1488_s30 }
  0xcf   : > { %p1492_p2 = pneg %p1491_p0 }
  0xd0   : > { %p1498_p9 = por %p1497_p8, %p1496_p7 }
  0xd2   : > { %p1499_p12 = pnand %p1498_p9, %p1492_p2 }
  0xd4   : > { %1502 = shalt.err (!%p1499_p12)
}
  0xd5   : > { %1213 = dma.hbm_to_vmem [thread:$0]  (!%p2280_p13), %s1919_s25, 512, %s1953_s15, %s1921_s7, %s1674_s23, %s1674_s23, %s1675_s18  }
  0xd6   : > { %s299_s1 = scalar_lea.sflag [#allocation5], %s298_s24  ;;  %s1503_s9 = scalar_lea.hbm %s2013_s5, 16 }
  0xd7   : > { %p1504_p7 = scmp.ne.s32.totalorder %s2013_s5, %s1503_s9  ;;  %p1505_p1 = pneg %p2021_p4 }
  0xd8   : > { %s1508_s16 = scalar_lea.hbm %s2277_s19, 32  ;;  %p1509_p5 = scmp.lt.u32.totalorder %s2013_s5, %s2277_s19 }
  0xd9   : > { %p1506_p11 = pnand %p1505_p1, %p1504_p7  ;;  %p1510_p6 = scmp.lt.u32.totalorder %s1508_s16, %s1503_s9 }
  0xda   : > { %p1512_p10 = scmp.lt.u32.totalorder %s1503_s9, %s2013_s5 }
  0xdb   : > { %p1507_p3 = pneg %p1506_p11  ;;  %p1511_p13 = por %p1510_p6, %p1509_p5 }
  0xdd   : > { %p1513_p0 = por %p1512_p10, %p1511_p13 }
  0xdf   : > { %p1514_p2 = pnand %p1513_p0, %p1507_p3 }
  0xe1   : > { %1517 = shalt.err (!%p1514_p2)
}
  0xe2   : > { %s1518_s25 = scalar_lea.vmem %s2017_s20, 16  ;;  %s1679_s7 = smov [#allocation4]  }
  0xe3   : > { %p1519_p8 = scmp.ne.s32.totalorder %s2017_s20, %s1518_s25  ;;  %s1523_s23 = sshll.u32 %s1679_s7, 4  ;;  %s1524_s23 = int_to_ptr.vmem [resolvable:$false] %s1523_s23 }
  0xe4   : > { %s1525_s18 = scalar_lea.vmem %s1524_s23, 32  ;;  %p1526_p7 = scmp.lt.s32.totalorder %s2017_s20, %s1524_s23 }
  0xe5   : > { %p1521_p9 = pnand %p1519_p8, %p1505_p1  ;;  %p1527_p11 = scmp.lt.s32.totalorder %s1525_s18, %s1518_s25 }
  0xe7   : > { %p1522_p12 = pneg %p1521_p9  ;;  %p1528_p5 = por %p1527_p11, %p1526_p7 }
  0xe9   : > { %p1529_p6 = pnand %p1528_p5, %p1522_p12 }
  0xeb   : > { %1532 = shalt.err (!%p1529_p6)
}
  0xec   : > { %1207 = dma.hbm_to_vmem [thread:$0]  (!%p2021_p4), %s2013_s5, 16, %s2017_s20, %s299_s1  }
  0xed   : > { %s2283_s15 = sld [smem:[#allocation28_spill]] }
  0xf3   : > { %p2284_p3 = scmp.ne.s32.totalorder %s2283_s15, 0 }
  0xf4   : > { %s365_s24 = sand.u32 (!%p2284_p3), 1, %s1643_s28   ;;  %p2285_p1 = scmp.ne.s32.totalorder (!%p2284_p3), %s2276_s0, 0 }
  0xf5   : > { %363 = sbr.rel (%p2284_p3) target bundleno = 992 (0x3e0), region = 48  ;;  %s366_s12 = scalar_lea.sflag (!%p2284_p3), [#allocation5], %s365_s24 }
  0xf6   : > { %s368_s27 = scalar_lea.vmem (!%p2284_p3), [#allocation4], %s365_s24 }
  0xfc   : > { %1606 = dma.done.wait (%p2285_p1), %s366_s12, 16  }
  0xfd   : > { %1608 = vsyncadd (%p2285_p1), %s366_s12, 4294967280  ;;  %s2286_s17 = sld [smem:[#allocation27_spill]]  ;;  %s2287_s9 = sld [smem:[#allocation23_spill]] }
  0xfe   : > { %s2288_s8 = sld [smem:[#allocation32_spill]] }
 0x103   : > { %s373_s22 = sand.u32 1, %s2286_s17   ;;  %s375_s14 = sand.u32 1, %s2287_s9  }
 0x104   : > { %s1066_s5 = sshll.u32 %s375_s14, 5  ;;  %s374_s20 = scalar_lea.sflag [#allocation8], %s373_s22 }
 0x105   : > { %s2090_s1 = scalar_lea.vmem [#allocation7], %s1066_s5  ;;  %p2289_p4 = scmp.ne.s32.totalorder %s2288_s8, 0 }
 0x107   : > { %1610 = dma.done.wait (%p2289_p4), %s374_s20, 1024  }
 0x108   : > { %1612 = vsyncadd (%p2289_p4), %s374_s20, 4294966272  ;;  %s2096_s16 = scalar_lea.vmem [#allocation9], %s1066_s5  ;;  %p2290_p13 = scmp.eq.s32.totalorder %s2286_s17, 0 }
 0x10a   : > { %1614 = dma.done.wait (%p2290_p13), [#allocation11], 272   ;;  %p2291_p10 = pmov %p2290_p13 }
 0x10c   : > { %1616 = vsyncadd (%p2291_p10), [#allocation11], 4294967024  ;;  %p2292_p0 = pmov %p2291_p10 }
 0x10e   : > { %1618 = dma.done.wait (%p2292_p0), [#allocation14], 80   ;;  %p2293_p2 = pmov %p2292_p0 }
 0x10f   : > { %s2106_s0 = scalar_lea.vmem [#allocation16], %s1066_s5  ;;  %s2294_s13 = sld [smem:[#allocation24_spill]] }
 0x110   : > { %1620 = vsyncadd (%p2293_p2), [#allocation14], 4294967216 }
 0x115   : > { %p1073_p8 = scmp.ne.s32.totalorder %s2294_s13, 0 }
 0x116   : > { %v1327_v0 = vld [vmem:[#allocation10] sm:$0xff] (!%p1073_p8)   ;;  %v451_v1 = vlaneseq (!%p1073_p8)  ;;  %v1329_v3 = vld [vmem:[#allocation10 + $0x8] sm:$0xff] (!%p1073_p8)   ;;  %v450_v6 = vld [vmem:[%s368_s27] sm:$0x1] (!%p1073_p8)  ;;  %vm509_vm0 = vcmask (!%p1073_p8), 261120   ;;  %v1680_v14 = vmov (!%p1073_p8), 0.0  }
 0x117   : > { %449 = sbr.rel (%p1073_p8) target bundleno = 511 (0x1ff), region = 80  ;;  %v1328_v2 = vld [vmem:[#allocation10] sm:$0xff] (!%p1073_p8)   ;;  %1124 = vmatprep.subr.bf16.mxu0 (!%p1073_p8), %v1327_v0  ;;  %v1330_v5 = vld [vmem:[#allocation10 + $0x8] sm:$0xff] (!%p1073_p8)   ;;  %v1078_v11 = vadd.s32 (!%p1073_p8), 4294967264, %v450_v6  ;;  %vm567_vm9 = vcmask (!%p1073_p8), 64512  }
 0x118   : > { %v452_v4 = vshrl.u32 (!%p1073_p8), %v451_v1, 7  ;;  %1132 = vmatprep.subr.bf16.mxu1 (!%p1073_p8), %v1328_v2  ;;  %1125 = vmatpush3.bf16.msra.mxu0 (!%p1073_p8), %v1327_v0 }
 0x119   : > { %1133 = vmatpush3.bf16.msra.mxu1 (!%p1073_p8), %v1328_v2  ;;  %1126 = vmatprep.subr.bf16.mxu0 (!%p1073_p8), %v1329_v3 }
 0x11a   : > { %v453_v7 = vadd.s32 (!%p1073_p8), 8, %v452_v4  ;;  %v458_v8 = vsub.s32 (!%p1073_p8), 0, %v452_v4  ;;  %v454_v9 = vadd.s32 (!%p1073_p8), 16, %v452_v4  ;;  %v455_v10 = vadd.s32 (!%p1073_p8), 24, %v452_v4  ;;  %1134 = vmatprep.subr.bf16.mxu1 (!%p1073_p8), %v1330_v5 }
 0x11c   : > { %v459_v12 = vrot.slane (!%p1073_p8), %v450_v6, %v458_v8  ;;  %1127 = vmatpush3.bf16.msra.mxu0 (!%p1073_p8), %v1329_v3  ;;  %v478_v13 = vrot.slane (!%p1073_p8), %v1078_v11, %v458_v8 }
 0x11d   : > { %1135 = vmatpush3.bf16.msra.mxu1 (!%p1073_p8), %v1330_v5 }
 0x11e   : > { %vm460_vm1 = vcmp.eq.s32.totalorder %v452_v4, %v459_v12  ;;  %vm461_vm2 = vcmp.eq.s32.totalorder %v453_v7, %v459_v12  ;;  %vm462_vm3 = vcmp.eq.s32.totalorder %v454_v9, %v459_v12  ;;  %vm463_vm4 = vcmp.eq.s32.totalorder %v455_v10, %v459_v12 }
 0x11f   : > { %v1074_v15 = vsel %vm460_vm1, 1.0, %v1680_v14  ;;  %v1075_v16 = vsel %vm461_vm2, 1.0, %v1680_v14  ;;  %vm479_vm5 = vcmp.eq.s32.totalorder %v452_v4, %v478_v13  ;;  %vm480_vm6 = vcmp.eq.s32.totalorder %v453_v7, %v478_v13 }
 0x120   : > { %v472_v17 = vpack.c.bf16 %v1075_v16, %v1074_v15  ;;  %v1079_v18 = vsel %vm479_vm5, 1.0, %v1680_v14  ;;  %v1080_v19 = vsel %vm480_vm6, 1.0, %v1680_v14  ;;  %v1076_v20 = vsel %vm462_vm3, 1.0, %v1680_v14 }
 0x121   : > { %v491_v21 = vpack.c.bf16 %v1080_v19, %v1079_v18  ;;  %v1077_v22 = vsel %vm463_vm4, 1.0, %v1680_v14  ;;  %vm481_vm7 = vcmp.eq.s32.totalorder %v454_v9, %v478_v13  ;;  %vm482_vm8 = vcmp.eq.s32.totalorder %v455_v10, %v478_v13 }
 0x122   : > { %1128 = vmatprep.mubr.msk.bf16.mxu0 %vm509_vm0, %v472_v17  ;;  %v473_v23 = vpack.c.bf16 %v1077_v22, %v1076_v20  ;;  %v1081_v24 = vsel %vm481_vm7, 1.0, %v1680_v14  ;;  %v1082_v25 = vsel %vm482_vm8, 1.0, %v1680_v14 }
 0x123   : > { %1136 = vmatprep.mubr.msk.bf16.mxu1 %vm509_vm0, %v491_v21  ;;  %v492_v26 = vpack.c.bf16 %v1082_v25, %v1081_v24 }
 0x124   : > { %1129 = vmatmul.mubr.msk.bf16.vlgmr.msra.gmra.mrb[0].mxu0 %vm509_vm0, %v473_v23 }
 0x125   : > { %1137 = vmatmul.mubr.msk.bf16.vlgmr.msra.gmra.mrb[0].mxu1 %vm509_vm0, %v492_v26 }
 0x1f7   : > { %v1130_v27 = vpop.f32.mrb[0].mxu0 }
 0x1f8   : > { %v1138_v28 = vpop.f32.mrb[0].mxu1  ;;  %v550_v29 = vpop.f32.mrb[1].mxu0 }
 0x1f9   : > { %v626_v30 = vpop.f32.mrb[1].mxu1  ;;  %v1131_v31 = vpop.f32.mrb[2].mxu0 }
 0x1fa   : > { %v566_v32 = vpack.c.bf16 %v1131_v31, %v1130_v27  ;;  %v1139_v33 = vpop.f32.mrb[2].mxu1  ;;  %v553_v34 = vpop.f32.mrb[3].mxu0 }
 0x1fb   : > { %v642_v35 = vpack.c.bf16 %v1139_v33, %v1138_v28  ;;  %v565_v36 = vpack.c.bf16 %v553_v34, %v550_v29  ;;  %v629_v37 = vpop.f32.mrb[3].mxu1 }
 0x1fc   : > { %569 = vst.msk [vmem:[#allocation2 + $0x8] sm:$0xff] %vm567_vm9, %v566_v32  ;;  %v641_v38 = vpack.c.bf16 %v629_v37, %v626_v30 }
 0x1fd   : > { %644 = vst.msk [vmem:[#allocation3 + $0x8] sm:$0xff] %vm567_vm9, %v642_v35  ;;  %568 = vst.msk [vmem:[#allocation2] sm:$0xff] %vm567_vm9, %v565_v36 }
 0x1fe   : > { %643 = vst.msk [vmem:[#allocation3] sm:$0xff] %vm567_vm9, %v641_v38 }
 0x1ff PF: > { %v651_v41 = vld [vmem:[%s2096_s16] sm:$0xff]  ;;  %v652_v42 = vld [vmem:[%s2096_s16 + $0x8] sm:$0xff]  ;;  %vm661_vm10 = vcmask 261120   ;;  %v653_v44 = vld [vmem:[%s2096_s16 + $0x10] sm:$0xff]  ;;  %vm804_vm11 = vcmask 1043456   ;;  %s2295_s30 = sld [smem:[#allocation24_spill]] }
 0x200   : > { %v655_v43 = vpack.c.bf16 %v652_v42, %v651_v41  ;;  %v654_v45 = vld [vmem:[%s2096_s16 + $0x18] sm:$0xff]  ;;  %v645_v46 = vld [vmem:[%s2090_s1] sm:$0xff]  ;;  %v646_v47 = vld [vmem:[%s2090_s1 + $0x8] sm:$0xff]  ;;  %s2296_s25 = sld [smem:[#allocation25_spill]]  ;;  %vm797_vm12 = vcmask 64512   ;;  %s877_s12 = sshll.u32 %s2106_s0, 4  ;;  %s2135_s12 = int_to_ptr.vmem [resolvable:$true] %s877_s12 }
 0x201   : > { %v656_v49 = vpack.c.bf16 %v654_v45, %v653_v44  ;;  %v649_v50 = vpack.c.bf16 %v646_v47, %v645_v46  ;;  %v647_v52 = vld [vmem:[%s2090_s1 + $0x10] sm:$0xff]  ;;  %v648_v53 = vld [vmem:[%s2090_s1 + $0x18] sm:$0xff]  ;;  %s2298_s27 = sld [smem:[#allocation30_spill]]  ;;  %s2299_s8 = sld [smem:[#allocation38_spill]] }
 0x202   : > { %1144 = vmatprep.mubr.msk.bf16.mxu0 %vm661_vm10, %v655_v43  ;;  %v650_v54 = vpack.c.bf16 %v648_v53, %v647_v52  ;;  %v789_v55 = vld [vmem:[#allocation13] sm:$0xf]  ;;  %v1095_v57 = vld [vmem:[#allocation12] ss:$0 sm:$0xff]  ;;  %v1096_v8 = vld [vmem:[#allocation15] ss:$0 sm:$0xff] }
 0x203   : > { %v658_v51 = vld [vmem:[#allocation2 + $0x8] sm:$0xff]  ;;  %1166 = vmatprep.subr.msk.bf16.mxu1 %vm804_vm11, %v789_v55  ;;  %v806_v56 = vsel %vm804_vm11, %v789_v55, 0  ;;  %s2145_s20 = scalar_lea.sflag [#allocation6], %s375_s14  ;;  %s1533_s1 = scalar_lea.vmem %s2135_s12, 512 }
 0x204   : > { %v660_v40 = vld [vmem:[#allocation3 + $0x8] sm:$0xff]  ;;  %v657_v48 = vld [vmem:[#allocation2] sm:$0xff]  ;;  %1157 = vmatpush3.bf16.msra.mxu1 %v806_v56  ;;  %p1534_p9 = scmp.ne.s32.totalorder %s2135_s12, %s1533_s1  ;;  %s1681_s16 = smov [#allocation16]  }
 0x205   : > { %v659_v39 = vld [vmem:[#allocation3] sm:$0xff]  ;;  %s1100_s7 = sshll.u32 %s2295_s30, 2  ;;  %s1537_s13 = sshll.u32 %s1681_s16, 4  ;;  %s1538_s13 = int_to_ptr.vmem [resolvable:$false] %s1537_s13 }
 0x206   : > { %1140 = vmatprep.subr.bf16.mxu0 %v659_v39  ;;  %s1101_s23 = sshll.u32 %s2296_s25, 3  ;;  %s1539_s30 = scalar_lea.vmem %s1538_s13, 1024 }
 0x207   : > { %1141 = vmatpush3.bf16.msra.mxu0 %v659_v39  ;;  %s874_s18 = sadd.s32 %s1101_s23, %s1100_s7  ;;  %s2300_s22 = smov %s2299_s8 }
 0x208   : > { %1142 = vmatprep.subr.bf16.mxu0 %v660_v40  ;;  %s1102_s24 = sshll.u32 %s874_s18, 7  ;;  %p2301_p12 = scmp.ne.s32.totalorder %s2298_s27, 0 }
 0x209   : > { %s2133_s5 = scalar_lea.hbm %s2299_s8, %s1102_s24  ;;  %p1540_p5 = scmp.lt.s32.totalorder %s2135_s12, %s1538_s13 }
 0x20a   : > { %p1535_p7 = pnand %p1534_p9, %p2301_p12  ;;  %p1541_p6 = scmp.lt.s32.totalorder %s1539_s30, %s1533_s1 }
 0x20b   : > { %1143 = vmatpush3.bf16.msra.mxu0 %v660_v40 }
 0x20c   : > { %1148 = vmatprep.subr.bf16.mxu0 %v657_v48  ;;  %p1536_p11 = pneg %p1535_p7  ;;  %p1542_p3 = por %p1541_p6, %p1540_p5 }
 0x20e   : > { %1145 = vmatmul.mubr.msk.bf16.vlgmr.msra.gmra.mrb[0].mxu0 %vm661_vm10, %v656_v49  ;;  %p1543_p1 = pnand %p1542_p3, %p1536_p11 }
 0x20f   : > { %1149 = vmatpush3.bf16.msra.mxu0 %v657_v48  ;;  %1152 = vmatprep.mubr.msk.bf16.mxu0 %vm661_vm10, %v649_v50 }
 0x210   : > { %1150 = vmatprep.subr.bf16.mxu0 %v658_v51 }
 0x213   : > { %1151 = vmatpush3.bf16.msra.mxu0 %v658_v51 }
 0x21a   : > { %1153 = vmatmul.mubr.msk.bf16.vlgmr.msra.gmra.mrb[0].mxu0 %vm661_vm10, %v650_v54 }
 0x2ed   : > { %v1154_v58 = vpop.f32.mrb[0].mxu0 }
 0x2ee   : > { %v781_v59 = vadd.f32 %v1154_v58, %v1095_v57  ;;  %v757_v60 = vpop.f32.mrb[1].mxu0 }
 0x2ef   : > { %v779_v61 = vadd.f32 %v1095_v57, %v757_v60  ;;  %v1155_v62 = vpop.f32.mrb[2].mxu0 }
 0x2f0   : > { %v782_v63 = vadd.f32 %v1155_v62, %v1095_v57  ;;  %v760_v0 = vpop.f32.mrb[3].mxu0  ;;  %v785_v2 = vmax.f32 %v781_v59, 0.0 }
 0x2f1   : > { %v780_v1 = vadd.f32 %v1095_v57, %v760_v0  ;;  %v783_v4 = vmax.f32 %v779_v61, 0.0 }
 0x2f2   : > { %v786_v3 = vmax.f32 %v782_v63, 0.0 }
 0x2f3   : > { %v784_v5 = vmax.f32 %v780_v1, 0.0 }
 0x2f4   : > { %v788_v6 = vpack.c.bf16 %v786_v3, %v785_v2 }
 0x2f5   : > { %v787_v7 = vpack.c.bf16 %v784_v5, %v783_v4 }
 0x2f7   : > { %1158 = vmatprep.mubr.msk.bf16.mxu1 %vm797_vm12, %v787_v7 }
 0x2f8   : > { %1159 = vmatmul.mubr.msk.bf16.vlgmr.msra.gmra.mrb[0].mxu1 %vm797_vm12, %v788_v6 }
 0x3cb   : > { %v1160_v9 = vpop.f32.mrb[0].mxu1 }
 0x3cc   : > { %v851_v10 = vadd.f32 %v1160_v9, %v1096_v8  ;;  %v842_v11 = vpop.f32.mrb[1].mxu1 }
 0x3cd   : > { %v843_v12 = vadd.f32 %v1096_v8, %v842_v11  ;;  %v1161_v13 = vpop.f32.mrb[2].mxu1 }
 0x3ce   : > { %859 = vst.msk [vmem:[%s2106_s0 + $0x10] sm:$0xff] %vm661_vm10, %v851_v10  ;;  %v854_v14 = vadd.f32 %v1161_v13, %v1096_v8  ;;  %v845_v15 = vpop.f32.mrb[3].mxu1 }
 0x3cf   : > { %857 = vst.msk [vmem:[%s2106_s0] sm:$0xff] %vm661_vm10, %v843_v12  ;;  %v846_v16 = vadd.f32 %v1096_v8, %v845_v15 }
 0x3d0   : > { %860 = vst.msk [vmem:[%s2106_s0 + $0x18] sm:$0xff] %vm661_vm10, %v854_v14 }
 0x3d1   : > { %858 = vst.msk [vmem:[%s2106_s0 + $0x8] sm:$0xff] %vm661_vm10, %v846_v16 }
 0x3d2   : > { %1546 = shalt.err (!%p1543_p1)
}
 0x3d3   : > { %s1547_s14 = scalar_lea.hbm %s2133_s5, 512  ;;  %s1551_s7 = scalar_lea.hbm %s2300_s22, 2048 }
 0x3d4   : > { %p1548_p4 = scmp.ne.s32.totalorder %s2133_s5, %s1547_s14  ;;  %p1552_p0 = scmp.lt.u32.totalorder %s2133_s5, %s2300_s22 }
 0x3d5   : > { %p1553_p2 = scmp.lt.u32.totalorder %s1551_s7, %s1547_s14  ;;  %p1555_p9 = scmp.lt.u32.totalorder %s1547_s14, %s2133_s5 }
 0x3d6   : > { %p1549_p13 = pnand %p1548_p4, %p2301_p12 }
 0x3d7   : > { %p1554_p8 = por %p1553_p2, %p1552_p0 }
 0x3d8   : > { %p1550_p10 = pneg %p1549_p13 }
 0x3d9   : > { %p1556_p7 = por %p1555_p9, %p1554_p8 }
 0x3db   : > { %p1557_p11 = pnand %p1556_p7, %p1550_p10 }
 0x3dd   : > { %1560 = shalt.err (!%p1557_p11)
}
 0x3de   : > { %s1682_s15 = smov 128   ;;  %s1683_s24 = smov 8  }
 0x3df   : > { %1189 = dma.vmem_to_hbm [thread:$0]  (%p2301_p12), %s2135_s12, 512, %s2133_s5, %s2145_s20, %s1682_s15, %s1682_s15, %s1683_s24  }
 0x3e0 PF: > { %s2302_s17 = sld [smem:[#allocation22_spill]]  ;;  %s2303_s9 = sld [smem:[#allocation33_spill]] }
 0x3e1   : > { %p1227_p5 = scmp.ge.s32.totalorder %s1667_s11, 2 }
 0x3e6   : > { %s892_s8 = sand.u32 1, %s2302_s17   ;;  %p2304_p6 = scmp.ne.s32.totalorder %s2303_s9, 0 }
 0x3e7   : > { %s893_s1 = scalar_lea.sflag [#allocation6], %s892_s8 }
 0x3e8   : > { %p1215_p3 = pnand %p1227_p5, %p2304_p6 }
 0x3ea   : > { %1622 = dma.done.wait (!%p1215_p3), %s893_s1, 512  }
 0x3eb   : > { %1624 = vsyncadd (!%p1215_p3), %s893_s1, 4294966784  ;;  %s28_s11 = sadd.s32 1, %s1667_s11   ;;  %s2305_s24 = sld [smem:[#allocation23_spill]] }
 0x3ec   : > { %p25_p1 = scmp.ge.s32.totalorder %s28_s11, 6   ;;  %s2306_s30 = sld [smem:[#allocation26_spill]] }
 0x3ed   : > { %s2307_s9 = sld [smem:[#allocation29_spill]]  ;;  %s2308_s12 = sld [smem:[#allocation31_spill]] }
 0x3ee   : > { %s2309_s25 = smov %s1635_s26  ;;  %s2310_s26 = smov %s1895_s3 }
 0x3ef   : > { %s2311_s27 = smov %s1643_s28  ;;  %s2312_s28 = smov %s1647_s29 }
 0x3f0   : > { %s2313_s29 = smov %s1998_s21  ;;  %s2314_s8 = smov %s1663_s10 }
 0x3f1   :  { %27 = sbr.rel (!%p25_p1) target bundleno = 19 (0x13), region = 137 }
 0x3f3   : > { %s2315_s10 = smov %s2308_s12 }
 0x3f8   :  { %898 = vsyncpa [#allocation5], 1 }
 0x3f9   :  { %900 = vsyncpa [#allocation5 + $0x1], 1 }
 0x3fa   :  { %901 = vsyncpa [#allocation8], 1 }
 0x3fb   :  { %903 = vsyncpa [#allocation8 + $0x1], 1 }
 0x3fc   :  { %904 = vsyncpa [#allocation11], 1 }
 0x3fd   :  { %905 = vsyncpa [#allocation14], 1 }
 0x3fe   :  { %906 = vsyncpa [#allocation6], 1 }
 0x3ff   :  { %908 = vsyncpa [#allocation6 + $0x1], 1 }

// kernel: adapter_block_v6_forward.9
= control target key start
LH: loop header
LB: loop body
LE: loop exit
PB: predicated region body
PF: predicated region fallthrough
CT: control target
= control target key end

     0   :  { %s1219_s0 = inlined_call_operand.hbm [shape: f32[2,2,64], index: 0, kind: input, shape index: {}]   ;;  %s1220_s1 = inlined_call_operand.hbm [shape: bf16[2,64,32], index: 1, kind: input, shape index: {}]   ;;  %s1221_s2 = inlined_call_operand.hbm [shape: bf16[2,64,32], index: 2, kind: input, shape index: {}]   ;;  %s1222_s3 = inlined_call_operand.hbm [shape: f32[2,2,64], index: 3, kind: output, shape index: {}]  }
   0x1   :  { %1230 = sst [smem:[#allocation15_spill]] %s1220_s1 }
   0x2   :  { %8 = vsyncpa [#allocation3], 0 }
   0x3   :  { %10 = vsyncpa [#allocation3 + $0x1], 0 }
   0x4   :  { %11 = vsyncpa [#allocation6], 0 }
   0x5   :  { %13 = vsyncpa [#allocation6 + $0x1], 0 }
   0x6   :  { %14 = vsyncpa [#allocation4], 0 }
   0x7   :  { %16 = vsyncpa [#allocation4 + $0x1], 0  ;;  %s946_s12 = smov 0   ;;  %s948_s13 = smov 0  }
   0x8   :  { %s950_s14 = smov 0   ;;  %s952_s15 = smov 0  }
   0x9   :  { %s954_s16 = smov 0   ;;  %s956_s17 = smov 0  }
   0xa LB: > { %1231 = sst [smem:[#allocation12_spill]] %s904_s14  ;;  %s977_s18 = sadd.s32 4294967295, %s916_s17   ;;  %s916_s17 = sphi %s956_s17, %s22_s17   ;;  %s912_s16 = sphi %s954_s16, %s1255_s16   ;;  %s908_s15 = sphi %s952_s15, %s1254_s15   ;;  %s904_s14 = sphi %s950_s14, %s1250_s14   ;;  %s900_s13 = sphi %s948_s13, %s1253_s13   ;;  %s896_s12 = sphi %s946_s12, %s1252_s12  }
   0xb   : > { %s590_s19 = sadd.s32 4294967294, %s916_s17   ;;  %s34_s20 = sadd.s32 1, %s912_s16 }
   0xc   : > { %s41_s21 = sadd.s32 1, %s904_s14  ;;  %p36_p0 = scmp.ge.s32.totalorder %s34_s20, 2 }
   0xd   : > { %p48_p1 = scmp.ne.s32.totalorder %s904_s14, %s900_s13  ;;  %p49_p2 = scmp.eq.s32.totalorder %s916_s17, 0 }
   0xe   : > { %p54_p3 = scmp.ne.s32.totalorder %s900_s13, %s896_s12  ;;  %s1257_s20 = smov (%p36_p0, %s34_s20), 0 }
   0xf   : > { %1232 = sst [smem:[#allocation13_spill]] %s1257_s20  ;;  %p989_p4 = por %p49_p2, %p48_p1 }
  0x10   : > { %p55_p5 = scmp.eq.s32.totalorder %s977_s18, 0  ;;  %s38_s23 = ssub.s32 %s912_s16, %s1257_s20 }
  0x11   : > { %p134_p6 = scmp.eq.s32.totalorder %s977_s18, 1  ;;  %p39_p7 = scmp.eq.s32.totalorder %s38_s23, 0 }
  0x12   : > { %p997_p8 = por %p55_p5, %p54_p3  ;;  %p140_p10 = scmp.eq.s32.totalorder %s590_s19, 1 }
  0x13   : > { %p1001_p9 = por %p134_p6, %p48_p1  ;;  %p678_p13 = scmp.lt.s32.totalorder %s916_s17, 2 }
  0x14   : > { %s1234_s24 = scalar_select %p997_p8, 1, 0 }
  0x15   : > { %s1235_s25 = scalar_select %p1001_p9, 1, 0 }
  0x16   : > { %s1006_s26 = scalar_select %p39_p7, %s904_s14, %s41_s21  }
  0x17   : > { %p1008_p11 = por %p140_p10, %p54_p3  ;;  %s1015_s28 = sand.u32 1, %s904_s14  }
  0x18   : > { %1236 = sst [smem:[#allocation14_spill]] %s1006_s26  ;;  %s178_s29 = sand.u32 1, %s916_s17  }
  0x19   : > { %s1237_s27 = scalar_select %p1008_p11, 1, 0 }
  0x1a   : > { %s595_s30 = sshll.u32 %s1015_s28, 5  ;;  %p1021_p0 = pnand %p678_p13, %p989_p4 }
  0x1b   : > { %s620_s5 = sshll.u32 %s912_s16, 9  ;;  %s1239_s1 = sld [smem:[#allocation15_spill]] }
  0x1c   : > { %s1238_s4 = scalar_select %p1021_p0, 1, 0 }
  0x1d   : > { %s182_s9 = scalar_lea.vmem [#allocation5], %s595_s30  ;;  %s1037_s11 = scalar_lea.sflag [#allocation6], %s178_s29 }
  0x1e   : > { %s189_s10 = sshll.u32 %s182_s9, 4  ;;  %p1043_p2 = pneg %p1021_p0  ;;  %s1035_s10 = int_to_ptr.vmem [resolvable:$true] %s189_s10 }
  0x21   : > { %s1031_s8 = scalar_lea.hbm %s1239_s1, %s620_s5  ;;  %s745_s6 = scalar_lea.hbm %s1239_s1, 1024 }
  0x22   : > { %s740_s19 = scalar_lea.hbm %s1031_s8, 512  ;;  %p746_p5 = scmp.lt.u32.totalorder %s1031_s8, %s1239_s1 }
  0x23   : > { %p741_p1 = scmp.ne.s32.totalorder %s1031_s8, %s740_s19  ;;  %p747_p6 = scmp.lt.u32.totalorder %s745_s6, %s740_s19 }
  0x24   : > { %p749_p10 = scmp.lt.u32.totalorder %s740_s19, %s1031_s8 }
  0x25   : > { %p743_p3 = pnand %p1043_p2, %p741_p1  ;;  %p748_p7 = por %p747_p6, %p746_p5 }
  0x27   : > { %p744_p4 = pneg %p743_p3  ;;  %p750_p13 = por %p749_p10, %p748_p7 }
  0x29   : > { %p751_p12 = pnand %p750_p13, %p744_p4 }
  0x2b   : > { %754 = shalt.err (!%p751_p12)
}
  0x2c   : > { %s755_s29 = scalar_lea.vmem %s1035_s10, 512  ;;  %s918_s22 = smov [#allocation5]  }
  0x2d   : > { %p756_p1 = scmp.ne.s32.totalorder %s1035_s10, %s755_s29  ;;  %s760_s23 = sshll.u32 %s918_s22, 4  ;;  %s761_s23 = int_to_ptr.vmem [resolvable:$false] %s760_s23 }
  0x2e   : > { %s762_s7 = scalar_lea.vmem %s761_s23, 1024  ;;  %p763_p9 = scmp.lt.s32.totalorder %s1035_s10, %s761_s23 }
  0x2f   : > { %p758_p3 = pnand %p756_p1, %p1043_p2  ;;  %p764_p8 = scmp.lt.s32.totalorder %s762_s7, %s755_s29 }
  0x31   : > { %p759_p11 = pneg %p758_p3  ;;  %p765_p5 = por %p764_p8, %p763_p9 }
  0x33   : > { %p766_p6 = pnand %p765_p5, %p759_p11 }
  0x35   : > { %769 = shalt.err (!%p766_p6)
}
  0x36   : > { %s1227_s19 = smov 64   ;;  %s920_s6 = smov 4  }
  0x37   : > { %670 = dma.hbm_to_vmem [thread:$0]  (!%p1021_p0), %s1031_s8, 512, %s1035_s10, %s1037_s11, %s1227_s19, %s1227_s19, %s920_s6  }
  0x38   : > { %s1075_s22 = scalar_lea.hbm %s1221_s2, %s620_s5  ;;  %p601_p8 = scmp.ge.s32.totalorder %s916_s17, 1 }
  0x39   : > { %s203_s23 = scalar_lea.vmem [#allocation7], %s595_s30  ;;  %p220_p9 = scmp.lt.s32.totalorder %s916_s17, 3 }
  0x3a   : > { %s212_s7 = sshll.u32 %s203_s23, 4  ;;  %s593_s20 = sshll.u32 %s1015_s28, 1  ;;  %s1092_s7 = int_to_ptr.vmem [resolvable:$true] %s212_s7 }
  0x3b   : > { %p1081_p11 = pnand %p601_p8, %p220_p9  ;;  %s594_s26 = sshll.u32 %s912_s16, 5 }
  0x3c   : > { %s1090_s10 = scalar_lea.hbm %s1219_s0, %s594_s26  ;;  %s164_s30 = scalar_lea.vmem [#allocation2], %s593_s20 }
  0x3d   : > { %s1241_s1 = scalar_select %p1081_p11, 1, 0 }
  0x3e   : > { %s171_s5 = sshll.u32 %s164_s30, 4  ;;  %s161_s9 = scalar_lea.sflag [#allocation3], %s1015_s28  ;;  %s172_s5 = int_to_ptr.vmem [resolvable:$true] %s171_s5 }
  0x3f   : > { %s770_s29 = scalar_lea.hbm %s1090_s10, 32  ;;  %s775_s14 = scalar_lea.hbm %s1219_s0, 64 }
  0x40   : > { %p771_p12 = scmp.ne.s32.totalorder %s1090_s10, %s770_s29  ;;  %p776_p10 = scmp.lt.u32.totalorder %s1090_s10, %s1219_s0 }
  0x41   : > { %p777_p13 = scmp.lt.u32.totalorder %s775_s14, %s770_s29  ;;  %p779_p3 = scmp.lt.u32.totalorder %s770_s29, %s1090_s10 }
  0x42   : > { %p773_p4 = pnand %p771_p12, %p1043_p2 }
  0x43   : > { %p778_p1 = por %p777_p13, %p776_p10 }
  0x44   : > { %p774_p7 = pneg %p773_p4 }
  0x45   : > { %p780_p5 = por %p779_p3, %p778_p1 }
  0x47   : > { %p781_p6 = pnand %p780_p5, %p774_p7 }
  0x49   : > { %784 = shalt.err (!%p781_p6)
}
  0x4a   : > { %s785_s20 = scalar_lea.vmem %s172_s5, 32  ;;  %s921_s28 = smov [#allocation2]  }
  0x4b   : > { %p786_p8 = scmp.ne.s32.totalorder %s172_s5, %s785_s20  ;;  %s790_s30 = sshll.u32 %s921_s28, 4  ;;  %s791_s30 = int_to_ptr.vmem [resolvable:$false] %s790_s30 }
  0x4c   : > { %s792_s19 = scalar_lea.vmem %s791_s30, 64  ;;  %p793_p4 = scmp.lt.s32.totalorder %s172_s5, %s791_s30 }
  0x4d   : > { %p788_p9 = pnand %p786_p8, %p1043_p2  ;;  %p794_p11 = scmp.lt.s32.totalorder %s792_s19, %s785_s20 }
  0x4f   : > { %p789_p12 = pneg %p788_p9  ;;  %p795_p0 = por %p794_p11, %p793_p4 }
  0x51   : > { %p796_p10 = pnand %p795_p0, %p789_p12 }
  0x53   : > { %799 = shalt.err (!%p796_p10)
}
  0x54   : > { %p1242_p13 = scmp.ne.s32.totalorder %s1238_s4, 0  ;;  %s800_s29 = scalar_lea.hbm %s1075_s22, 512 }
  0x55   : > { %p801_p7 = scmp.ne.s32.totalorder %s1075_s22, %s800_s29  ;;  %s805_s26 = scalar_lea.hbm %s1221_s2, 1024 }
  0x56   : > { %667 = dma.hbm_to_vmem [thread:$0]  (!%p1242_p13), %s1090_s10, 32, %s172_s5, %s161_s9  }
  0x57   : > { %p803_p1 = pnand %p801_p7, %p1043_p2  ;;  %p806_p0 = scmp.lt.u32.totalorder %s1075_s22, %s1221_s2 }
  0x58   : > { %p807_p11 = scmp.lt.u32.totalorder %s805_s26, %s800_s29  ;;  %p809_p6 = scmp.lt.u32.totalorder %s800_s29, %s1075_s22 }
  0x59   : > { %p804_p3 = pneg %p803_p1 }
  0x5a   : > { %p808_p5 = por %p807_p11, %p806_p0 }
  0x5c   : > { %p810_p8 = por %p809_p6, %p808_p5 }
  0x5e   : > { %p811_p9 = pnand %p810_p8, %p804_p3 }
  0x60   : > { %814 = shalt.err (!%p811_p9)
}
  0x61   : > { %s815_s10 = scalar_lea.vmem %s1092_s7, 512  ;;  %s922_s5 = smov [#allocation7]  }
  0x62   : > { %p816_p12 = scmp.ne.s32.totalorder %s1092_s7, %s815_s10  ;;  %s820_s9 = sshll.u32 %s922_s5, 4  ;;  %s821_s9 = int_to_ptr.vmem [resolvable:$false] %s820_s9 }
  0x63   : > { %s822_s28 = scalar_lea.vmem %s821_s9, 1024  ;;  %p823_p7 = scmp.lt.s32.totalorder %s1092_s7, %s821_s9 }
  0x64   : > { %p818_p4 = pnand %p816_p12, %p1043_p2  ;;  %p824_p1 = scmp.lt.s32.totalorder %s822_s28, %s815_s10 }
  0x66   : > { %p819_p10 = pneg %p818_p4  ;;  %p825_p0 = por %p824_p1, %p823_p7 }
  0x68   : > { %p826_p11 = pnand %p825_p0, %p819_p10 }
  0x6a   : > { %829 = shalt.err (!%p826_p11)
}
  0x6b   : > { %s1243_s30 = smov 64   ;;  %p1244_p2 = scmp.ne.s32.totalorder %s1241_s1, 0 }
  0x6c   : > { %673 = dma.hbm_to_vmem [thread:$0]  (!%p1242_p13), %s1075_s22, 512, %s1092_s7, %s1037_s11, %s1243_s30, %s1243_s30, %s920_s6  }
  0x6d   : > { %224 = sbr.rel (%p1244_p2) target bundleno = 580 (0x244), region = 32  ;;  %s1140_s21 = sand.u32 (!%p1244_p2), 1, %s900_s13  }
  0x6e   : > { %s602_s19 = sshll.u32 (!%p1244_p2), %s1140_s21, 1  ;;  %s227_s29 = scalar_lea.sflag (!%p1244_p2), [#allocation3], %s1140_s21 }
  0x6f   : > { %s1146_s4 = scalar_lea.vmem (!%p1244_p2), [#allocation2], %s602_s19  ;;  %p1245_p3 = scmp.ne.s32.totalorder (!%p1244_p2), %s1234_s24, 0 }
  0x74   : > { %883 = dma.done.wait (%p1245_p3), %s227_s29, 32  }
  0x75   : > { %885 = vsyncadd (%p1245_p3), %s227_s29, 4294967264  ;;  %s235_s1 = sand.u32 1, %s977_s18   ;;  %s603_s11 = sshll.u32 %s1140_s21, 5 }
  0x76   : > { %s236_s6 = scalar_lea.sflag [#allocation6], %s235_s1  ;;  %s239_s22 = scalar_lea.vmem [#allocation5], %s603_s11 }
  0x77   : > { %887 = dma.done.wait (%p1245_p3), %s236_s6, 1024  }
  0x78   : > { %889 = vsyncadd (%p1245_p3), %s236_s6, 4294966272  ;;  %v923_v0 = vmov 0.0   ;;  %vm924_vm0 = vmmov 0   ;;  %v732_v1 = vld [vmem:[%s239_s22] sm:$0xff]   ;;  %v733_v2 = vld [vmem:[%s239_s22 + $0x8] sm:$0xff]   ;;  %s248_s18 = scalar_lea.vmem [#allocation7], %s603_s11 }
  0x79   : > { %632 = vmatprep.subr.bf16.mxu0 %v923_v0  ;;  %640 = vmatprep.mubr.msk.bf16.mxu0 %vm924_vm0, %v923_v0  ;;  %vm390_vm1 = vcmask 261120   ;;  %v736_v3 = vld [vmem:[%s248_s18] sm:$0xff]   ;;  %v734_v4 = vld [vmem:[%s239_s22 + $0x10] sm:$0xff]   ;;  %v737_v6 = vld [vmem:[%s248_s18 + $0x8] sm:$0xff]   ;;  %vm325_vm2 = vcmask 523264   ;;  %s617_s24 = sshll.u32 %s908_s15, 5 }
  0x7a   : > { %644 = vmatprep.subr.bf16.mxu1 %v923_v0  ;;  %652 = vmatprep.mubr.msk.bf16.mxu1 %vm924_vm0, %v923_v0  ;;  %v395_v5 = vsel %vm390_vm1, %v736_v3, 0  ;;  %v735_v7 = vld [vmem:[%s239_s22 + $0x18] sm:$0xff]   ;;  %v398_v10 = vsel %vm390_vm1, %v737_v6, 0  ;;  %v738_v11 = vld [vmem:[%s248_s18 + $0x10] sm:$0xff]   ;;  %s280_s7 = scalar_lea.vmem [#allocation8], %s602_s19  ;;  %vm447_vm3 = vcmask 517120   ;;  %s1170_s8 = scalar_lea.hbm %s1222_s3, %s617_s24 }
  0x7b   : > { %633 = vmatpush3.bf16.msra.mxu0 %v732_v1  ;;  %645 = vmatpush3.bf16.xpose.msra.mxu1 %v395_v5  ;;  %v283_v8 = vld [vmem:[%s1146_s4] sm:$0x3]  ;;  %v401_v12 = vsel %vm390_vm1, %v738_v11, 0  ;;  %s464_s23 = sshll.u32 %s280_s7, 4  ;;  %s450_s15 = scalar_lea.sflag [#allocation4], %s1140_s21  ;;  %s1172_s23 = int_to_ptr.vmem [resolvable:$true] %s464_s23 }
  0x7c   : > { %634 = vmatprep.subr.bf16.mxu0 %v923_v0  ;;  %646 = vmatprep.subr.bf16.mxu1 %v923_v0  ;;  %v284_v9 = vpack.c.bf16 %v283_v8, %v283_v8  ;;  %v739_v13 = vld [vmem:[%s248_s18 + $0x18] sm:$0xff]   ;;  %s830_s20 = scalar_lea.vmem %s1172_s23, 32  ;;  %p1246_p5 = scmp.ne.s32.totalorder %s1235_s25, 0 }
  0x7d   : > { %v404_v14 = vsel %vm390_vm1, %v739_v13, 0  ;;  %p831_p13 = scmp.ne.s32.totalorder %s1172_s23, %s830_s20  ;;  %s925_s10 = smov [#allocation8]  }
  0x7e   : > { %s834_s5 = sshll.u32 %s925_s10, 4  ;;  %s835_s5 = int_to_ptr.vmem [resolvable:$false] %s834_s5 }
  0x7f   : > { %635 = vmatpush3.bf16.msra.mxu0 %v733_v2  ;;  %p832_p6 = pnand %p831_p13, %p1246_p5  ;;  %s836_s9 = scalar_lea.vmem %s835_s5, 64 }
  0x80   : > { %636 = vmatprep.subr.bf16.mxu0 %v923_v0  ;;  %p837_p9 = scmp.lt.s32.totalorder %s1172_s23, %s835_s5  ;;  %p838_p12 = scmp.lt.s32.totalorder %s836_s9, %s830_s20 }
  0x81   : > { %p833_p8 = pneg %p832_p6 }
  0x82   : > { %p839_p4 = por %p838_p12, %p837_p9 }
  0x83   : > { %637 = vmatpush3.bf16.msra.mxu0 %v734_v4  ;;  %647 = vmatpush3.bf16.xpose.msra.mxu1 %v398_v10 }
  0x84   : > { %638 = vmatprep.subr.bf16.mxu0 %v923_v0  ;;  %648 = vmatprep.subr.bf16.mxu1 %v923_v0  ;;  %p840_p10 = pnand %p839_p4, %p833_p8 }
  0x87   : > { %639 = vmatpush3.bf16.msra.mxu0 %v735_v7 }
  0x8a   : > { %641 = vmatmul.mubr.msk.bf16.vlgmr.msra.gmra.mrb[0].mxu0 %vm325_vm2, %v284_v9 }
  0x8b   : > { %649 = vmatpush3.bf16.xpose.msra.mxu1 %v401_v12 }
  0x8c   : > { %650 = vmatprep.subr.bf16.mxu1 %v923_v0 }
  0x93   : > { %651 = vmatpush3.bf16.xpose.msra.mxu1 %v404_v14 }
 0x15d   : > { %v363_v15 = vpop.f32.mrb[0].mxu0 }
 0x15e   : > { %v369_v16 = vpack.c.bf16 %v363_v15, %v363_v15  ;;  %v642_v17 = vpop.f32.mrb[1].mxu0 }
 0x15f   : > { %v366_v18 = vpop.f32.mrb[2].mxu0 }
 0x160   : > { %v643_v19 = vpop.f32.mrb[3].mxu0  ;;  %653 = vmatmul.mubr.msk.bf16.vlgmr.msra.gmra.mrb[0].mxu1 %vm390_vm1, %v369_v16 }
 0x233   : > { %v440_v20 = vpop.f32.mrb[0].mxu1 }
 0x234   : > { %v446_v21 = vmul.f32 0.17677669, %v440_v20  ;;  %v654_v22 = vpop.f32.mrb[1].mxu1 }
 0x235   : > { %v443_v23 = vpop.f32.mrb[2].mxu1 }
 0x236   : > { %v655_v24 = vpop.f32.mrb[3].mxu1  ;;  %448 = vst.msk [vmem:[%s280_s7] sm:$0x3] %vm447_vm3, %v446_v21 }
 0x237   : > { %843 = shalt.err (!%p840_p10)
}
 0x238   : > { %s844_s28 = scalar_lea.hbm %s1170_s8, 32  ;;  %s848_s19 = scalar_lea.hbm %s1222_s3, 64 }
 0x239   : > { %p845_p7 = scmp.ne.s32.totalorder %s1170_s8, %s844_s28  ;;  %p849_p11 = scmp.lt.u32.totalorder %s1170_s8, %s1222_s3 }
 0x23a   : > { %p850_p2 = scmp.lt.u32.totalorder %s848_s19, %s844_s28  ;;  %p852_p13 = scmp.lt.u32.totalorder %s844_s28, %s1170_s8 }
 0x23b   : > { %p846_p1 = pnand %p845_p7, %p1246_p5 }
 0x23c   : > { %p851_p3 = por %p850_p2, %p849_p11 }
 0x23d   : > { %p847_p0 = pneg %p846_p1 }
 0x23e   : > { %p853_p6 = por %p852_p13, %p851_p3 }
 0x240   : > { %p854_p8 = pnand %p853_p6, %p847_p0 }
 0x242   : > { %857 = shalt.err (!%p854_p8)
}
 0x243   : > { %662 = dma.vmem_to_hbm [thread:$0]  (%p1246_p5), %s1172_s23, 32, %s1170_s8, %s450_s15  }
 0x244 PF: > { %s476_s1 = sand.u32 1, %s896_s12   ;;  %p1247_p9 = scmp.ne.s32.totalorder %s1237_s27, 0 }
 0x245   : > { %p1248_p12 = scmp.ge.s32.totalorder %s916_s17, 2  ;;  %s477_s11 = scalar_lea.sflag [#allocation4], %s476_s1 }
 0x247   : > { %p675_p4 = pnand %p1248_p12, %p1247_p9 }
 0x249   : > { %891 = dma.done.wait (!%p675_p4), %s477_s11, 32  }
 0x24a   : > { %893 = vsyncadd (!%p675_p4), %s477_s11, 4294967264  ;;  %s22_s17 = sadd.s32 1, %s916_s17   ;;  %s1249_s6 = sld [smem:[#allocation12_spill]] }
 0x24b   : > { %p19_p10 = scmp.ge.s32.totalorder %s22_s17, 4   ;;  %s1250_s14 = sld [smem:[#allocation14_spill]] }
 0x24c   : > { %s1251_s25 = sld [smem:[#allocation13_spill]]  ;;  %s1252_s12 = smov %s900_s13 }
 0x24d   : > { %s1254_s15 = smov %s912_s16  ;;  %21 = sbr.rel (!%p19_p10) target bundleno = 10 (0xa), region = 101 }
 0x250   : > { %s1253_s13 = smov %s1249_s6 }
 0x252   : > { %s1255_s16 = smov %s1251_s25 }
 0x254   :  { %482 = vsyncpa [#allocation3], 1 }
 0x255   :  { %484 = vsyncpa [#allocation3 + $0x1], 1 }
 0x256   :  { %485 = vsyncpa [#allocation6], 1 }
 0x257   :  { %487 = vsyncpa [#allocation6 + $0x1], 1 }
 0x258   :  { %488 = vsyncpa [#allocation4], 1 }
 0x259   :  { %490 = vsyncpa [#allocation4 + $0x1], 1 }

</bundles_post_ra>
